<compile_context>
chip_gen: v7x
topology: tpu7x:2x2x1
jax: 0.10.0
libtpu: 0.0.40
codegen_flags: <defaults>
</compile_context>

<pallas_src>
import functools

import jax
import jax.numpy as jnp
from jax.experimental import pallas as pl
from jax.experimental.pallas import tpu as pltpu


# ------------------------------ Pallas kernels ------------------------------

def _fused_forward_kernel(x_ref, cmask_ref, pool_ref, w1_ref, b1_ref,
                          w2_ref, b2_ref, wfc_ref, bfc_ref,
                          feat_ref, logits_ref, col_ref, h1_ref,
                          *, H, Wp, P):
    """One image per grid step: conv3x3+ReLU -> conv3x3+ReLU -> GAP -> fc.

    x_ref   : [2P + H*Wp, Cin] bf16 padded row slab (zero pad columns baked in;
              rows [0,P) and [P+H*Wp, 2P+H*Wp) are zero = SAME-pad rows + apron)
    cmask   : [H*Wp, 1] f32   1 on real pixels, 0 on the two pad columns
    pool    : [1, H*Wp] bf16  cmask / (H*W) (GAP weights; pad columns = 0)
    w{1,2}  : [9*Cin, Cout] bf16 folded conv taps, row = t*Cin + ci, t = ky*3+kx
    wfc     : [C2, 128] bf16 concatenated + lane-padded continual-fc heads
    col_ref : VMEM scratch [H*Wp, 9*C1] bf16 im2col slab (reused by both convs)
    h1_ref  : VMEM scratch [2P + H*Wp, C1] bf16 conv1 output slab (same layout
              as x_ref; never leaves VMEM)
    """
    f32 = jnp.float32
    Nr = H * Wp
    Cin = x_ref.shape[1]
    C1 = w1_ref.shape[1]
    C2 = w2_ref.shape[1]

    def build_cols(src_ref, c):
        # K-fold: copy 9 row-shifted slabs into lanes [t*c, (t+1)*c) once per
        # conv, so the conv itself is a single lane-dense, aligned MXU matmul.
        for t in range(9):
            dy, dx = t // 3 - 1, t % 3 - 1
            s = P + dy * Wp + dx                      # static row shift per tap
            col_ref[:, t * c:(t + 1) * c] = src_ref[s:s + Nr, :]

    # ---- conv1: ONE (Nr, 9*Cin) @ (9*Cin, C1) matmul, bias + ReLU ----
    build_cols(x_ref, Cin)
    acc1 = jnp.dot(col_ref[:, :9 * Cin], w1_ref[...],
                   preferred_element_type=f32)
    # re-zero the pad columns so h1 acts as SAME padding for conv2
    h1 = jnp.maximum(acc1 + b1_ref[...], 0.0) * cmask_ref[...]

    # park h1 in the padded slab: zero ONLY the two edge pad regions (P rows
    # each); the interior is fully overwritten.
    h1_ref[0:P, :] = jnp.zeros((P, C1), h1_ref.dtype)
    h1_ref[P + Nr:2 * P + Nr, :] = jnp.zeros((P, C1), h1_ref.dtype)
    h1_ref[P:P + Nr, :] = h1.astype(h1_ref.dtype)

    # ---- conv2: ONE (Nr, 9*C1) @ (9*C1, C2) matmul, bias + ReLU ----
    build_cols(h1_ref, C1)
    acc2 = jnp.dot(col_ref[...], w2_ref[...], preferred_element_type=f32)
    h2 = jnp.maximum(acc2 + b2_ref[...], 0.0).astype(jnp.bfloat16)

    # ---- global average pool as an MXU matmul (mask + 1/(H*W) baked in) ----
    feats = jnp.dot(pool_ref[...], h2, preferred_element_type=f32)   # [1, C2]
    feat_ref[...] = feats

    # ---- continual fc: all heads concatenated, lane-dense 128-wide store ----
    logits_ref[...] = (jnp.dot(feats.astype(wfc_ref.dtype), wfc_ref[...],
                               preferred_element_type=f32) + bfc_ref[...])


def _fc_kernel(x_ref, w_ref, b_ref, o_ref):
    # x_ref: [B, D] f32 features ; w_ref: [D, 128] bf16 ; o_ref: [B, 128] f32
    o_ref[...] = (jnp.dot(x_ref[...].astype(w_ref.dtype), w_ref[...],
                          preferred_element_type=jnp.float32) + b_ref[...])


# ------------------------------ glue / wrappers -----------------------------

def _backbone_and_fc(params, x_nchw):
    B, Cin, H, W = x_nchw.shape
    Wp = W + 2                              # zero pad column on each side
    Nr = H * Wp                             # conv-output rows per image
    P = pl.cdiv(Wp + 1, 16) * 16            # 16-aligned pad-row + apron region
    Nslab = 2 * P + Nr
    C1 = params["w1"].shape[1]
    C2 = params["w2"].shape[1]
    Cpad = params["wfc"].shape[1]

    # NCHW -> channels-last padded row slab [B, Nslab, Cin]: one zero column on
    # each side of every row (replaces all per-tap edge masks) and P zero rows
    # above/below each image (SAME-pad rows + in-bounds slice apron).
    xh = jnp.pad(x_nchw.transpose(0, 2, 3, 1), ((0, 0), (0, 0), (1, 1), (0, 0)))
    slab = jnp.pad(xh.reshape(B, Nr, Cin), ((0, 0), (P, P), (0, 0)))
    slab = slab.astype(jnp.bfloat16)

    xcol = jnp.arange(Nr, dtype=jnp.int32) % Wp
    interior = ((xcol >= 1) & (xcol <= W)).astype(jnp.float32)
    cmask = interior.reshape(Nr, 1)                                   # f32
    pool = (interior * (1.0 / (H * W))).astype(jnp.bfloat16).reshape(1, Nr)

    flops = 2 * B * Nr * (9 * Cin * C1 + 9 * C1 * C2 + C2) + 2 * B * C2 * Cpad
    bytes_accessed = (slab.size * 2 + cmask.size * 4 + pool.size * 2
                      + 2 * (params["w1"].size + params["w2"].size
                             + params["wfc"].size)
                      + 4 * (params["b1"].size + params["b2"].size
                             + params["bfc"].size)
                      + 4 * B * (C2 + Cpad))

    kernel = functools.partial(_fused_forward_kernel, H=H, Wp=Wp, P=P)
    feats3, logits3 = pl.pallas_call(
        kernel,
        out_shape=(jax.ShapeDtypeStruct((B, 1, C2), jnp.float32),
                   jax.ShapeDtypeStruct((B, 1, Cpad), jnp.float32)),
        grid=(B,),
        in_specs=[
            pl.BlockSpec((None, Nslab, Cin), lambda b: (b, 0, 0)),   # x slab
            pl.BlockSpec((Nr, 1), lambda b: (0, 0)),                 # col mask
            pl.BlockSpec((1, Nr), lambda b: (0, 0)),                 # pool vec
            pl.BlockSpec((9 * Cin, C1), lambda b: (0, 0)),           # w1 folded
            pl.BlockSpec((1, C1), lambda b: (0, 0)),                 # b1
            pl.BlockSpec((9 * C1, C2), lambda b: (0, 0)),            # w2 folded
            pl.BlockSpec((1, C2), lambda b: (0, 0)),                 # b2
            pl.BlockSpec((C2, Cpad), lambda b: (0, 0)),              # wfc
            pl.BlockSpec((1, Cpad), lambda b: (0, 0)),               # bfc
        ],
        out_specs=(pl.BlockSpec((None, 1, C2), lambda b: (b, 0, 0)),
                   pl.BlockSpec((None, 1, Cpad), lambda b: (b, 0, 0))),
        scratch_shapes=[pltpu.VMEM((Nr, 9 * C1), jnp.bfloat16),   # im2col slab
                        pltpu.VMEM((Nslab, C1), jnp.bfloat16)],   # h1 slab
        compiler_params=pltpu.CompilerParams(
            dimension_semantics=("parallel",),
            vmem_limit_bytes=32 * 1024 * 1024),
        cost_estimate=pl.CostEstimate(flops=flops, transcendentals=0,
                                      bytes_accessed=bytes_accessed),
    )(slab, cmask, pool,
      params["w1"], params["b1"], params["w2"], params["b2"],
      params["wfc"], params["bfc"])
    return feats3[:, 0, :], logits3[:, 0, :]


def _continual_fc(features, params):
    B = features.shape[0]
    Cpad = params["wfc"].shape[1]
    return pl.pallas_call(
        _fc_kernel,
        out_shape=jax.ShapeDtypeStruct((B, Cpad), jnp.float32),
        in_specs=[pl.BlockSpec(memory_space=pltpu.MemorySpace.VMEM)] * 3,
        out_specs=pl.BlockSpec(memory_space=pltpu.MemorySpace.VMEM),
    )(features, params["wfc"], params["bfc"])


# ---------------------- FinetuneIncrementalNet.forward ----------------------

def finetune_incremental_net_forward(params, x, bcb_no_grad=False, fc_only=False):
    """Mirrors FinetuneIncrementalNet.forward (BaseNet + SimpleContinualLinear).

    fc_only=True : x is a feature tensor [B, D]; returns {'logits','old_logits'}.
    otherwise    : x is an image batch NCHW; returns {'logits','features'}.
    bcb_no_grad only affects autograd in PyTorch - a no-op for inference here.
    """
    n_tot, n_old = params["n_total"], params["n_old"]
    if fc_only:
        logits_p = _continual_fc(x, params)
        # old_fc is a deepcopy of head 0 and stays identical here, so its
        # logits are a slice of the single fused fc matmul.
        # TODO(synk): if old_fc ever diverges from head 0 after training, pass
        # its weights separately instead of slicing.
        return {"logits": logits_p[:, :n_tot],
                "old_logits": logits_p[:, :n_old]}
    del bcb_no_grad
    feats, logits_p = _backbone_and_fc(params, x)
    return {"logits": logits_p[:, :n_tot], "features": feats}


# --------------------------- deterministic params ---------------------------

def init_params(cin=4, c1=16, feat_dim=32, classes_per_head=(5, 5)):
    """Raw f32 PyTorch-layout parameters."""
    key = jax.random.PRNGKey(0)
    k1, k2, k3, k4 = jax.random.split(key, 4)
    c0, c1cls = classes_per_head
    return {
        "conv1_w": jax.random.normal(k1, (c1, cin, 3, 3), jnp.float32) * 0.05,
        "conv1_b": jnp.zeros((c1,), jnp.float32),
        "conv2_w": jax.random.normal(k2, (feat_dim, c1, 3, 3), jnp.float32) * 0.05,
        "conv2_b": jnp.zeros((feat_dim,), jnp.float32),
        # SimpleContinualLinear init: trunc_normal_(std=0.02), bias=0; [out, in]
        "fc_w0": jax.random.truncated_normal(
            k3, -2.0, 2.0, (c0, feat_dim), jnp.float32) * 0.02,
        "fc_b0": jnp.zeros((c0,), jnp.float32),
        "fc_w1": jax.random.truncated_normal(
            k4, -2.0, 2.0, (c1cls, feat_dim), jnp.float32) * 0.02,
        "fc_b1": jnp.zeros((c1cls,), jnp.float32),
    }


def prepare_params(raw):
    """One-time repack (hoisted out of the per-call wrapper): conv taps folded
    into the contraction dim as [9*Cin, Cout] bf16, continual-fc heads
    concatenated and zero-padded to a lane-dense [D, 128] bf16 weight."""
    def conv_fold(w_oihw):
        cout, cin = w_oihw.shape[:2]
        # [O,I,ky,kx] -> [ky,kx,I,O] -> [9*I, O], row index = (ky*3+kx)*I + i
        return (w_oihw.transpose(2, 3, 1, 0).reshape(9 * cin, cout)
                .astype(jnp.bfloat16))

    wfc = jnp.concatenate([raw["fc_w0"], raw["fc_w1"]], axis=0)   # [Ctot, D]
    bfc = jnp.concatenate([raw["fc_b0"], raw["fc_b1"]])
    n_total, d = wfc.shape
    n_old = raw["fc_b0"].shape[0]
    cpad = max(128, pl.cdiv(int(n_total), 128) * 128)
    wfc_p = jnp.zeros((d, cpad), jnp.float32).at[:, :n_total].set(wfc.T)
    bfc_p = jnp.zeros((1, cpad), jnp.float32).at[0, :n_total].set(bfc)
    return {
        "w1": conv_fold(raw["conv1_w"]), "b1": raw["conv1_b"].reshape(1, -1),
        "w2": conv_fold(raw["conv2_w"]), "b2": raw["conv2_b"].reshape(1, -1),
        "wfc": wfc_p.astype(jnp.bfloat16), "bfc": bfc_p,
        "n_total": int(n_total), "n_old": int(n_old),
    }


# ------------------------------ reference (JAX) ------------------------------

def _ref_forward(raw, x):
    dn = ("NCHW", "OIHW", "NCHW")
    h = jax.lax.conv_general_dilated(x, raw["conv1_w"], (1, 1), "SAME",
                                     dimension_numbers=dn)
    h = jnp.maximum(h + raw["conv1_b"][None, :, None, None], 0.0)
    h = jax.lax.conv_general_dilated(h, raw["conv2_w"], (1, 1), "SAME",
                                     dimension_numbers=dn)
    h = jnp.maximum(h + raw["conv2_b"][None, :, None, None], 0.0)
    feats = h.mean(axis=(2, 3))
    w = jnp.concatenate([raw["fc_w0"], raw["fc_w1"]], axis=0)
    b = jnp.concatenate([raw["fc_b0"], raw["fc_b1"]])
    return {"logits": feats @ w.T + b, "features": feats}


# ----------------------------------- main -----------------------------------

if __name__ == "__main__":
    raw = init_params(cin=4, c1=16, feat_dim=32, classes_per_head=(5, 5))
    params = prepare_params(raw)
    x = jax.random.normal(jax.random.PRNGKey(0), (2, 4, 16, 16), jnp.float32)

    # main path: fused convnet features + continual fc
    out = finetune_incremental_net_forward(params, x, bcb_no_grad=True)
    jax.block_until_ready(out["logits"])
    jax.block_until_ready(out["features"])
    assert out["logits"].shape == (2, 10)
    assert out["features"].shape == (2, 32)

    # fc_only path (precomputed features, includes old_fc logits)
    out_fc = finetune_incremental_net_forward(params, out["features"],
                                              fc_only=True)
    jax.block_until_ready(out_fc["logits"])
    assert out_fc["logits"].shape == (2, 10)
    assert out_fc["old_logits"].shape == (2, 5)

    # numerical check vs. a pure-JAX f32 reference (bf16 MXU inputs -> loosened
    # tolerance compared with an all-f32 path)
    ref = _ref_forward(raw, x)
    assert jnp.allclose(out["features"], ref["features"], atol=3e-2, rtol=3e-2)
    assert jnp.allclose(out["logits"], ref["logits"], atol=3e-2, rtol=3e-2)
    assert jnp.allclose(out_fc["old_logits"], out["logits"][:, :5], atol=1e-5)

    print("KERNEL_OK")
</pallas_src>

<mosaic_0001>
module attributes {stable_mosaic.version = 11 : i64} {
  func.func @_fused_forward_kernel(%arg0: i32, %arg1: memref<1x352x4xbf16, #tpu.memory_space<vmem>>, %arg2: memref<288x1xf32, #tpu.memory_space<vmem>>, %arg3: memref<1x288xbf16, #tpu.memory_space<vmem>>, %arg4: memref<36x16xbf16, #tpu.memory_space<vmem>>, %arg5: memref<1x16xf32, #tpu.memory_space<vmem>>, %arg6: memref<144x32xbf16, #tpu.memory_space<vmem>>, %arg7: memref<1x32xf32, #tpu.memory_space<vmem>>, %arg8: memref<32x128xbf16, #tpu.memory_space<vmem>>, %arg9: memref<1x128xf32, #tpu.memory_space<vmem>>, %arg10: memref<1x1x32xf32, #tpu.memory_space<vmem>>, %arg11: memref<1x1x128xf32, #tpu.memory_space<vmem>>, %arg12: memref<288x144xbf16, #tpu.memory_space<vmem>>, %arg13: memref<352x16xbf16, #tpu.memory_space<vmem>>) attributes {dimension_semantics = [#tpu.dimension_semantics<parallel>], iteration_bounds = array<i64: 2>, scalar_prefetch = 0 : i64, scratch_operands = 2 : i64, tpu.core_type = #tpu.core_type<tc>, window_params = [{transform_indices = @transform_0, window_bounds = array<i64: 1, 352, 4>}, {pipeline_mode = #tpu.pipeline_mode<synchronous>, transform_indices = @transform_1, window_bounds = array<i64: 288, 1>}, {pipeline_mode = #tpu.pipeline_mode<synchronous>, transform_indices = @transform_2, window_bounds = array<i64: 1, 288>}, {pipeline_mode = #tpu.pipeline_mode<synchronous>, transform_indices = @transform_3, window_bounds = array<i64: 36, 16>}, {pipeline_mode = #tpu.pipeline_mode<synchronous>, transform_indices = @transform_4, window_bounds = array<i64: 1, 16>}, {pipeline_mode = #tpu.pipeline_mode<synchronous>, transform_indices = @transform_5, window_bounds = array<i64: 144, 32>}, {pipeline_mode = #tpu.pipeline_mode<synchronous>, transform_indices = @transform_6, window_bounds = array<i64: 1, 32>}, {pipeline_mode = #tpu.pipeline_mode<synchronous>, transform_indices = @transform_7, window_bounds = array<i64: 32, 128>}, {pipeline_mode = #tpu.pipeline_mode<synchronous>, transform_indices = @transform_8, window_bounds = array<i64: 1, 128>}, {transform_indices = @transform_9, window_bounds = array<i64: 1, 1, 32>}, {transform_indices = @transform_10, window_bounds = array<i64: 1, 1, 128>}]} {
    %c0 = arith.constant 0 : index
    %c13 = arith.constant 13 : index
    %c0_0 = arith.constant 0 : index
    %0 = vector.load %arg1[%c0, %c13, %c0_0] : memref<1x352x4xbf16, #tpu.memory_space<vmem>>, vector<1x288x4xbf16>
    %1 = vector.shape_cast %0 : vector<1x288x4xbf16> to vector<288x4xbf16>
    %c0_1 = arith.constant 0 : index
    %c0_2 = arith.constant 0 : index
    %2 = vector.load %arg12[%c0_1, %c0_2] : memref<288x144xbf16, #tpu.memory_space<vmem>>, vector<288x4xbf16>
    tpu.vector_store %arg12[%c0_1, %c0_2], %1 {strides = array<i32>} : memref<288x144xbf16, #tpu.memory_space<vmem>>, vector<288x4xbf16>,
    %c0_3 = arith.constant 0 : index
    %c14 = arith.constant 14 : index
    %c0_4 = arith.constant 0 : index
    %3 = vector.load %arg1[%c0_3, %c14, %c0_4] : memref<1x352x4xbf16, #tpu.memory_space<vmem>>, vector<1x288x4xbf16>
    %4 = vector.shape_cast %3 : vector<1x288x4xbf16> to vector<288x4xbf16>
    %c0_5 = arith.constant 0 : index
    %c4 = arith.constant 4 : index
    %5 = vector.load %arg12[%c0_5, %c4] : memref<288x144xbf16, #tpu.memory_space<vmem>>, vector<288x4xbf16>
    tpu.vector_store %arg12[%c0_5, %c4], %4 {strides = array<i32>} : memref<288x144xbf16, #tpu.memory_space<vmem>>, vector<288x4xbf16>,
    %c0_6 = arith.constant 0 : index
    %c15 = arith.constant 15 : index
    %c0_7 = arith.constant 0 : index
    %6 = vector.load %arg1[%c0_6, %c15, %c0_7] : memref<1x352x4xbf16, #tpu.memory_space<vmem>>, vector<1x288x4xbf16>
    %7 = vector.shape_cast %6 : vector<1x288x4xbf16> to vector<288x4xbf16>
    %c0_8 = arith.constant 0 : index
    %c8 = arith.constant 8 : index
    %8 = vector.load %arg12[%c0_8, %c8] : memref<288x144xbf16, #tpu.memory_space<vmem>>, vector<288x4xbf16>
    tpu.vector_store %arg12[%c0_8, %c8], %7 {strides = array<i32>} : memref<288x144xbf16, #tpu.memory_space<vmem>>, vector<288x4xbf16>,
    %c0_9 = arith.constant 0 : index
    %c31 = arith.constant 31 : index
    %c0_10 = arith.constant 0 : index
    %9 = vector.load %arg1[%c0_9, %c31, %c0_10] : memref<1x352x4xbf16, #tpu.memory_space<vmem>>, vector<1x288x4xbf16>
    %10 = vector.shape_cast %9 : vector<1x288x4xbf16> to vector<288x4xbf16>
    %c0_11 = arith.constant 0 : index
    %c12 = arith.constant 12 : index
    %11 = vector.load %arg12[%c0_11, %c12] : memref<288x144xbf16, #tpu.memory_space<vmem>>, vector<288x4xbf16>
    tpu.vector_store %arg12[%c0_11, %c12], %10 {strides = array<i32>} : memref<288x144xbf16, #tpu.memory_space<vmem>>, vector<288x4xbf16>,
    %c0_12 = arith.constant 0 : index
    %c32 = arith.constant 32 : index
    %c0_13 = arith.constant 0 : index
    %12 = vector.load %arg1[%c0_12, %c32, %c0_13] : memref<1x352x4xbf16, #tpu.memory_space<vmem>>, vector<1x288x4xbf16>
    %13 = vector.shape_cast %12 : vector<1x288x4xbf16> to vector<288x4xbf16>
    %c0_14 = arith.constant 0 : index
    %c16 = arith.constant 16 : index
    %14 = vector.load %arg12[%c0_14, %c16] : memref<288x144xbf16, #tpu.memory_space<vmem>>, vector<288x4xbf16>
    tpu.vector_store %arg12[%c0_14, %c16], %13 {strides = array<i32>} : memref<288x144xbf16, #tpu.memory_space<vmem>>, vector<288x4xbf16>,
    %c0_15 = arith.constant 0 : index
    %c33 = arith.constant 33 : index
    %c0_16 = arith.constant 0 : index
    %15 = vector.load %arg1[%c0_15, %c33, %c0_16] : memref<1x352x4xbf16, #tpu.memory_space<vmem>>, vector<1x288x4xbf16>
    %16 = vector.shape_cast %15 : vector<1x288x4xbf16> to vector<288x4xbf16>
    %c0_17 = arith.constant 0 : index
    %c20 = arith.constant 20 : index
    %17 = vector.load %arg12[%c0_17, %c20] : memref<288x144xbf16, #tpu.memory_space<vmem>>, vector<288x4xbf16>
    tpu.vector_store %arg12[%c0_17, %c20], %16 {strides = array<i32>} : memref<288x144xbf16, #tpu.memory_space<vmem>>, vector<288x4xbf16>,
    %c0_18 = arith.constant 0 : index
    %c49 = arith.constant 49 : index
    %c0_19 = arith.constant 0 : index
    %18 = vector.load %arg1[%c0_18, %c49, %c0_19] : memref<1x352x4xbf16, #tpu.memory_space<vmem>>, vector<1x288x4xbf16>
    %19 = vector.shape_cast %18 : vector<1x288x4xbf16> to vector<288x4xbf16>
    %c0_20 = arith.constant 0 : index
    %c24 = arith.constant 24 : index
    %20 = vector.load %arg12[%c0_20, %c24] : memref<288x144xbf16, #tpu.memory_space<vmem>>, vector<288x4xbf16>
    tpu.vector_store %arg12[%c0_20, %c24], %19 {strides = array<i32>} : memref<288x144xbf16, #tpu.memory_space<vmem>>, vector<288x4xbf16>,
    %c0_21 = arith.constant 0 : index
    %c50 = arith.constant 50 : index
    %c0_22 = arith.constant 0 : index
    %21 = vector.load %arg1[%c0_21, %c50, %c0_22] : memref<1x352x4xbf16, #tpu.memory_space<vmem>>, vector<1x288x4xbf16>
    %22 = vector.shape_cast %21 : vector<1x288x4xbf16> to vector<288x4xbf16>
    %c0_23 = arith.constant 0 : index
    %c28 = arith.constant 28 : index
    %23 = vector.load %arg12[%c0_23, %c28] : memref<288x144xbf16, #tpu.memory_space<vmem>>, vector<288x4xbf16>
    tpu.vector_store %arg12[%c0_23, %c28], %22 {strides = array<i32>} : memref<288x144xbf16, #tpu.memory_space<vmem>>, vector<288x4xbf16>,
    %c0_24 = arith.constant 0 : index
    %c51 = arith.constant 51 : index
    %c0_25 = arith.constant 0 : index
    %24 = vector.load %arg1[%c0_24, %c51, %c0_25] : memref<1x352x4xbf16, #tpu.memory_space<vmem>>, vector<1x288x4xbf16>
    %25 = vector.shape_cast %24 : vector<1x288x4xbf16> to vector<288x4xbf16>
    %c0_26 = arith.constant 0 : index
    %c32_27 = arith.constant 32 : index
    %26 = vector.load %arg12[%c0_26, %c32_27] : memref<288x144xbf16, #tpu.memory_space<vmem>>, vector<288x4xbf16>
    tpu.vector_store %arg12[%c0_26, %c32_27], %25 {strides = array<i32>} : memref<288x144xbf16, #tpu.memory_space<vmem>>, vector<288x4xbf16>,
    %c0_28 = arith.constant 0 : index
    %c0_29 = arith.constant 0 : index
    %27 = vector.load %arg12[%c0_28, %c0_29] : memref<288x144xbf16, #tpu.memory_space<vmem>>, vector<288x36xbf16>
    %c0_30 = arith.constant 0 : index
    %c0_31 = arith.constant 0 : index
    %28 = vector.load %arg4[%c0_30, %c0_31] : memref<36x16xbf16, #tpu.memory_space<vmem>>, vector<36x16xbf16>
    %cst = arith.constant dense<0.000000e+00> : vector<288x16xf32>
    %29 = tpu.matmul %27, %28, %cst {dimension_numbers = #tpu.dot_dimension_numbers<[1], [0], [0], [1], [0, 0, 1, 1], [], []>} : vector<288x36xbf16>, vector<36x16xbf16>, vector<288x16xf32> -> vector<288x16xf32>
    %c0_32 = arith.constant 0 : index
    %c0_33 = arith.constant 0 : index
    %30 = vector.load %arg5[%c0_32, %c0_33] : memref<1x16xf32, #tpu.memory_space<vmem>>, vector<1x16xf32>
    %31 = vector.broadcast %30 : vector<1x16xf32> to vector<288x16xf32>
    %32 = arith.addf %29, %31 : vector<288x16xf32>
    %cst_34 = arith.constant 0.000000e+00 : f32
    %33 = vector.broadcast %cst_34 : f32 to vector<288x16xf32>
    %34 = arith.maximumf %32, %33 : vector<288x16xf32>
    %c0_35 = arith.constant 0 : index
    %c0_36 = arith.constant 0 : index
    %35 = vector.load %arg2[%c0_35, %c0_36] : memref<288x1xf32, #tpu.memory_space<vmem>>, vector<288x1xf32>
    %36 = vector.broadcast %35 : vector<288x1xf32> to vector<288x16xf32>
    %37 = arith.mulf %34, %36 : vector<288x16xf32>
    %cst_37 = arith.constant 0.000000e+00 : bf16
    %38 = vector.broadcast %cst_37 : bf16 to vector<32x16xbf16>
    %c0_38 = arith.constant 0 : index
    %c0_39 = arith.constant 0 : index
    %39 = vector.load %arg13[%c0_38, %c0_39] : memref<352x16xbf16, #tpu.memory_space<vmem>>, vector<32x16xbf16>
    tpu.vector_store %arg13[%c0_38, %c0_39], %38 {strides = array<i32>} : memref<352x16xbf16, #tpu.memory_space<vmem>>, vector<32x16xbf16>,
    %cst_40 = arith.constant 0.000000e+00 : bf16
    %40 = vector.broadcast %cst_40 : bf16 to vector<32x16xbf16>
    %c320 = arith.constant 320 : index
    %c0_41 = arith.constant 0 : index
    %41 = vector.load %arg13[%c320, %c0_41] : memref<352x16xbf16, #tpu.memory_space<vmem>>, vector<32x16xbf16>
    tpu.vector_store %arg13[%c320, %c0_41], %40 {strides = array<i32>} : memref<352x16xbf16, #tpu.memory_space<vmem>>, vector<32x16xbf16>,
    %42 = arith.truncf %37 : vector<288x16xf32> to vector<288x16xbf16>
    %c32_42 = arith.constant 32 : index
    %c0_43 = arith.constant 0 : index
    %43 = vector.load %arg13[%c32_42, %c0_43] : memref<352x16xbf16, #tpu.memory_space<vmem>>, vector<288x16xbf16>
    tpu.vector_store %arg13[%c32_42, %c0_43], %42 {strides = array<i32>} : memref<352x16xbf16, #tpu.memory_space<vmem>>, vector<288x16xbf16>,
    %c13_44 = arith.constant 13 : index
    %c0_45 = arith.constant 0 : index
    %44 = vector.load %arg13[%c13_44, %c0_45] : memref<352x16xbf16, #tpu.memory_space<vmem>>, vector<288x16xbf16>
    %c0_46 = arith.constant 0 : index
    %c0_47 = arith.constant 0 : index
    %45 = vector.load %arg12[%c0_46, %c0_47] : memref<288x144xbf16, #tpu.memory_space<vmem>>, vector<288x16xbf16>
    tpu.vector_store %arg12[%c0_46, %c0_47], %44 {strides = array<i32>} : memref<288x144xbf16, #tpu.memory_space<vmem>>, vector<288x16xbf16>,
    %c14_48 = arith.constant 14 : index
    %c0_49 = arith.constant 0 : index
    %46 = vector.load %arg13[%c14_48, %c0_49] : memref<352x16xbf16, #tpu.memory_space<vmem>>, vector<288x16xbf16>
    %c0_50 = arith.constant 0 : index
    %c16_51 = arith.constant 16 : index
    %47 = vector.load %arg12[%c0_50, %c16_51] : memref<288x144xbf16, #tpu.memory_space<vmem>>, vector<288x16xbf16>
    tpu.vector_store %arg12[%c0_50, %c16_51], %46 {strides = array<i32>} : memref<288x144xbf16, #tpu.memory_space<vmem>>, vector<288x16xbf16>,
    %c15_52 = arith.constant 15 : index
    %c0_53 = arith.constant 0 : index
    %48 = vector.load %arg13[%c15_52, %c0_53] : memref<352x16xbf16, #tpu.memory_space<vmem>>, vector<288x16xbf16>
    %c0_54 = arith.constant 0 : index
    %c32_55 = arith.constant 32 : index
    %49 = vector.load %arg12[%c0_54, %c32_55] : memref<288x144xbf16, #tpu.memory_space<vmem>>, vector<288x16xbf16>
    tpu.vector_store %arg12[%c0_54, %c32_55], %48 {strides = array<i32>} : memref<288x144xbf16, #tpu.memory_space<vmem>>, vector<288x16xbf16>,
    %c31_56 = arith.constant 31 : index
    %c0_57 = arith.constant 0 : index
    %50 = vector.load %arg13[%c31_56, %c0_57] : memref<352x16xbf16, #tpu.memory_space<vmem>>, vector<288x16xbf16>
    %c0_58 = arith.constant 0 : index
    %c48 = arith.constant 48 : index
    %51 = vector.load %arg12[%c0_58, %c48] : memref<288x144xbf16, #tpu.memory_space<vmem>>, vector<288x16xbf16>
    tpu.vector_store %arg12[%c0_58, %c48], %50 {strides = array<i32>} : memref<288x144xbf16, #tpu.memory_space<vmem>>, vector<288x16xbf16>,
    %c32_59 = arith.constant 32 : index
    %c0_60 = arith.constant 0 : index
    %52 = vector.load %arg13[%c32_59, %c0_60] : memref<352x16xbf16, #tpu.memory_space<vmem>>, vector<288x16xbf16>
    %c0_61 = arith.constant 0 : index
    %c64 = arith.constant 64 : index
    %53 = vector.load %arg12[%c0_61, %c64] : memref<288x144xbf16, #tpu.memory_space<vmem>>, vector<288x16xbf16>
    tpu.vector_store %arg12[%c0_61, %c64], %52 {strides = array<i32>} : memref<288x144xbf16, #tpu.memory_space<vmem>>, vector<288x16xbf16>,
    %c33_62 = arith.constant 33 : index
    %c0_63 = arith.constant 0 : index
    %54 = vector.load %arg13[%c33_62, %c0_63] : memref<352x16xbf16, #tpu.memory_space<vmem>>, vector<288x16xbf16>
    %c0_64 = arith.constant 0 : index
    %c80 = arith.constant 80 : index
    %55 = vector.load %arg12[%c0_64, %c80] : memref<288x144xbf16, #tpu.memory_space<vmem>>, vector<288x16xbf16>
    tpu.vector_store %arg12[%c0_64, %c80], %54 {strides = array<i32>} : memref<288x144xbf16, #tpu.memory_space<vmem>>, vector<288x16xbf16>,
    %c49_65 = arith.constant 49 : index
    %c0_66 = arith.constant 0 : index
    %56 = vector.load %arg13[%c49_65, %c0_66] : memref<352x16xbf16, #tpu.memory_space<vmem>>, vector<288x16xbf16>
    %c0_67 = arith.constant 0 : index
    %c96 = arith.constant 96 : index
    %57 = vector.load %arg12[%c0_67, %c96] : memref<288x144xbf16, #tpu.memory_space<vmem>>, vector<288x16xbf16>
    tpu.vector_store %arg12[%c0_67, %c96], %56 {strides = array<i32>} : memref<288x144xbf16, #tpu.memory_space<vmem>>, vector<288x16xbf16>,
    %c50_68 = arith.constant 50 : index
    %c0_69 = arith.constant 0 : index
    %58 = vector.load %arg13[%c50_68, %c0_69] : memref<352x16xbf16, #tpu.memory_space<vmem>>, vector<288x16xbf16>
    %c0_70 = arith.constant 0 : index
    %c112 = arith.constant 112 : index
    %59 = vector.load %arg12[%c0_70, %c112] : memref<288x144xbf16, #tpu.memory_space<vmem>>, vector<288x16xbf16>
    tpu.vector_store %arg12[%c0_70, %c112], %58 {strides = array<i32>} : memref<288x144xbf16, #tpu.memory_space<vmem>>, vector<288x16xbf16>,
    %c51_71 = arith.constant 51 : index
    %c0_72 = arith.constant 0 : index
    %60 = vector.load %arg13[%c51_71, %c0_72] : memref<352x16xbf16, #tpu.memory_space<vmem>>, vector<288x16xbf16>
    %c0_73 = arith.constant 0 : index
    %c128 = arith.constant 128 : index
    %61 = vector.load %arg12[%c0_73, %c128] : memref<288x144xbf16, #tpu.memory_space<vmem>>, vector<288x16xbf16>
    tpu.vector_store %arg12[%c0_73, %c128], %60 {strides = array<i32>} : memref<288x144xbf16, #tpu.memory_space<vmem>>, vector<288x16xbf16>,
    %c0_74 = arith.constant 0 : index
    %c0_75 = arith.constant 0 : index
    %62 = vector.load %arg12[%c0_74, %c0_75] : memref<288x144xbf16, #tpu.memory_space<vmem>>, vector<288x144xbf16>
    %c0_76 = arith.constant 0 : index
    %c0_77 = arith.constant 0 : index
    %63 = vector.load %arg6[%c0_76, %c0_77] : memref<144x32xbf16, #tpu.memory_space<vmem>>, vector<144x32xbf16>
    %cst_78 = arith.constant dense<0.000000e+00> : vector<288x32xf32>
    %64 = tpu.matmul %62, %63, %cst_78 {dimension_numbers = #tpu.dot_dimension_numbers<[1], [0], [0], [1], [0, 0, 1, 1], [], []>} : vector<288x144xbf16>, vector<144x32xbf16>, vector<288x32xf32> -> vector<288x32xf32>
    %c0_79 = arith.constant 0 : index
    %c0_80 = arith.constant 0 : index
    %65 = vector.load %arg7[%c0_79, %c0_80] : memref<1x32xf32, #tpu.memory_space<vmem>>, vector<1x32xf32>
    %66 = vector.broadcast %65 : vector<1x32xf32> to vector<288x32xf32>
    %67 = arith.addf %64, %66 : vector<288x32xf32>
    %cst_81 = arith.constant 0.000000e+00 : f32
    %68 = vector.broadcast %cst_81 : f32 to vector<288x32xf32>
    %69 = arith.maximumf %67, %68 : vector<288x32xf32>
    %70 = arith.truncf %69 : vector<288x32xf32> to vector<288x32xbf16>
    %c0_82 = arith.constant 0 : index
    %c0_83 = arith.constant 0 : index
    %71 = vector.load %arg3[%c0_82, %c0_83] : memref<1x288xbf16, #tpu.memory_space<vmem>>, vector<1x288xbf16>
    %cst_84 = arith.constant dense<0.000000e+00> : vector<1x32xf32>
    %72 = tpu.matmul %71, %70, %cst_84 {dimension_numbers = #tpu.dot_dimension_numbers<[1], [0], [0], [1], [0, 0, 1, 1], [], []>} : vector<1x288xbf16>, vector<288x32xbf16>, vector<1x32xf32> -> vector<1x32xf32>
    %c0_85 = arith.constant 0 : index
    %c0_86 = arith.constant 0 : index
    %c0_87 = arith.constant 0 : index
    %73 = vector.load %arg10[%c0_85, %c0_86, %c0_87] : memref<1x1x32xf32, #tpu.memory_space<vmem>>, vector<1x1x32xf32>
    %74 = vector.shape_cast %73 : vector<1x1x32xf32> to vector<1x32xf32>
    %75 = vector.shape_cast %72 : vector<1x32xf32> to vector<1x1x32xf32>
    tpu.vector_store %arg10[%c0_85, %c0_86, %c0_87], %75 {strides = array<i32>} : memref<1x1x32xf32, #tpu.memory_space<vmem>>, vector<1x1x32xf32>,
    %76 = arith.truncf %72 : vector<1x32xf32> to vector<1x32xbf16>
    %c0_88 = arith.constant 0 : index
    %c0_89 = arith.constant 0 : index
    %77 = vector.load %arg8[%c0_88, %c0_89] : memref<32x128xbf16, #tpu.memory_space<vmem>>, vector<32x128xbf16>
    %cst_90 = arith.constant dense<0.000000e+00> : vector<1x128xf32>
    %78 = tpu.matmul %76, %77, %cst_90 {dimension_numbers = #tpu.dot_dimension_numbers<[1], [0], [0], [1], [0, 0, 1, 1], [], []>} : vector<1x32xbf16>, vector<32x128xbf16>, vector<1x128xf32> -> vector<1x128xf32>
    %c0_91 = arith.constant 0 : index
    %c0_92 = arith.constant 0 : index
    %79 = vector.load %arg9[%c0_91, %c0_92] : memref<1x128xf32, #tpu.memory_space<vmem>>, vector<1x128xf32>
    %80 = arith.addf %78, %79 : vector<1x128xf32>
    %c0_93 = arith.constant 0 : index
    %c0_94 = arith.constant 0 : index
    %c0_95 = arith.constant 0 : index
    %81 = vector.load %arg11[%c0_93, %c0_94, %c0_95] : memref<1x1x128xf32, #tpu.memory_space<vmem>>, vector<1x1x128xf32>
    %82 = vector.shape_cast %81 : vector<1x1x128xf32> to vector<1x128xf32>
    %83 = vector.shape_cast %80 : vector<1x128xf32> to vector<1x1x128xf32>
    tpu.vector_store %arg11[%c0_93, %c0_94, %c0_95], %83 {strides = array<i32>} : memref<1x1x128xf32, #tpu.memory_space<vmem>>, vector<1x1x128xf32>,
    return
  }
  func.func @transform_0(%arg0: i32) -> (i32, i32, i32) {
    %c0_i32 = arith.constant 0 : i32
    %c0_i32_0 = arith.constant 0 : i32
    %c0_i32_1 = arith.constant 0 : i32
    return %arg0, %c0_i32, %c0_i32_0 : i32, i32, i32
  }
  func.func @transform_1(%arg0: i32) -> (i32, i32) {
    %c0_i32 = arith.constant 0 : i32
    %c0_i32_0 = arith.constant 0 : i32
    %c0_i32_1 = arith.constant 0 : i32
    return %c0_i32, %c0_i32_0 : i32, i32
  }
  func.func @transform_2(%arg0: i32) -> (i32, i32) {
    %c0_i32 = arith.constant 0 : i32
    %c0_i32_0 = arith.constant 0 : i32
    %c0_i32_1 = arith.constant 0 : i32
    return %c0_i32, %c0_i32_0 : i32, i32
  }
  func.func @transform_3(%arg0: i32) -> (i32, i32) {
    %c0_i32 = arith.constant 0 : i32
    %c0_i32_0 = arith.constant 0 : i32
    %c0_i32_1 = arith.constant 0 : i32
    return %c0_i32, %c0_i32_0 : i32, i32
  }
  func.func @transform_4(%arg0: i32) -> (i32, i32) {
    %c0_i32 = arith.constant 0 : i32
    %c0_i32_0 = arith.constant 0 : i32
    %c0_i32_1 = arith.constant 0 : i32
    return %c0_i32, %c0_i32_0 : i32, i32
  }
  func.func @transform_5(%arg0: i32) -> (i32, i32) {
    %c0_i32 = arith.constant 0 : i32
    %c0_i32_0 = arith.constant 0 : i32
    %c0_i32_1 = arith.constant 0 : i32
    return %c0_i32, %c0_i32_0 : i32, i32
  }
  func.func @transform_6(%arg0: i32) -> (i32, i32) {
    %c0_i32 = arith.constant 0 : i32
    %c0_i32_0 = arith.constant 0 : i32
    %c0_i32_1 = arith.constant 0 : i32
    return %c0_i32, %c0_i32_0 : i32, i32
  }
  func.func @transform_7(%arg0: i32) -> (i32, i32) {
    %c0_i32 = arith.constant 0 : i32
    %c0_i32_0 = arith.constant 0 : i32
    %c0_i32_1 = arith.constant 0 : i32
    return %c0_i32, %c0_i32_0 : i32, i32
  }
  func.func @transform_8(%arg0: i32) -> (i32, i32) {
    %c0_i32 = arith.constant 0 : i32
    %c0_i32_0 = arith.constant 0 : i32
    %c0_i32_1 = arith.constant 0 : i32
    return %c0_i32, %c0_i32_0 : i32, i32
  }
  func.func @transform_9(%arg0: i32) -> (i32, i32, i32) {
    %c0_i32 = arith.constant 0 : i32
    %c0_i32_0 = arith.constant 0 : i32
    %c0_i32_1 = arith.constant 0 : i32
    return %arg0, %c0_i32, %c0_i32_0 : i32, i32, i32
  }
  func.func @transform_10(%arg0: i32) -> (i32, i32, i32) {
    %c0_i32 = arith.constant 0 : i32
    %c0_i32_0 = arith.constant 0 : i32
    %c0_i32_1 = arith.constant 0 : i32
    return %arg0, %c0_i32, %c0_i32_0 : i32, i32, i32
  }
}

</mosaic_0001>

<bundles_post_ra>
// kernel: tpu_custom_call.1
= control target key start
LH: loop header
LB: loop body
LE: loop exit
PB: predicated region body
PF: predicated region fallthrough
CT: control target
= control target key end

     0   :  { %s9805_s0 = inlined_call_operand.vmem [shape: bf16[2,352,4], index: 0, kind: input, shape index: {}]   ;;  %s9806_s1 = inlined_call_operand.vmem [shape: f32[288,1], index: 1, kind: input, shape index: {}]   ;;  %s9807_s2 = inlined_call_operand.vmem [shape: bf16[1,288], index: 2, kind: input, shape index: {}]   ;;  %s9808_s3 = inlined_call_operand.vmem [shape: bf16[36,16], index: 3, kind: input, shape index: {}]   ;;  %s9809_s4 = inlined_call_operand.vmem [shape: f32[1,16], index: 4, kind: input, shape index: {}]   ;;  %s9810_s5 = inlined_call_operand.vmem [shape: bf16[144,32], index: 5, kind: input, shape index: {}]   ;;  %s9811_s6 = inlined_call_operand.vmem [shape: f32[1,32], index: 6, kind: input, shape index: {}]   ;;  %s9812_s7 = inlined_call_operand.vmem [shape: bf16[32,128], index: 7, kind: input, shape index: {}]   ;;  %s9813_s8 = inlined_call_operand.vmem [shape: f32[1,128], index: 8, kind: input, shape index: {}]   ;;  %s9814_s9 = inlined_call_operand.hbm [shape: f32[2,1,32], index: 9, kind: output, shape index: {0}]   ;;  %s9815_s10 = inlined_call_operand.hbm [shape: f32[2,1,128], index: 10, kind: output, shape index: {1}]  }
   0x1   :  { %9844 = sst [smem:[#allocation10_spill]] %s9805_s0 }
   0x2   :  { %16 = vsyncpa [#allocation5], 0 }
   0x3   :  { %18 = vsyncpa [#allocation5 + $0x1], 0 }
   0x4   :  { %19 = vsyncpa [#allocation7], 0 }
   0x5   :  { %21 = vsyncpa [#allocation7 + $0x1], 0  ;;  %s7106_s13 = smov 0   ;;  %s7108_s14 = smov 0  }
   0x6   :  { %s7110_s15 = smov 0   ;;  %s7112_s16 = smov 0  }
   0x7 LB: > { %s7127_s17 = sadd.s32 4294967295, %s7030_s16   ;;  %s6327_s18 = sadd.s32 4294967294, %s7030_s16   ;;  %s7030_s16 = sphi %s7112_s16, %s9877_s16   ;;  %s7026_s15 = sphi %s7110_s15, %s9876_s15   ;;  %s7022_s14 = sphi %s7108_s14, %s9875_s14   ;;  %s7018_s13 = sphi %s7106_s13, %s9874_s13  }
   0x8   : > { %s7131_s19 = sadd.s32 1, %s7030_s16   ;;  %s228_s20 = sadd.s32 1, %s7026_s15 }
   0x9   : > { %s225_s21 = ssub.s32 %s7030_s16, %s7131_s19  ;;  %p238_p0 = scmp.ne.s32.totalorder %s7026_s15, %s7022_s14 }
   0xa   : > { %p226_p1 = scmp.eq.s32.totalorder %s225_s21, 0  ;;  %p239_p2 = scmp.eq.s32.totalorder %s7127_s17, 1 }
   0xb   : > { %p244_p3 = scmp.ne.s32.totalorder %s7022_s14, %s7018_s13  ;;  %p245_p4 = scmp.eq.s32.totalorder %s6327_s18, 1 }
   0xc   : > { %s7142_s22 = scalar_select %p226_p1, %s7026_s15, %s228_s20  }
   0xd   : > { %p7144_p5 = por %p239_p2, %p238_p0  ;;  %p7148_p6 = por %p245_p4, %p244_p3 }
   0xe   : > { %p6330_p7 = scmp.ge.s32.totalorder %s7030_s16, 1  ;;  %p321_p8 = scmp.lt.s32.totalorder %s7030_s16, 3 }
  0x10   : > { %p322_p9 = pnand %p6330_p7, %p321_p8 }
  0x11   : > { %p362_p10 = scmp.lt.s32.totalorder (!%p322_p9), %s7127_s17, 1  ;;  %vm836_vm0 = vcmask (!%p322_p9), 1044480   ;;  %s9847_s0 = sld [smem:[#allocation10_spill]] (!%p322_p9)  ;;  %vm1077_vm1 = vsmask.f32 (!%p322_p9), 4352  ;;  %vm2726_vm3 = vcmask (!%p322_p9), 1046528  }
  0x12   : > { %325 = sbr.rel (%p322_p9) target bundleno = 1562 (0x61a), region = 56  ;;  %s7032_s30 = smov (!%p322_p9), 16   ;;  %vm2023_vm2 = vsmask.f32 (!%p322_p9), 7424  ;;  %vm2967_vm4 = vsmask.f32 (!%p322_p9), 6400 }
  0x13   : > { %s7033_s11 = smov (!%p322_p9), 4   ;;  %s7034_s12 = smov (!%p322_p9), 8   ;;  %vm498_vm5 = vsmask.f32 (!%p322_p9), 5376  ;;  %vm687_vm6 = vcmask (!%p322_p9), 31744   ;;  %vm3311_vm7 = vcmask (!%p322_p9), 1041408  }
  0x14   : > { %s7035_s18 = smov (!%p322_p9), 12   ;;  %s7036_s20 = smov (!%p322_p9), 20   ;;  %vm928_vm8 = vcmask (!%p322_p9), 64544   ;;  %vm1302_vm9 = vcmask (!%p322_p9), 97344   ;;  %vm1675_vm10 = vcmask (!%p322_p9), 130144   ;;  %vm1874_vm11 = vcmask (!%p322_p9), 162944  }
  0x15   : > { %s7037_s21 = smov (!%p322_p9), 24   ;;  %s9848_s27 = smov (!%p322_p9), 28   ;;  %vm2226_vm12 = vcmask (!%p322_p9), 195744   ;;  %vm2577_vm13 = vcmask (!%p322_p9), 228544   ;;  %vm2818_vm14 = vcmask (!%p322_p9), 261344   ;;  %vm3192_vm15 = vcmask (!%p322_p9), 294144  }
  0x16   : > { %s9849_s28 = smov (!%p322_p9), 32  }
  0x19   : > { %s363_s25 = scalar_select %p362_p10, %s7127_s17, 1 }
  0x1b   : > { %s6687_s26 = smul.u32 176, %s363_s25  ;;  %s9818_s25 = smov 28  }
  0x1d   : > { %s7159_s29 = scalar_lea.vmem %s9847_s0, %s6687_s26  ;;  %s9816_s26 = smov 32  }
  0x1e   : > { %v6751_v0 = vld [vmem:[%s7159_s29 + $0x10] sm:$0xff]   ;;  %v6752_v1 = vld [vmem:[%s7159_s29 + $0x18] sm:$0xff]   ;;  %v6753_v2 = vld [vmem:[%s7159_s29 + $0x4] sm:$0xf8]  }
  0x1f   : > { %1820 = vrot.lane.b32.xlu0 %v6751_v0, %s7032_s30  ;;  %1822 = vrot.lane.b32.xlu1 %v6752_v1, %s7032_s30  ;;  %v6754_v3 = vld [vmem:[%s7159_s29 + $0xc] sm:$0xff]   ;;  %v837_v4 = vrot.slane %v6753_v2, 3  ;;  %v6755_v6 = vld [vmem:[%s7159_s29 + $0x4] sm:$0xf8]  }
  0x20   : > { %v838_v5 = vrot.slane %v6754_v3, 3  ;;  %v6756_v7 = vld [vmem:[%s7159_s29 + $0xc] sm:$0xff]   ;;  %v1079_v9 = vshrl.u32 %v6755_v6, 16  ;;  %v1082_v10 = vshll.u32 %v6755_v6, 16  ;;  %v7171_v11 = vld [vmem:[%s7159_s29 + $0x14] sm:$0xff]   ;;  %v6761_v27 = vld [vmem:[%s7159_s29 + $0x1c] sm:$0xff]  }
  0x21   : > { %v6758_v12 = vld [vmem:[%s7159_s29 + $0x14] sm:$0xff]   ;;  %v1087_v13 = vshrl.u32 %v6756_v7, 16  ;;  %v1090_v14 = vshll.u32 %v6756_v7, 16  ;;  %v840_v17 = vrot.slane %v7171_v11, 3  ;;  %v6759_v26 = vld [vmem:[%s7159_s29 + $0xc] sm:$0xf8]  }
  0x22   : > { %v839_v8 = vsel %vm836_vm0, %v837_v4, %v838_v5  ;;  %v1081_v15 = vrot.slane %v1079_v9, 3  ;;  %v1084_v16 = vrot.slane %v1082_v10, 4  ;;  %v1096_v18 = vshrl.u32 %v6758_v12, 16  ;;  %v6760_v22 = vld [vmem:[%s7159_s29 + $0x14] sm:$0xff]   ;;  %v7192_v50 = vld [vmem:[%s7159_s29 + $0x20] sm:$0xff]   ;;  %v7207_v0 = vld [vmem:[%s7159_s29 + $0x28] sm:$0xff]  }
  0x23   : > { %874 = vrot.lane.b32.xlu0 %v839_v8, %s7033_s11  ;;  %v1089_v19 = vrot.slane %v1087_v13, 3  ;;  %v1092_v20 = vrot.slane %v1090_v14, 4  ;;  %v1099_v21 = vshll.u32 %v6758_v12, 16  ;;  %v841_v24 = vsel %vm836_vm0, %v838_v5, %v840_v17  ;;  %v6762_v32 = vld [vmem:[%s7159_s29 + $0x10] sm:$0xff]   ;;  %v6763_v47 = vld [vmem:[%s7159_s29 + $0x18] sm:$0xff]   ;;  %v6766_v63 = vld [vmem:[%s7159_s29 + $0x20] sm:$0xff]  }
  0x24   : > { %v1085_v23 = vor.u32 %v1084_v16, %v1081_v15  ;;  %v1098_v25 = vrot.slane %v1096_v18, 3  ;;  %v1460_v30 = vshrl.u32 %v6760_v22, 16  ;;  %v1463_v31 = vshll.u32 %v6760_v22, 16  ;;  %v6765_v58 = vld [vmem:[%s7159_s29 + $0x18] sm:$0xff]   ;;  %v6769_v13 = vld [vmem:[%s7159_s29 + $0x20] sm:$0xff]   ;;  %v7220_v18 = vld [vmem:[%s7159_s29 + $0x28] sm:$0xff]  }
  0x25   : > { %v1093_v28 = vor.u32 %v1092_v20, %v1089_v19  ;;  %v1101_v29 = vrot.slane %v1099_v21, 4  ;;  %v1452_v33 = vshrl.u32 %v6759_v26, 16  ;;  %v1455_v34 = vshll.u32 %v6759_v26, 16  ;;  %v6768_v9 = vld [vmem:[%s7159_s29 + $0x18] sm:$0xfe]   ;;  %v6772_v19 = vld [vmem:[%s7159_s29 + $0x20] sm:$0xff]  }
  0x26   : > { %v1469_v35 = vshrl.u32 %v6761_v27, 16  ;;  %v1472_v36 = vshll.u32 %v6761_v27, 16  ;;  %v1462_v39 = vrot.slane %v1460_v30, 3  ;;  %v1465_v40 = vrot.slane %v1463_v31, 4  ;;  %v6773_v22 = vld [vmem:[%s7159_s29 + $0x1c] sm:$0xff]  }
  0x27   : > { %876 = vrot.lane.b32.xlu0 %v841_v24, %s7033_s11  ;;  %v1094_v37 = vsel %vm1077_vm1, %v1085_v23, %v1093_v28  ;;  %v7185_v38 = vor.u32 %v1101_v29, %v1098_v25  ;;  %v1454_v41 = vrot.slane %v1452_v33, 3  ;;  %v1457_v42 = vrot.slane %v1455_v34, 4  ;;  %v6771_v25 = vld [vmem:[%s7159_s29 + $0x18] sm:$0xfe]   ;;  %v6774_v34 = vld [vmem:[%s7159_s29 + $0x28] sm:$0xff]  }
  0x28   : > { %1248 = vrot.lane.b32.xlu1 %v1094_v37, %s7034_s12  ;;  %v1471_v43 = vrot.slane %v1469_v35, 3  ;;  %v1474_v44 = vrot.slane %v1472_v36, 4  ;;  %v1466_v46 = vor.u32 %v1465_v40, %v1462_v39  ;;  %v2025_v48 = vshrl.u32 %v6762_v32, 16  ;;  %v7234_v36 = vld [vmem:[%s7159_s29 + $0x24] sm:$0xff]  }
  0x29   : > { %v1103_v45 = vsel %vm1077_vm1, %v1093_v28, %v7185_v38  ;;  %v2027_v49 = vshll.u32 %v6762_v32, 16  ;;  %v1458_v51 = vor.u32 %v1457_v42, %v1454_v41  ;;  %v2032_v54 = vshll.u32 %v6763_v47, 16 }
  0x2a   : > { %v7194_v52 = vor.u32 %v1474_v44, %v1471_v43  ;;  %v2036_v55 = vshrl.u32 %v6763_v47, 16  ;;  %v2040_v56 = vshll.u32 %v7192_v50, 16  ;;  %v2376_v1 = vshrl.u32 %v6765_v58, 16 }
  0x2b   : > { %v2029_v53 = vrot.slane %v2027_v49, 1  ;;  %v1467_v57 = vsel %vm1077_vm1, %v1458_v51, %v1466_v46  ;;  %v2034_v61 = vrot.slane %v2032_v54, 1  ;;  %v2378_v2 = vshll.u32 %v6765_v58, 16  ;;  %v6778_v54 = vld [vmem:[%s7159_s29 + $0x24] sm:$0xff]  }
  0x2c   : > { %1250 = vrot.lane.b32.xlu1 %v1103_v45, %s7034_s12  ;;  %1621 = vrot.lane.b32.xlu0 %v1467_v57, %s7035_s18  ;;  %v1476_v59 = vsel %vm1077_vm1, %v1466_v46, %v7194_v52  ;;  %v7203_v62 = vrot.slane %v2040_v56, 1  ;;  %v2383_v5 = vshll.u32 %v6766_v63, 16  ;;  %v2387_v6 = vshrl.u32 %v6766_v63, 16  ;;  %v6776_v45 = vld [vmem:[%s7159_s29 + $0x1c] sm:$0xff]   ;;  %v6779_v63 = vld [vmem:[%s7159_s29 + $0x2c] sm:$0xff]  }
  0x2d   : > { %v2030_v60 = vor.u32 %v2029_v53, %v2025_v48  ;;  %v2038_v4 = vor.u32 %v2036_v55, %v2034_v61  ;;  %v2380_v7 = vrot.slane %v2378_v2, 1  ;;  %v2391_v8 = vshll.u32 %v7207_v0, 16  ;;  %v6777_v53 = vld [vmem:[%s7159_s29 + $0x24] sm:$0xff]  }
  0x2e   : > { %v2385_v12 = vrot.slane %v2383_v5, 1  ;;  %v2727_v16 = vrot.slane %v6768_v9, 1  ;;  %v2728_v21 = vrot.slane %v6769_v13, 1  ;;  %v2730_v24 = vrot.slane %v7220_v18, 1  ;;  %v6782_v13 = vld [vmem:[%s7159_s29 + $0x28] sm:$0xff]  }
  0x2f   : > { %v2035_v3 = vsel %vm2023_vm2, %v2030_v60, %v2034_v61  ;;  %v2043_v10 = vsel %vm2023_vm2, %v2038_v4, %v7203_v62  ;;  %v2381_v14 = vor.u32 %v2380_v7, %v2376_v1  ;;  %v7217_v15 = vrot.slane %v2391_v8, 1 }
  0x30   : > { %1623 = vrot.lane.b32.xlu1 %v1476_v59, %s7035_s18  ;;  %2172 = vrot.lane.b32.xlu0 %v2035_v3, %s7036_s20  ;;  %v2389_v20 = vor.u32 %v2387_v6, %v2385_v12  ;;  %v2977_v26 = vshrl.u32 %v6772_v19, 16  ;;  %v2980_v28 = vshll.u32 %v6772_v19, 16  ;;  %v842_v29 = vrot.slane %v6773_v22, 3 }
  0x31   : > { %v2386_v23 = vsel %vm2023_vm2, %v2381_v14, %v2385_v12  ;;  %v2729_v30 = vsel %vm2726_vm3, %v2727_v16, %v2728_v21  ;;  %v2969_v31 = vshrl.u32 %v6771_v25, 16  ;;  %v2972_v32 = vshll.u32 %v6771_v25, 16 }
  0x32   : > { %v2394_v27 = vsel %vm2023_vm2, %v2389_v20, %v7217_v15  ;;  %v2979_v33 = vrot.slane %v2977_v26, 1  ;;  %v2982_v35 = vrot.slane %v2980_v28, 2  ;;  %v2986_v40 = vshrl.u32 %v6774_v34, 16  ;;  %v7267_v20 = vld [vmem:[%s7159_s29 + $0x30] sm:$0xff]   ;;  %v7281_v28 = vld [vmem:[%s7159_s29 + $0x38] sm:$0xff]  }
  0x33   : > { %v2971_v37 = vrot.slane %v2969_v31, 1  ;;  %v2974_v39 = vrot.slane %v2972_v32, 2  ;;  %v2989_v41 = vshll.u32 %v6774_v34, 16  ;;  %v2731_v42 = vsel %vm2726_vm3, %v2728_v21, %v2730_v24  ;;  %v6788_v34 = vld [vmem:[%s7159_s29 + $0x30] sm:$0xff]  }
  0x34   : > { %2174 = vrot.lane.b32.xlu1 %v2043_v10, %s7036_s20  ;;  %2523 = vrot.lane.b32.xlu0 %v2386_v23, %s7037_s21  ;;  %v2983_v43 = vor.u32 %v2982_v35, %v2979_v33  ;;  %v844_v44 = vrot.slane %v7234_v36, 3  ;;  %v2988_v47 = vrot.slane %v2986_v40, 1  ;;  %v1105_v49 = vshrl.u32 %v6776_v45, 16  ;;  %v6781_v35 = vld [vmem:[%s7159_s29 + $0x28] sm:$0xff]  }
  0x35   : > { %v2975_v46 = vor.u32 %v2974_v39, %v2971_v37  ;;  %v2991_v48 = vrot.slane %v2989_v41, 2  ;;  %v1108_v51 = vshll.u32 %v6776_v45, 16  ;;  %v843_v56 = vsel %vm836_vm0, %v840_v17, %v842_v29  ;;  %v6786_v41 = vld [vmem:[%s7159_s29 + $0x30] sm:$0xff]   ;;  %v6790_v45 = vld [vmem:[%s7159_s29 + $0x38] sm:$0xff]  }
  0x36   : > { %v1107_v58 = vrot.slane %v1105_v49, 3  ;;  %v1114_v60 = vshrl.u32 %v6777_v53, 16  ;;  %v1117_v61 = vshll.u32 %v6777_v53, 16  ;;  %v1478_v2 = vshrl.u32 %v6778_v54, 16  ;;  %v7303_v49 = vld [vmem:[%s7159_s29 + $0x38] sm:$0xff]  }
  0x37   : > { %v2984_v55 = vsel %vm2967_vm4, %v2975_v46, %v2983_v43  ;;  %v7250_v57 = vor.u32 %v2991_v48, %v2988_v47  ;;  %v1110_v59 = vrot.slane %v1108_v51, 4  ;;  %v1481_v3 = vshll.u32 %v6778_v54, 16  ;;  %v6792_v51 = vld [vmem:[%s7159_s29 + $0x2c] sm:$0xff]  }
  0x38   : > { %2525 = vrot.lane.b32.xlu1 %v2394_v27, %s7037_s21  ;;  %2764 = vrot.lane.b32.xlu0 %v2729_v30, %s9818_s25  ;;  %v1116_v11 = vrot.slane %v1114_v60, 3  ;;  %v1119_v17 = vrot.slane %v1117_v61, 4  ;;  %v1487_v5 = vshrl.u32 %v6779_v63, 16  ;;  %v1480_v6 = vrot.slane %v1478_v2, 3  ;;  %v6793_v2 = vld [vmem:[%s7159_s29 + $0x34] sm:$0xff]  }
  0x39   : > { %v2993_v1 = vsel %vm2967_vm4, %v2983_v43, %v7250_v57  ;;  %v1111_v4 = vor.u32 %v1110_v59, %v1107_v58  ;;  %v1483_v7 = vrot.slane %v1481_v3, 4  ;;  %v1490_v8 = vshll.u32 %v6779_v63, 16  ;;  %v6789_v63 = vld [vmem:[%s7159_s29 + $0x2c] sm:$0xff]  }
  0x3a   : > { %v845_v9 = vsel %vm836_vm0, %v842_v29, %v844_v44  ;;  %v7261_v10 = vor.u32 %v1119_v17, %v1116_v11  ;;  %v1489_v12 = vrot.slane %v1487_v5, 3  ;;  %v2044_v21 = vshrl.u32 %v7192_v50, 16  ;;  %v6780_v29 = vld [vmem:[%s7159_s29 + $0x20] sm:$0xff]  }
  0x3b   : > { %v1112_v14 = vsel %vm1077_vm1, %v7185_v38, %v1111_v4  ;;  %v1484_v16 = vor.u32 %v1483_v7, %v1480_v6  ;;  %v1492_v19 = vrot.slane %v1490_v8, 4  ;;  %v2048_v25 = vshll.u32 %v6782_v13, 16  ;;  %v6784_v38 = vld [vmem:[%s7159_s29 + $0x30] sm:$0xff]  }
  0x3c   : > { %2766 = vrot.lane.b32.xlu1 %v2731_v42, %s9818_s25  ;;  %3138 = vrot.lane.b32.xlu0 %v2984_v55, %s9816_s26  ;;  %v1121_v22 = vsel %vm1077_vm1, %v1111_v4, %v7261_v10  ;;  %v2056_v27 = vshll.u32 %v7267_v20, 16  ;;  %v2052_v31 = vshrl.u32 %v6782_v13, 16  ;;  %v2399_v32 = vshll.u32 %v6784_v38, 16  ;;  %v6794_v7 = vld [vmem:[%s7159_s29 + $0x34] sm:$0xff]  }
  0x3d   : > { %v7274_v23 = vor.u32 %v1492_v19, %v1489_v12  ;;  %v1485_v26 = vsel %vm1077_vm1, %v7194_v52, %v1484_v16  ;;  %v2050_v30 = vrot.slane %v2048_v25, 1  ;;  %v2046_v33 = vor.u32 %v2044_v21, %v7203_v62  ;;  %v7324_v8 = vld [vmem:[%s7159_s29 + $0x34] sm:$0xff]  }
  0x3e   : > { %v2395_v52 = vshrl.u32 %v7207_v0, 16  ;;  %v7293_v37 = vrot.slane %v2056_v27, 1  ;;  %v2403_v39 = vshrl.u32 %v6784_v38, 16  ;;  %v2407_v40 = vshll.u32 %v7281_v28, 16 }
  0x3f   : > { %v1494_v50 = vsel %vm1077_vm1, %v1484_v16, %v7274_v23  ;;  %v2054_v42 = vor.u32 %v2052_v31, %v2050_v30  ;;  %v2401_v43 = vrot.slane %v2399_v32, 1  ;;  %v2051_v62 = vsel %vm2023_vm2, %v2046_v33, %v2050_v30 }
  0x40   : > { %878 = vrot.lane.b32.xlu1 %v843_v56, %s7033_s11  ;;  %3140 = vrot.lane.b32.xlu0 %v2993_v1, %s9816_s26  ;;  %v2397_v0 = vor.u32 %v2395_v52, %v7217_v15  ;;  %v2995_v46 = vshrl.u32 %v6788_v34, 16  ;;  %v2998_v47 = vshll.u32 %v6788_v34, 16  ;;  %v2732_v48 = vrot.slane %v6786_v41, 1  ;;  %v6798_v52 = vld [vmem:[%s7159_s29 + $0x38] sm:$0xff]   ;;  %v7355_v41 = vld [vmem:[%s7159_s29 + $0x40] sm:$0xff]  }
  0x41   : > { %v2059_v53 = vsel %vm2023_vm2, %v2054_v42, %v7293_v37  ;;  %v2405_v54 = vor.u32 %v2403_v39, %v2401_v43  ;;  %v7309_v55 = vrot.slane %v2407_v40, 1  ;;  %v3004_v56 = vshrl.u32 %v6790_v45, 16 }
  0x42   : > { %v2402_v15 = vsel %vm2023_vm2, %v2397_v0, %v2401_v43  ;;  %v2997_v58 = vrot.slane %v2995_v46, 1  ;;  %v3000_v59 = vrot.slane %v2998_v47, 2  ;;  %v3007_v60 = vshll.u32 %v6790_v45, 16  ;;  %v6800_v43 = vld [vmem:[%s7159_s29 + $0x40] sm:$0xff]   ;;  %v7365_v0 = vld [vmem:[%s7159_s29 + $0x48] sm:$0xff]   ;;  %v6796_v47 = vld [vmem:[%s7159_s29 + $0x30] sm:$0xff]  }
  0x43   : > { %v2734_v61 = vrot.slane %v7303_v49, 1  ;;  %v1123_v1 = vshrl.u32 %v6792_v51, 16  ;;  %v2410_v3 = vsel %vm2023_vm2, %v2405_v54, %v7309_v55  ;;  %v3006_v4 = vrot.slane %v3004_v56, 1 }
  0x44   : > { %880 = vrot.lane.b32.xlu1 %v845_v9, %s7033_s11  ;;  %1252 = vrot.lane.b32.xlu0 %v1112_v14, %s7034_s12  ;;  %v1126_v11 = vshll.u32 %v6792_v51, 16  ;;  %v2733_v17 = vsel %vm2726_vm3, %v2730_v24, %v2732_v48  ;;  %v3001_v5 = vor.u32 %v3000_v59, %v2997_v58  ;;  %v3009_v6 = vrot.slane %v3007_v60, 2  ;;  %v6795_v14 = vld [vmem:[%s7159_s29 + $0x3c] sm:$0xff]  }
  0x45   : > { %v846_v9 = vrot.slane %v6789_v63, 3  ;;  %v1125_v12 = vrot.slane %v1123_v1, 3  ;;  %v1132_v13 = vshrl.u32 %v6793_v2, 16  ;;  %v2735_v16 = vsel %vm2726_vm3, %v2732_v48, %v2734_v61  ;;  %v6804_v51 = vld [vmem:[%s7159_s29 + $0x40] sm:$0xff]   ;;  %v6797_v59 = vld [vmem:[%s7159_s29 + $0x38] sm:$0xff]   ;;  %v7385_v63 = vld [vmem:[%s7159_s29 + $0x48] sm:$0xff]  }
  0x46   : > { %v1128_v18 = vrot.slane %v1126_v11, 4  ;;  %v1135_v19 = vshll.u32 %v6793_v2, 16  ;;  %v3002_v24 = vsel %vm2967_vm4, %v7250_v57, %v3001_v5  ;;  %v7334_v21 = vor.u32 %v3009_v6, %v3006_v4  ;;  %v7380_v58 = vld [vmem:[%s7159_s29 + $0x40] sm:$0xff]   ;;  %v6806_v2 = vld [vmem:[%s7159_s29 + $0x48] sm:$0xff]  }
  0x47   : > { %v1499_v25 = vshll.u32 %v6794_v7, 16  ;;  %v848_v38 = vrot.slane %v7324_v8, 3  ;;  %v1505_v27 = vshrl.u32 %v6795_v14, 16  ;;  %v1508_v57 = vshll.u32 %v6795_v14, 16  ;;  %v6818_v11 = vld [vmem:[%s7159_s29 + $0xc] sm:$0xff]  }
  0x48   : > { %1254 = vrot.lane.b32.xlu1 %v1121_v22, %s7034_s12  ;;  %1625 = vrot.lane.b32.xlu0 %v1485_v26, %s7035_s18  ;;  %v1496_v22 = vshrl.u32 %v6794_v7, 16  ;;  %v1134_v26 = vrot.slane %v1132_v13, 3  ;;  %v3011_v30 = vsel %vm2967_vm4, %v3001_v5, %v7334_v21  ;;  %v1129_v31 = vor.u32 %v1128_v18, %v1125_v12  ;;  %v6817_v13 = vld [vmem:[%s7159_s29 + $0x4] sm:$0xfc]  }
  0x49   : > { %v1501_v33 = vrot.slane %v1499_v25, 4  ;;  %v849_v36 = vsel %vm836_vm0, %v846_v9, %v848_v38  ;;  %v1507_v34 = vrot.slane %v1505_v27, 3  ;;  %v2064_v42 = vshll.u32 %v6798_v52, 16 }
  0x4a   : > { %v1498_v32 = vrot.slane %v1496_v22, 3  ;;  %v1130_v39 = vsel %vm1077_vm1, %v7261_v10, %v1129_v31  ;;  %v2060_v46 = vshrl.u32 %v7267_v20, 16  ;;  %v2068_v48 = vshrl.u32 %v6798_v52, 16 }
  0x4b   : > { %v2072_v54 = vshll.u32 %v7355_v41, 16  ;;  %v2411_v56 = vshrl.u32 %v7281_v28, 16  ;;  %v2423_v20 = vshll.u32 %v7365_v0, 16  ;;  %v3013_v1 = vshrl.u32 %v6804_v51, 16 }
  0x4c   : > { %1627 = vrot.lane.b32.xlu1 %v1494_v50, %s7035_s18  ;;  %1824 = vrot.lane.b32.xlu0 %v6780_v29, %s7032_s30  ;;  %v847_v50 = vsel %vm836_vm0, %v844_v44, %v846_v9  ;;  %v1137_v29 = vrot.slane %v1135_v19, 4  ;;  %v1502_v40 = vor.u32 %v1501_v33, %v1498_v32  ;;  %v2062_v60 = vor.u32 %v2060_v46, %v7293_v37 }
  0x4d   : > { %v7389_v28 = vrot.slane %v2072_v54, 1  ;;  %v2419_v4 = vshrl.u32 %v6800_v43, 16  ;;  %v2413_v37 = vor.u32 %v2411_v56, %v7309_v55  ;;  %v7394_v5 = vrot.slane %v2423_v20, 1  ;;  %v6808_v55 = vld [vmem:[%s7159_s29 + $0x3c] sm:$0xff]   ;;  %v6810_v54 = vld [vmem:[%s7159_s29 + $0x44] sm:$0xff]  }
  0x4e   : > { %v7350_v44 = vor.u32 %v1137_v29, %v1134_v26  ;;  %v1503_v10 = vsel %vm1077_vm1, %v7274_v23, %v1502_v40  ;;  %v2736_v6 = vrot.slane %v7380_v58, 1  ;;  %v2738_v9 = vrot.slane %v7385_v63, 1  ;;  %v6821_v26 = vld [vmem:[%s7159_s29 + $0x14] sm:$0xff]  }
  0x4f   : > { %v3016_v12 = vshll.u32 %v6804_v51, 16  ;;  %v3015_v14 = vrot.slane %v3013_v1, 1  ;;  %v508_v18 = vshrl.u32 %v6818_v11, 16  ;;  %v511_v19 = vshll.u32 %v6818_v11, 16  ;;  %v6811_v1 = vld [vmem:[%s7159_s29 + $0x4c] sm:$0xff]  }
  0x50   : > { %1826 = vrot.lane.b32.xlu1 %v6781_v35, %s7032_s30  ;;  %2176 = vrot.lane.b32.xlu0 %v2051_v62, %s7036_s20  ;;  %v1510_v35 = vrot.slane %v1508_v57, 4  ;;  %v1139_v45 = vsel %vm1077_vm1, %v1129_v31, %v7350_v44  ;;  %v500_v22 = vshrl.u32 %v6817_v13, 16  ;;  %v503_v25 = vshll.u32 %v6817_v13, 16  ;;  %v6805_v31 = vld [vmem:[%s7159_s29 + $0x3c] sm:$0xff]  }
  0x51   : > { %v510_v29 = vrot.slane %v508_v18, 2  ;;  %v513_v57 = vrot.slane %v511_v19, 3  ;;  %v3025_v32 = vshll.u32 %v6806_v2, 16  ;;  %v850_v20 = vrot.slane %v6805_v31, 3  ;;  %v6836_v31 = vld [vmem:[%s9808_s3 + $0x8] sm:$0xff]  }
  0x52   : > { %v7362_v62 = vor.u32 %v1510_v35, %v1507_v34  ;;  %v502_v33 = vrot.slane %v500_v22, 2  ;;  %v505_v52 = vrot.slane %v503_v25, 3  ;;  %v517_v34 = vshrl.u32 %v6821_v26, 16  ;;  %v6832_v25 = vld [vmem:[%s9808_s3] sm:$0xff]  }
  0x53   : > { %v520_v35 = vshll.u32 %v6821_v26, 16  ;;  %v2739_v49 = vsel %vm2726_vm3, %v2736_v6, %v2738_v9  ;;  %v1514_v11 = vshrl.u32 %v6810_v54, 16  ;;  %v1526_v13 = vshll.u32 %v6811_v1, 16  ;;  %6610 = vmatprep.subr.bf16.mxu0 %v6832_v25 }
  0x54   : > { %2178 = vrot.lane.b32.xlu1 %v2059_v53, %s7036_s20  ;;  %2527 = vrot.lane.b32.xlu0 %v2402_v15, %s7037_s21  ;;  %v2066_v53 = vrot.slane %v2064_v42, 1  ;;  %v2415_v15 = vshll.u32 %v6800_v43, 16  ;;  %v1512_v23 = vsel %vm1077_vm1, %v1502_v40, %v7362_v62  ;;  %v6809_v42 = vld [vmem:[%s7159_s29 + $0x44] sm:$0xff]   ;;  %v506_v43 = vor.u32 %v505_v52, %v502_v33 }
  0x55   : > { %v519_v46 = vrot.slane %v517_v34, 2  ;;  %v1150_v58 = vshrl.u32 %v6809_v42, 16  ;;  %v1516_v18 = vrot.slane %v1514_v11, 3  ;;  %v1528_v22 = vrot.slane %v1526_v13, 4  ;;  %6611 = vmatpush3.bf16.msra.mxu0 %v6832_v25 }
  0x56   : > { %v2067_v7 = vsel %vm2023_vm2, %v2062_v60, %v2066_v53  ;;  %v2076_v33 = vshrl.u32 %v7355_v41, 16  ;;  %6612 = vmatprep.subr.bf16.mxu0 %v6836_v31 }
  0x58   : > { %2529 = vrot.lane.b32.xlu1 %v2410_v3, %s7037_s21  ;;  %2768 = vrot.lane.b32.xlu0 %v2733_v17, %s9818_s25  ;;  %v2417_v3 = vrot.slane %v2415_v15, 1  ;;  %v2070_v17 = vor.u32 %v2068_v48, %v2066_v53  ;;  %v2737_v48 = vsel %vm2726_vm3, %v2734_v61, %v2736_v6  ;;  %v3027_v53 = vrot.slane %v3025_v32, 2  ;;  %v7419_v15 = vld [vmem:[%s7159_s29 + $0x44] sm:$0xff]  }
  0x59   : > { %v1152_v6 = vrot.slane %v1150_v58, 3  ;;  %6613 = vmatpush3.bf16.msra.mxu0 %v6836_v31  ;;  %v6828_v31 = vld [vmem:[%s7159_s29 + $0x54] sm:$0xff]  }
  0x5a   : > { %v2075_v27 = vsel %vm2023_vm2, %v2070_v17, %v7389_v28  ;;  %v1517_v17 = vshll.u32 %v6810_v54, 16  ;;  %v6823_v54 = vld [vmem:[%s7159_s29 + $0x50] sm:$0xff]  }
  0x5c   : > { %2770 = vrot.lane.b32.xlu1 %v2735_v16, %s9818_s25  ;;  %3142 = vrot.lane.b32.xlu0 %v3002_v24, %s9816_s26  ;;  %v3022_v16 = vshrl.u32 %v6806_v2, 16  ;;  %v2421_v24 = vor.u32 %v2419_v4, %v2417_v3  ;;  %v1519_v19 = vrot.slane %v1517_v17, 4 }
  0x5e   : > { %v3024_v40 = vrot.slane %v3022_v16, 1 }
  0x60   : > { %882 = vrot.lane.b32.xlu1 %v847_v50, %s7033_s11  ;;  %3144 = vrot.lane.b32.xlu0 %v3011_v30, %s9816_s26  ;;  %v2418_v50 = vsel %vm2023_vm2, %v2413_v37, %v2417_v3  ;;  %v3018_v30 = vrot.slane %v3016_v12, 2  ;;  %v7434_v4 = vor.u32 %v3027_v53, %v3024_v40  ;;  %v852_v37 = vrot.slane %v7419_v15, 3  ;;  %v6812_v40 = vld [vmem:[%s7159_s29 + $0x40] sm:$0xff]  }
  0x61   : > { %v851_v12 = vsel %vm836_vm0, %v848_v38, %v850_v20  ;;  %v2427_v53 = vshrl.u32 %v7365_v0, 16 }
  0x62   : > { %v3019_v51 = vor.u32 %v3018_v30, %v3015_v14  ;;  %v853_v8 = vsel %vm836_vm0, %v850_v20, %v852_v37  ;;  %v6835_v30 = vld [vmem:[%s7159_s29 + $0x1c] sm:$0xff]  }
  0x64   : > { %884 = vrot.lane.b32.xlu1 %v849_v36, %s7033_s11  ;;  %1256 = vrot.lane.b32.xlu0 %v1130_v39, %s7034_s12  ;;  %v514_v36 = vor.u32 %v513_v57, %v510_v29  ;;  %v2426_v39 = vsel %vm2023_vm2, %v2421_v24, %v7394_v5  ;;  %v3020_v3 = vsel %vm2967_vm4, %v7334_v21, %v3019_v51  ;;  %v1523_v21 = vshrl.u32 %v6811_v1, 16  ;;  %v6814_v24 = vld [vmem:[%s7159_s29 + $0x48] sm:$0xff]   ;;  %v7459_v29 = vld [vmem:[%s7159_s29 + $0x50] sm:$0xff]  }
  0x65   : > { %v3029_v14 = vsel %vm2967_vm4, %v3019_v51, %v7434_v4  ;;  %v7462_v57 = vld [vmem:[%s7159_s29 + $0x50] sm:$0xff]   ;;  %v2084_v52 = vshrl.u32 %v6814_v24, 16  ;;  %v6813_v51 = vld [vmem:[%s7159_s29 + $0x48] sm:$0xff]  }
  0x66   : > { %v515_v56 = vsel %vm498_vm5, %v506_v43, %v514_v36  ;;  %v2431_v43 = vshll.u32 %v7462_v57, 16  ;;  %v2435_v17 = vshrl.u32 %v7462_v57, 16 }
  0x67   : > { %688 = vst.msk [vmem:[#allocation2] sm:$0xff] %vm687_vm6, %v515_v56 }
  0x68   : > { %1258 = vrot.lane.b32.xlu1 %v1139_v45, %s7034_s12  ;;  %1629 = vrot.lane.b32.xlu0 %v1503_v10, %s7035_s18  ;;  %v1141_v45 = vshrl.u32 %v6808_v55, 16  ;;  %v1144_v10 = vshll.u32 %v6808_v55, 16  ;;  %v1525_v55 = vrot.slane %v1523_v21, 3  ;;  %v3034_v21 = vshll.u32 %v6823_v54, 16 }
  0x6a   : > { %v1143_v61 = vrot.slane %v1141_v45, 3  ;;  %v1146_v60 = vrot.slane %v1144_v10, 4  ;;  %v7472_v32 = vor.u32 %v1528_v22, %v1525_v55  ;;  %v6839_v10 = vld [vmem:[%s7159_s29 + $0x24] sm:$0xff]   ;;  %v6827_v55 = vld [vmem:[%s7159_s29 + $0x4c] sm:$0xff]  }
  0x6b   : > { %v535_v20 = vshrl.u32 %v6839_v10, 16  ;;  %v538_v58 = vshll.u32 %v6839_v10, 16  ;;  %v6830_v10 = vld [vmem:[%s7159_s29 + $0x5c] sm:$0xff]  }
  0x6c   : > { %1631 = vrot.lane.b32.xlu1 %v1512_v23, %s7035_s18  ;;  %1828 = vrot.lane.b32.xlu0 %v6796_v47, %s7032_s30  ;;  %v522_v47 = vrot.slane %v520_v35, 3  ;;  %v1147_v16 = vor.u32 %v1146_v60, %v1143_v61  ;;  %v526_v35 = vshrl.u32 %v6835_v30, 16  ;;  %v6824_v61 = vld [vmem:[%s7159_s29 + $0x58] sm:$0xff]  }
  0x6d   : > { %v537_v1 = vrot.slane %v535_v20, 2 }
  0x6e   : > { %v7422_v23 = vor.u32 %v522_v47, %v519_v46  ;;  %v1148_v26 = vsel %vm1077_vm1, %v7350_v44, %v1147_v16  ;;  %v528_v45 = vrot.slane %v526_v35, 2  ;;  %v2078_v46 = vor.u32 %v2076_v33, %v7389_v28  ;;  %v7487_v47 = vld [vmem:[%s7159_s29 + $0x58] sm:$0xff]  }
  0x6f   : > { %v2433_v28 = vrot.slane %v2431_v43, 1  ;;  %v1159_v35 = vshrl.u32 %v6827_v55, 16  ;;  %v6829_v43 = vld [vmem:[%s7159_s29 + $0x54] sm:$0xff]  }
  0x70   : > { %1830 = vrot.lane.b32.xlu1 %v6797_v59, %s7032_s30  ;;  %2180 = vrot.lane.b32.xlu0 %v2067_v7, %s7036_s20  ;;  %v1153_v59 = vshll.u32 %v6809_v42, 16  ;;  %v524_v2 = vsel %vm498_vm5, %v514_v36, %v7422_v23  ;;  %v2088_v42 = vshll.u32 %v7459_v29, 16  ;;  %v1532_v20 = vshrl.u32 %v6829_v43, 16 }
  0x71   : > { %689 = vst.msk [vmem:[#allocation2 + $0x10] sm:$0xff] %vm687_vm6, %v524_v2  ;;  %v540_v2 = vrot.slane %v538_v58, 3  ;;  %v1535_v58 = vshll.u32 %v6829_v43, 16 }
  0x72   : > { %v1155_v7 = vrot.slane %v1153_v59, 4  ;;  %v7495_v59 = vrot.slane %v2088_v42, 1  ;;  %v1162_v42 = vshll.u32 %v6827_v55, 16 }
  0x73   : > { %v7510_v13 = vor.u32 %v540_v2, %v537_v1 }
  0x74   : > { %2182 = vrot.lane.b32.xlu1 %v2075_v27, %s7036_s20  ;;  %2531 = vrot.lane.b32.xlu0 %v2418_v50, %s7037_s21  ;;  %v7451_v38 = vor.u32 %v1155_v7, %v1152_v6  ;;  %v1520_v27 = vor.u32 %v1519_v19, %v1516_v18  ;;  %v2080_v50 = vshll.u32 %v6814_v24, 16  ;;  %v2439_v6 = vshll.u32 %v7487_v47, 16  ;;  %v6820_v7 = vld [vmem:[%s7159_s29 + $0x50] sm:$0xff]  }
  0x75   : > { %v2437_v19 = vor.u32 %v2435_v17, %v2433_v28  ;;  %v2740_v25 = vrot.slane %v6820_v7, 1  ;;  %v1537_v7 = vrot.slane %v1535_v58, 4 }
  0x76   : > { %v1157_v44 = vsel %vm1077_vm1, %v1147_v16, %v7451_v38  ;;  %v1521_v36 = vsel %vm1077_vm1, %v7362_v62, %v1520_v27  ;;  %v2082_v34 = vrot.slane %v2080_v50, 1  ;;  %v1530_v62 = vsel %vm1077_vm1, %v1520_v27, %v7472_v32 }
  0x77   : > { %v3040_v16 = vshrl.u32 %v6824_v61, 16  ;;  %v7521_v24 = vrot.slane %v2439_v6, 1  ;;  %v3036_v27 = vrot.slane %v3034_v21, 2 }
  0x78   : > { %2533 = vrot.lane.b32.xlu1 %v2426_v39, %s7037_s21  ;;  %2772 = vrot.lane.b32.xlu0 %v2737_v48, %s9818_s25  ;;  %v529_v39 = vshll.u32 %v6835_v30, 16  ;;  %v6840_v48 = vld [vmem:[%s9808_s3 + $0x10] ss:$0 sps:$4 sm:$0x33]   ;;  %v2083_v0 = vsel %vm2023_vm2, %v2078_v46, %v2082_v34  ;;  %v2086_v11 = vor.u32 %v2084_v52, %v2082_v34  ;;  %v7536_v52 = vld [vmem:[%s7159_s29 + $0x54] sm:$0xff]  }
  0x79   : > { %6686 = vmatprep.subr.msk.bf16.mxu0 %vm3311_vm7, %v6840_v48  ;;  %v7528_v30 = vld [vmem:[%s7159_s29 + $0x4c] sm:$0xff]   ;;  %v3042_v33 = vrot.slane %v3040_v16, 1  ;;  %v856_v63 = vrot.slane %v7536_v52, 3 }
  0x7a   : > { %v531_v41 = vrot.slane %v529_v39, 3  ;;  %v2741_v39 = vsel %vm2726_vm3, %v2738_v9, %v2740_v25 }
  0x7c   : > { %2774 = vrot.lane.b32.xlu1 %v2739_v49, %s9818_s25  ;;  %3146 = vrot.lane.b32.xlu0 %v3020_v3, %s9816_s26  ;;  %v532_v56 = vor.u32 %v531_v41, %v528_v45  ;;  %v3313_v49 = vsel %vm3311_vm7, %v6840_v48, 0  ;;  %v1168_v41 = vshrl.u32 %v6828_v31, 16  ;;  %v1161_v48 = vrot.slane %v1159_v35, 3 }
  0x7d   : > { %6615 = vmatpush3.bf16.msra.mxu0 %v3313_v49  ;;  %v6855_v49 = vld [vmem:[%s7159_s29 + $0x2c] sm:$0xff]   ;;  %vm3256_vm7 = vcmask 293888  }
  0x7e   : > { %v533_v60 = vsel %vm498_vm5, %v7422_v23, %v532_v56  ;;  %v2429_v23 = vor.u32 %v2427_v53, %v7394_v5  ;;  %v542_v18 = vsel %vm498_vm5, %v532_v56, %v7510_v13  ;;  %v2091_v5 = vsel %vm2023_vm2, %v2086_v11, %v7495_v59 }
  0x7f   : > { %690 = vst.msk [vmem:[#allocation2 + $0x20] sm:$0xff] %vm687_vm6, %v533_v60  ;;  %691 = vst.msk [vmem:[#allocation2 + $0x30] sm:$0xff] %vm687_vm6, %v542_v18  ;;  %v1164_v56 = vrot.slane %v1162_v42, 4  ;;  %v1544_v60 = vshll.u32 %v6830_v10, 16  ;;  %v544_v1 = vshrl.u32 %v6855_v49, 16  ;;  %v547_v11 = vshll.u32 %v6855_v49, 16 }
  0x80   : > { %886 = vrot.lane.b32.xlu1 %v851_v12, %s7033_s11  ;;  %3148 = vrot.lane.b32.xlu0 %v3029_v14, %s9816_s26  ;;  %v3031_v12 = vshrl.u32 %v6823_v54, 16  ;;  %v7513_v14 = vld [vmem:[%s7159_s29 + $0x58] sm:$0xff]   ;;  %v2434_v22 = vsel %vm2023_vm2, %v2429_v23, %v2433_v28  ;;  %v1170_v28 = vrot.slane %v1168_v41, 3  ;;  %v1534_v23 = vrot.slane %v1532_v20, 3  ;;  %s7042_s26 = smov 48  }
  0x81   : > { %v2742_v57 = vrot.slane %v7513_v14, 1  ;;  %v1165_v6 = vor.u32 %v1164_v56, %v1161_v48  ;;  %v549_v16 = vrot.slane %v547_v11, 3  ;;  %v6858_v18 = vld [vmem:[%s7159_s29 + $0x34] sm:$0xff]   ;;  %v2443_v20 = vshrl.u32 %v7487_v47, 16  ;;  %v6842_v47 = vld [vmem:[%s7159_s29 + $0x60] sm:$0xff]  }
  0x83   : > { %v2743_v9 = vsel %vm2726_vm3, %v2740_v25, %v2742_v57 }
  0x84   : > { %888 = vrot.lane.b32.xlu1 %v853_v8, %s7033_s11  ;;  %1260 = vrot.lane.b32.xlu0 %v1148_v26, %s7034_s12  ;;  %v3043_v8 = vshll.u32 %v6824_v61, 16  ;;  %v3033_v26 = vrot.slane %v3031_v12, 1  ;;  %v1541_v61 = vshrl.u32 %v6830_v10, 16  ;;  %v546_v12 = vrot.slane %v544_v1, 2 }
  0x86   : > { %v3045_v34 = vrot.slane %v3043_v8, 2  ;;  %v1543_v15 = vrot.slane %v1541_v61, 3  ;;  %v6834_v8 = vld [vmem:[%s7159_s29 + $0x58] sm:$0xff]   ;;  %v550_v55 = vor.u32 %v549_v16, %v546_v12 }
  0x87   : > { %v2096_v35 = vshll.u32 %v6834_v8, 16  ;;  %v2100_v48 = vshrl.u32 %v6834_v8, 16  ;;  %v6848_v16 = vld [vmem:[%s7159_s29 + $0x5c] sm:$0xff]  }
  0x88   : > { %1262 = vrot.lane.b32.xlu1 %v1157_v44, %s7034_s12  ;;  %1633 = vrot.lane.b32.xlu0 %v1521_v36, %s7035_s18  ;;  %v2442_v36 = vsel %vm2023_vm2, %v2437_v19, %v7521_v24  ;;  %v7554_v46 = vor.u32 %v3045_v34, %v3042_v33  ;;  %v551_v33 = vsel %vm498_vm5, %v7510_v13, %v550_v55 }
  0x89   : > { %692 = vst.msk [vmem:[#allocation2 + $0x40] sm:$0xff] %vm687_vm6, %v551_v33 }
  0x8c   : > { %1635 = vrot.lane.b32.xlu1 %v1530_v62, %s7035_s18  ;;  %1832 = vrot.lane.b32.xlu0 %v6812_v40, %s7032_s30  ;;  %v3037_v40 = vor.u32 %v3036_v27, %v3033_v26  ;;  %v854_v62 = vrot.slane %v7528_v30, 3  ;;  %v1166_v26 = vsel %vm1077_vm1, %v7451_v38, %v1165_v6  ;;  %v1538_v27 = vor.u32 %v1537_v7, %v1534_v23 }
  0x8d   : > { %v556_v30 = vshll.u32 %v6858_v18, 16 }
  0x8e   : > { %v3038_v54 = vsel %vm2967_vm4, %v7434_v4, %v3037_v40  ;;  %v3047_v2 = vsel %vm2967_vm4, %v3037_v40, %v7554_v46  ;;  %v855_v4 = vsel %vm836_vm0, %v852_v37, %v854_v62  ;;  %v1546_v37 = vrot.slane %v1544_v60, 4  ;;  %v6845_v60 = vld [vmem:[%s7159_s29 + $0x68] sm:$0xff]  }
  0x8f   : > { %v558_v38 = vrot.slane %v556_v30, 3  ;;  %v1539_v40 = vsel %vm1077_vm1, %v7472_v32, %v1538_v27  ;;  %v7613_v32 = vld [vmem:[%s7159_s29 + $0x68] sm:$0xff]   ;;  %v3058_v12 = vshrl.u32 %v6845_v60, 16 }
  0x90   : > { %1834 = vrot.lane.b32.xlu1 %v6813_v51, %s7032_s30  ;;  %2184 = vrot.lane.b32.xlu0 %v2083_v0, %s7036_s20  ;;  %v1171_v51 = vshll.u32 %v6828_v31, 16  ;;  %v7587_v31 = vld [vmem:[%s7159_s29 + $0x60] sm:$0xff]   ;;  %v7599_v13 = vor.u32 %v1546_v37, %v1543_v15  ;;  %v2455_v61 = vshll.u32 %v7613_v32, 16 }
  0x91   : > { %v7503_v3 = vpop.permute.xlu0 %1820  ;;  %v7532_v44 = vpop.permute.xlu1 %1822  ;;  %v2447_v10 = vshll.u32 %v7587_v31, 16 }
  0x92   : > { %v1173_v0 = vrot.slane %v1171_v51, 4  ;;  %v6844_v51 = vld [vmem:[%s7159_s29 + $0x60] sm:$0xff]   ;;  %v7643_v7 = vrot.slane %v2455_v61, 1 }
  0x94   : > { %2186 = vrot.lane.b32.xlu1 %v2091_v5, %s7036_s20  ;;  %2535 = vrot.lane.b32.xlu0 %v2434_v22, %s7037_s21  ;;  %v857_v5 = vsel %vm836_vm0, %v854_v62, %v856_v63  ;;  %v7577_v19 = vor.u32 %v1173_v0, %v1170_v28  ;;  %v553_v22 = vshrl.u32 %v6858_v18, 16  ;;  %v1548_v62 = vsel %vm1077_vm1, %v1538_v27, %v7599_v13  ;;  %v6873_v27 = vld [vmem:[%s7159_s29 + $0x3c] sm:$0xff]  }
  0x95   : > { %v875_v50 = vpop.permute.xlu0 %874  ;;  %v2449_v28 = vrot.slane %v2447_v10, 1  ;;  %v562_v33 = vshrl.u32 %v6873_v27, 16 }
  0x96   : > { %929 = vst.msk [vmem:[#allocation2] sm:$0xff] %vm928_vm8, %v875_v50  ;;  %v7583_v50 = vld [vmem:[%s7159_s29 + $0x60] sm:$0xff]   ;;  %v1175_v34 = vsel %vm1077_vm1, %v1165_v6, %v7577_v19  ;;  %v7638_v6 = vld [vmem:[%s7159_s29 + $0x68] sm:$0xff]  }
  0x97   : > { %v2104_v41 = vshll.u32 %v7583_v50, 16 }
  0x98   : > { %2537 = vrot.lane.b32.xlu1 %v2442_v36, %s7037_s21  ;;  %2776 = vrot.lane.b32.xlu0 %v2741_v39, %s9848_s27  ;;  %v555_v36 = vrot.slane %v553_v22, 2  ;;  %v2744_v22 = vrot.slane %v6842_v47, 1 }
  0x99   : > { %v877_v45 = vpop.permute.xlu0 %876  ;;  %v7626_v49 = vrot.slane %v2104_v41, 1  ;;  %v564_v41 = vrot.slane %v562_v33, 2 }
  0x9a   : > { %930 = vst.msk [vmem:[#allocation2 + $0x10] sm:$0xff] %vm928_vm8, %v877_v45  ;;  %v1249_v53 = vpop.permute.xlu1 %1248  ;;  %v7604_v42 = vor.u32 %v558_v38, %v555_v36  ;;  %v6831_v45 = vld [vmem:[%s7159_s29 + $0x50] sm:$0xff]   ;;  %v565_v36 = vshll.u32 %v6873_v27, 16 }
  0x9b   : > { %1303 = vst.msk [vmem:[#allocation2] sm:$0xff] %vm1302_vm9, %v1249_v53 }
  0x9c   : > { %2778 = vrot.lane.b32.xlu1 %v2743_v9, %s9848_s27  ;;  %3150 = vrot.lane.b32.xlu0 %v3038_v54, %s9849_s28  ;;  %v2098_v9 = vrot.slane %v2096_v35, 1  ;;  %v6833_v54 = vld [vmem:[%s7159_s29 + $0x58] sm:$0xff]   ;;  %v7663_v35 = vld [vmem:[%s7159_s29 + $0x64] sm:$0xff]   ;;  %v567_v10 = vrot.slane %v565_v36, 3 }
  0x9e   : > { %v1251_v17 = vpop.permute.xlu1 %1250  ;;  %v1622_v21 = vpop.permute.xlu0 %1621  ;;  %v2102_v1 = vor.u32 %v2100_v48, %v2098_v9 }
  0x9f   : > { %1304 = vst.msk [vmem:[#allocation2 + $0x10] sm:$0xff] %vm1302_vm9, %v1251_v17  ;;  %v2445_v17 = vor.u32 %v2443_v20, %v7521_v24 }
  0xa0   : > { %1676 = vst.msk [vmem:[#allocation2] sm:$0xff] %vm1675_vm10, %v1622_v21  ;;  %3152 = vrot.lane.b32.xlu1 %v3047_v2, %s9849_s28  ;;  %890 = vrot.lane.b32.xlu0 %v855_v4, %s7033_s11  ;;  %v3049_v2 = vshrl.u32 %v6844_v51, 16  ;;  %v3052_v4 = vshll.u32 %v6844_v51, 16  ;;  %v3061_v21 = vshll.u32 %v6845_v60, 16  ;;  %v2107_v24 = vsel %vm2023_vm2, %v2102_v1, %v7626_v49 }
  0xa1   : > { %1875 = vst.msk [vmem:[#allocation2] sm:$0xff] %vm1874_vm11, %v7503_v3 }
  0xa2   : > { %v1624_v25 = vpop.permute.xlu1 %1623  ;;  %v2173_v3 = vpop.permute.xlu0 %2172  ;;  %v3051_v15 = vrot.slane %v3049_v2, 1  ;;  %v3054_v37 = vrot.slane %v3052_v4, 2 }
  0xa3   : > { %1677 = vst.msk [vmem:[#allocation2 + $0x10] sm:$0xff] %vm1675_vm10, %v1624_v25  ;;  %v2746_v25 = vrot.slane %v7638_v6, 1 }
  0xa4   : > { %2227 = vst.msk [vmem:[#allocation2] sm:$0xff] %vm2226_vm12, %v2173_v3  ;;  %892 = vrot.lane.b32.xlu1 %v857_v5, %s7033_s11  ;;  %1264 = vrot.lane.b32.xlu0 %v1166_v26, %s7034_s12  ;;  %v7650_v5 = vld [vmem:[%s7159_s29 + $0x5c] sm:$0xff]   ;;  %v6849_v26 = vld [vmem:[%s7159_s29 + $0x64] sm:$0xff]   ;;  %v3060_v3 = vrot.slane %v3058_v12, 1 }
  0xa5   : > { %1876 = vst.msk [vmem:[#allocation2 + $0x10] sm:$0xff] %vm1874_vm11, %v7532_v44  ;;  %v2092_v44 = vshrl.u32 %v7459_v29, 16  ;;  %v560_v29 = vsel %vm498_vm5, %v550_v55, %v7604_v42  ;;  %v2450_v55 = vsel %vm2023_vm2, %v2445_v17, %v2449_v28  ;;  %v858_v48 = vrot.slane %v7650_v5, 3 }
  0xa6   : > { %v2175_v39 = vpop.permute.xlu1 %2174  ;;  %v2524_v43 = vpop.permute.xlu0 %2523  ;;  %693 = vst.msk [vmem:[#allocation2 + $0x50] sm:$0xff] %vm687_vm6, %v560_v29  ;;  %v6876_v29 = vld [vmem:[%s7159_s29 + $0x44] sm:$0xff]   ;;  %v1186_v51 = vshrl.u32 %v6849_v26, 16  ;;  %v2747_v14 = vsel %vm2726_vm3, %v2744_v22, %v2746_v25  ;;  %v860_v17 = vrot.slane %v7663_v35, 3 }
  0xa7   : > { %2228 = vst.msk [vmem:[#allocation2 + $0x10] sm:$0xff] %vm2226_vm12, %v2175_v39  ;;  %v2094_v56 = vor.u32 %v2092_v44, %v7495_v59  ;;  %v2451_v59 = vshrl.u32 %v7587_v31, 16  ;;  %v3063_v31 = vrot.slane %v3061_v21, 2  ;;  %v1177_v39 = vshrl.u32 %v6848_v16, 16 }
  0xa8   : > { %2578 = vst.msk [vmem:[#allocation2] sm:$0xff] %vm2577_vm13, %v2524_v43  ;;  %1266 = vrot.lane.b32.xlu1 %v1175_v34, %s7034_s12  ;;  %1637 = vrot.lane.b32.xlu0 %v1539_v40, %s7035_s18  ;;  %v3055_v34 = vor.u32 %v3054_v37, %v3051_v15  ;;  %v1180_v40 = vshll.u32 %v6848_v16, 16  ;;  %v2745_v43 = vsel %vm2726_vm3, %v2742_v57, %v2744_v22  ;;  %v571_v20 = vshrl.u32 %v6876_v29, 16 }
  0xa9   : > { %v2099_v11 = vsel %vm2023_vm2, %v2094_v56, %v2098_v9  ;;  %v2453_v18 = vor.u32 %v2451_v59, %v2449_v28  ;;  %v7678_v57 = vor.u32 %v3063_v31, %v3060_v3  ;;  %v568_v56 = vor.u32 %v567_v10, %v564_v41  ;;  %v7714_v3 = vld [vmem:[%s7159_s29 + $0x70] sm:$0xff]  }
  0xaa   : > { %v2526_v53 = vpop.permute.xlu1 %2525  ;;  %v2765_v58 = vpop.permute.xlu0 %2764  ;;  %v1179_v28 = vrot.slane %v1177_v39, 3  ;;  %v1182_v61 = vrot.slane %v1180_v40, 4  ;;  %v574_v60 = vshll.u32 %v6876_v29, 16  ;;  %v573_v4 = vrot.slane %v571_v20, 2  ;;  %v6853_v20 = vld [vmem:[%s7159_s29 + $0x68] sm:$0xff]  }
  0xab   : > { %2579 = vst.msk [vmem:[#allocation2 + $0x10] sm:$0xff] %vm2577_vm13, %v2526_v53  ;;  %v2458_v38 = vsel %vm2023_vm2, %v2453_v18, %v7643_v7  ;;  %v1189_v53 = vshll.u32 %v6849_v26, 16  ;;  %v569_v2 = vsel %vm498_vm5, %v7604_v42, %v568_v56  ;;  %v3065_v21 = vsel %vm2967_vm4, %v3055_v34, %v7678_v57 }
  0xac   : > { %2819 = vst.msk [vmem:[#allocation2] sm:$0xff] %vm2818_vm14, %v2765_v58  ;;  %1639 = vrot.lane.b32.xlu1 %v1548_v62, %s7035_s18  ;;  %1836 = vrot.lane.b32.xlu0 %v6831_v45, %s7032_s30  ;;  %v6850_v45 = vld [vmem:[%s7159_s29 + $0x64] sm:$0xff]   ;;  %v3056_v58 = vsel %vm2967_vm4, %v7554_v46, %v3055_v34  ;;  %v576_v46 = vrot.slane %v574_v60, 3  ;;  %v859_v37 = vsel %vm836_vm0, %v856_v63, %v858_v48  ;;  %v7719_v34 = vld [vmem:[%s7159_s29 + $0x70] sm:$0xff]  }
  0xad   : > { %v1550_v59 = vshrl.u32 %v6850_v45, 16  ;;  %v1553_v47 = vshll.u32 %v6850_v45, 16  ;;  %694 = vst.msk [vmem:[#allocation2 + $0x60] sm:$0xff] %vm687_vm6, %v569_v2  ;;  %v1191_v12 = vrot.slane %v1189_v53, 4  ;;  %v1183_v5 = vor.u32 %v1182_v61, %v1179_v28  ;;  %v7752_v61 = vld [vmem:[%s7159_s29 + $0x70] sm:$0xff]  }
  0xae   : > { %v2767_v0 = vpop.permute.xlu1 %2766  ;;  %v3139_v23 = vpop.permute.xlu0 %3138  ;;  %v7696_v18 = vor.u32 %v576_v46, %v573_v4  ;;  %v861_v52 = vsel %vm836_vm0, %v858_v48, %v860_v17  ;;  %v2463_v48 = vshll.u32 %v7719_v34, 16  ;;  %v6893_v2 = vld [vmem:[%s7159_s29 + $0x4c] sm:$0xff]  }
  0xaf   : > { %2820 = vst.msk [vmem:[#allocation2 + $0x10] sm:$0xff] %vm2818_vm14, %v2767_v0  ;;  %v1184_v33 = vsel %vm1077_vm1, %v7577_v19, %v1183_v5  ;;  %v2108_v19 = vshrl.u32 %v7583_v50, 16  ;;  %v6862_v50 = vld [vmem:[%s7159_s29 + $0x70] sm:$0xff]  }
  0xb0   : > { %3193 = vst.msk [vmem:[#allocation2] sm:$0xff] %vm3192_vm15, %v3139_v23  ;;  %1838 = vrot.lane.b32.xlu1 %v6833_v54, %s7032_s30  ;;  %2188 = vrot.lane.b32.xlu0 %v2099_v11, %s7036_s20  ;;  %v6851_v54 = vld [vmem:[%s7159_s29 + $0x6c] sm:$0xff]   ;;  %v1188_v23 = vrot.slane %v1186_v51, 3  ;;  %v578_v26 = vsel %vm498_vm5, %v568_v56, %v7696_v18  ;;  %v6852_v51 = vld [vmem:[%s7159_s29 + $0x60] sm:$0xff]  }
  0xb1   : > { %v1559_v42 = vshrl.u32 %v6851_v54, 16  ;;  %v1562_v16 = vshll.u32 %v6851_v54, 16  ;;  %695 = vst.msk [vmem:[#allocation2 + $0x70] sm:$0xff] %vm687_vm6, %v578_v26  ;;  %v2110_v53 = vor.u32 %v2108_v19, %v7626_v49  ;;  %v2459_v54 = vshrl.u32 %v7613_v32, 16  ;;  %v7760_v32 = vld [vmem:[%s7159_s29 + $0x78] sm:$0xff]  }
  0xb2   : > { %v879_v8 = vpop.permute.xlu1 %878  ;;  %v3141_v30 = vpop.permute.xlu0 %3140  ;;  %v7711_v63 = vor.u32 %v1191_v12, %v1188_v23  ;;  %v2467_v49 = vshrl.u32 %v7719_v34, 16 }
  0xb3   : > { %931 = vst.msk [vmem:[#allocation2 + $0x20] sm:$0xff] %vm928_vm8, %v879_v8  ;;  %v1552_v8 = vrot.slane %v1550_v59, 3  ;;  %v1561_v27 = vrot.slane %v1559_v42, 3  ;;  %v6863_v59 = vld [vmem:[%s7159_s29 + $0x78] sm:$0xff]   ;;  %v2461_v12 = vor.u32 %v2459_v54, %v7643_v7 }
  0xb4   : > { %3194 = vst.msk [vmem:[#allocation2 + $0x10] sm:$0xff] %vm3192_vm15, %v3141_v30  ;;  %2190 = vrot.lane.b32.xlu1 %v2107_v24, %s7036_s20  ;;  %2539 = vrot.lane.b32.xlu0 %v2450_v55, %s7037_s21  ;;  %v6854_v24 = vld [vmem:[%s7159_s29 + $0x68] sm:$0xff]   ;;  %v1555_v55 = vrot.slane %v1553_v47, 4  ;;  %v1564_v30 = vrot.slane %v1562_v16, 4  ;;  %v1193_v40 = vsel %vm1077_vm1, %v1183_v5, %v7711_v63  ;;  %v3067_v47 = vshrl.u32 %v6862_v50, 16  ;;  %v6868_v54 = vld [vmem:[%s7159_s29 + $0x74] sm:$0xff]  }
  0xb5   : > { %v2116_v29 = vshrl.u32 %v6854_v24, 16  ;;  %v583_v5 = vshll.u32 %v6893_v2, 16 }
  0xb6   : > { %v881_v44 = vpop.permute.xlu1 %880  ;;  %v1253_v62 = vpop.permute.xlu0 %1252  ;;  %v1556_v36 = vor.u32 %v1555_v55, %v1552_v8  ;;  %v2750_v8 = vrot.slane %v7760_v32, 1  ;;  %v3069_v55 = vrot.slane %v3067_v47, 1 }
  0xb7   : > { %932 = vst.msk [vmem:[#allocation2 + $0x30] sm:$0xff] %vm928_vm8, %v881_v44  ;;  %v3211_v9 = vld [vmem:[#allocation2] sm:$0xff]  ;;  %v7727_v44 = vor.u32 %v1564_v30, %v1561_v27 }
  0xb8   : > { %1305 = vst.msk [vmem:[#allocation2 + $0x20] sm:$0xff] %vm1302_vm9, %v1253_v62  ;;  %2541 = vrot.lane.b32.xlu1 %v2458_v38, %s7037_s21  ;;  %6616 = vmatprep.mubr.msk.bf16.mxu0 %vm3256_vm7, %v3211_v9  ;;  %v2112_v38 = vshll.u32 %v6854_v24, 16  ;;  %v1557_v41 = vsel %vm1077_vm1, %v7599_v13, %v1556_v36  ;;  %v7734_v62 = vld [vmem:[%s7159_s29 + $0x78] sm:$0xff]   ;;  %v3076_v24 = vshrl.u32 %v6863_v59, 16 }
  0xb9   : > { %2780 = vrot.lane.b32.xlu0 %v2745_v43, %s9848_s27  ;;  %v2120_v43 = vshll.u32 %v7714_v3, 16  ;;  %v1566_v13 = vsel %vm1077_vm1, %v1556_v36, %v7727_v44  ;;  %v2471_v28 = vshll.u32 %v7734_v62, 16 }
  0xba   : > { %v1255_v1 = vpop.permute.xlu1 %1254  ;;  %v1626_v0 = vpop.permute.xlu0 %1625  ;;  %v2114_v10 = vrot.slane %v2112_v38, 1 }
  0xbb   : > { %1306 = vst.msk [vmem:[#allocation2 + $0x30] sm:$0xff] %vm1302_vm9, %v1255_v1  ;;  %v3212_v11 = vld [vmem:[#allocation2 + $0x10] sm:$0xff]  ;;  %v2465_v1 = vrot.slane %v2463_v48, 1  ;;  %v7769_v42 = vrot.slane %v2471_v28, 1 }
  0xbc   : > { %1678 = vst.msk [vmem:[#allocation2 + $0x20] sm:$0xff] %vm1675_vm10, %v1626_v0  ;;  %2782 = vrot.lane.b32.xlu1 %v2747_v14, %s9848_s27  ;;  %6617 = vmatmul.mubr.msk.bf16.vlgmr.msra.gmra.mrb[0].mxu0 %vm3256_vm7, %v3212_v11  ;;  %v7746_v14 = vrot.slane %v2120_v43, 1  ;;  %v2115_v4 = vsel %vm2023_vm2, %v2110_v53, %v2114_v10  ;;  %v3070_v0 = vshll.u32 %v6862_v50, 16  ;;  %v6894_v11 = vld [vmem:[%s7159_s29 + $0x54] sm:$0xff]   ;;  %v7781_v43 = vld [vmem:[%s7159_s29 + $0x6c] sm:$0xff]  }
  0xbd   : > { %3154 = vrot.lane.b32.xlu0 %v3056_v58, %s9849_s28  ;;  %v2118_v58 = vor.u32 %v2116_v29, %v2114_v10  ;;  %v589_v7 = vshrl.u32 %v6894_v11, 16  ;;  %v2469_v26 = vor.u32 %v2467_v49, %v2465_v1  ;;  %v2466_v36 = vsel %vm2023_vm2, %v2461_v12, %v2465_v1 }
  0xbe   : > { %v1628_v15 = vpop.permute.xlu1 %1627  ;;  %v1825_v22 = vpop.permute.xlu0 %1824  ;;  %v3072_v27 = vrot.slane %v3070_v0, 2  ;;  %v1571_v0 = vshll.u32 %v6868_v54, 16 }
  0xbf   : > { %1679 = vst.msk [vmem:[#allocation2 + $0x30] sm:$0xff] %vm1675_vm10, %v1628_v15  ;;  %v2123_v46 = vsel %vm2023_vm2, %v2118_v58, %v7746_v14  ;;  %v3079_v15 = vshll.u32 %v6863_v59, 16  ;;  %v591_v38 = vrot.slane %v589_v7, 2  ;;  %v2474_v29 = vsel %vm2023_vm2, %v2469_v26, %v7769_v42 }
  0xc0   : > { %1877 = vst.msk [vmem:[#allocation2 + $0x20] sm:$0xff] %vm1874_vm11, %v1825_v22  ;;  %3156 = vrot.lane.b32.xlu1 %v3065_v21, %s9849_s28  ;;  %v2748_v21 = vrot.slane %v7752_v61, 1  ;;  %v592_v22 = vshll.u32 %v6894_v11, 16  ;;  %v3073_v53 = vor.u32 %v3072_v27, %v3069_v55  ;;  %v7813_v61 = vld [vmem:[%s7159_s29 + $0x74] sm:$0xff]  }
  0xc1   : > { %894 = vrot.lane.b32.xlu0 %v859_v37, %s7033_s11  ;;  %v580_v37 = vshrl.u32 %v6893_v2, 16  ;;  %v3081_v19 = vrot.slane %v3079_v15, 2 }
  0xc2   : > { %v1827_v31 = vpop.permute.xlu1 %1826  ;;  %v2177_v39 = vpop.permute.xlu0 %2176  ;;  %v594_v34 = vrot.slane %v592_v22, 3  ;;  %v2751_v6 = vsel %vm2726_vm3, %v2748_v21, %v2750_v8  ;;  %v3074_v2 = vsel %vm2967_vm4, %v7678_v57, %v3073_v53  ;;  %v1573_v22 = vrot.slane %v1571_v0, 4 }
  0xc3   : > { %1878 = vst.msk [vmem:[#allocation2 + $0x30] sm:$0xff] %vm1874_vm11, %v1827_v31  ;;  %v582_v30 = vrot.slane %v580_v37, 2  ;;  %v585_v31 = vrot.slane %v583_v5, 3 }
  0xc4   : > { %2229 = vst.msk [vmem:[#allocation2 + $0x20] sm:$0xff] %vm2226_vm12, %v2177_v39  ;;  %896 = vrot.lane.b32.xlu1 %v861_v52, %s7033_s11  ;;  %v6866_v52 = vld [vmem:[%s7159_s29 + $0x6c] sm:$0xff]   ;;  %v7786_v10 = vor.u32 %v594_v34, %v591_v38 }
  0xc5   : > { %1268 = vrot.lane.b32.xlu0 %v1184_v33, %s7034_s12  ;;  %v1198_v48 = vshll.u32 %v6866_v52, 16 }
  0xc6   : > { %v2179_v45 = vpop.permute.xlu1 %2178  ;;  %v2528_v9 = vpop.permute.xlu0 %2527 }
  0xc7   : > { %2230 = vst.msk [vmem:[#allocation2 + $0x30] sm:$0xff] %vm2226_vm12, %v2179_v45  ;;  %v6867_v45 = vld [vmem:[%s7159_s29 + $0x74] sm:$0xff]   ;;  %v1200_v1 = vrot.slane %v1198_v48, 4  ;;  %v7864_v48 = vld [vmem:[%s7159_s29 + $0x88] sm:$0xff]  }
  0xc8   : > { %2580 = vst.msk [vmem:[#allocation2 + $0x20] sm:$0xff] %vm2577_vm13, %v2528_v9  ;;  %1270 = vrot.lane.b32.xlu1 %v1193_v40, %s7034_s12  ;;  %v3078_v40 = vrot.slane %v3076_v24, 1  ;;  %v1195_v9 = vshrl.u32 %v6866_v52, 16  ;;  %v1204_v59 = vshrl.u32 %v6867_v45, 16  ;;  %v1207_v49 = vshll.u32 %v6867_v45, 16 }
  0xc9   : > { %1641 = vrot.lane.b32.xlu0 %v1557_v41, %s7035_s18  ;;  %v586_v41 = vor.u32 %v585_v31, %v582_v30  ;;  %v7843_v31 = vld [vmem:[%s7159_s29 + $0x80] sm:$0xff]  }
  0xca   : > { %v2530_v56 = vpop.permute.xlu1 %2529  ;;  %v2769_v60 = vpop.permute.xlu0 %2768  ;;  %v1206_v24 = vrot.slane %v1204_v59, 3  ;;  %v1209_v15 = vrot.slane %v1207_v49, 4 }
  0xcb   : > { %2581 = vst.msk [vmem:[#allocation2 + $0x30] sm:$0xff] %vm2577_vm13, %v2530_v56  ;;  %v587_v50 = vsel %vm498_vm5, %v7696_v18, %v586_v41  ;;  %v6869_v56 = vld [vmem:[%s7159_s29 + $0x7c] sm:$0xff]   ;;  %v862_v18 = vrot.slane %v7781_v43, 3  ;;  %v6912_v43 = vld [vmem:[%s7159_s29 + $0x64] sm:$0xff]  }
  0xcc   : > { %2821 = vst.msk [vmem:[#allocation2 + $0x20] sm:$0xff] %vm2818_vm14, %v2769_v60  ;;  %1643 = vrot.lane.b32.xlu1 %v1566_v13, %s7035_s18  ;;  %v1197_v60 = vrot.slane %v1195_v9, 3  ;;  %v1577_v11 = vshrl.u32 %v6869_v56, 16  ;;  %v2479_v9 = vshll.u32 %v7843_v31, 16 }
  0xcd   : > { %1840 = vrot.lane.b32.xlu0 %v6852_v51, %s7032_s30  ;;  %v2749_v51 = vsel %vm2726_vm3, %v2746_v25, %v2748_v21  ;;  %696 = vst.msk [vmem:[#allocation2 + $0x80] sm:$0xff] %vm687_vm6, %v587_v50  ;;  %v7809_v25 = vor.u32 %v3081_v19, %v3078_v40  ;;  %v1580_v21 = vshll.u32 %v6869_v56, 16  ;;  %v863_v5 = vsel %vm836_vm0, %v860_v17, %v862_v18 }
  0xce   : > { %v2771_v23 = vpop.permute.xlu1 %2770  ;;  %v3143_v16 = vpop.permute.xlu0 %3142  ;;  %v1201_v55 = vor.u32 %v1200_v1, %v1197_v60  ;;  %v1579_v27 = vrot.slane %v1577_v11, 3  ;;  %v7840_v17 = vor.u32 %v1209_v15, %v1206_v24  ;;  %v2124_v19 = vshrl.u32 %v7714_v3, 16  ;;  %v6871_v15 = vld [vmem:[%s7159_s29 + $0x78] sm:$0xff]  }
  0xcf   : > { %2822 = vst.msk [vmem:[#allocation2 + $0x30] sm:$0xff] %vm2818_vm14, %v2771_v23  ;;  %v7819_v23 = vld [vmem:[%s7159_s29 + $0x78] sm:$0xff]   ;;  %v3083_v57 = vsel %vm2967_vm4, %v3073_v53, %v7809_v25  ;;  %v1582_v52 = vrot.slane %v1580_v21, 4  ;;  %v6880_v53 = vld [vmem:[%s7159_s29 + $0x80] sm:$0xff]   ;;  %v2475_v1 = vshrl.u32 %v7734_v62, 16  ;;  %v2481_v49 = vrot.slane %v2479_v9, 1 }
  0xd0   : > { %3195 = vst.msk [vmem:[#allocation2 + $0x20] sm:$0xff] %vm3192_vm15, %v3143_v16  ;;  %1842 = vrot.lane.b32.xlu1 %v6853_v20, %s7032_s30  ;;  %v596_v20 = vsel %vm498_vm5, %v586_v41, %v7786_v10  ;;  %v864_v16 = vrot.slane %v7813_v61, 3  ;;  %v2128_v30 = vshll.u32 %v7819_v23, 16  ;;  %v1202_v38 = vsel %vm1077_vm1, %v7711_v63, %v1201_v55 }
  0xd1   : > { %2192 = vrot.lane.b32.xlu0 %v2115_v4, %s7036_s20  ;;  %697 = vst.msk [vmem:[#allocation2 + $0x90] sm:$0xff] %vm687_vm6, %v596_v20  ;;  %v1568_v4 = vshrl.u32 %v6868_v54, 16  ;;  %v7856_v45 = vor.u32 %v1582_v52, %v1579_v27  ;;  %v2132_v63 = vshrl.u32 %v7819_v23, 16  ;;  %v607_v54 = vshrl.u32 %v6912_v43, 16  ;;  %v6870_v20 = vld [vmem:[%s7159_s29 + $0x70] sm:$0xff]  }
  0xd2   : > { %v883_v33 = vpop.permute.xlu1 %882  ;;  %v3145_v39 = vpop.permute.xlu0 %3144  ;;  %v865_v35 = vsel %vm836_vm0, %v862_v18, %v864_v16  ;;  %v2130_v41 = vrot.slane %v2128_v30, 1  ;;  %v610_v18 = vshll.u32 %v6912_v43, 16  ;;  %v2487_v23 = vshll.u32 %v7864_v48, 16 }
  0xd3   : > { %933 = vst.msk [vmem:[#allocation2 + $0x40] sm:$0xff] %vm928_vm8, %v883_v33  ;;  %v1570_v7 = vrot.slane %v1568_v4, 3  ;;  %v6911_v33 = vld [vmem:[%s7159_s29 + $0x5c] sm:$0xff]   ;;  %v609_v59 = vrot.slane %v607_v54, 2  ;;  %v7040_v24 = vmov 0  }
  0xd4   : > { %3196 = vst.msk [vmem:[#allocation2 + $0x30] sm:$0xff] %vm3192_vm15, %v3145_v39  ;;  %2194 = vrot.lane.b32.xlu1 %v2123_v46, %s7036_s20  ;;  %v7849_v39 = vld [vmem:[%s7159_s29 + $0x80] sm:$0xff]   ;;  %v598_v3 = vshrl.u32 %v6911_v33, 16  ;;  %v601_v50 = vshll.u32 %v6911_v33, 16  ;;  %v612_v0 = vrot.slane %v610_v18, 3  ;;  %6749 = vset.pattern.permute.xlu0 %v7040_v24  ;;  %v7909_v30 = vrot.slane %v2487_v23, 1 }
  0xd5   : > { %2543 = vrot.lane.b32.xlu0 %v2466_v36, %s7037_s21  ;;  %v1574_v34 = vor.u32 %v1573_v22, %v1570_v7  ;;  %6750 = vset.pattern.permute.xlu1 %v7040_v24  ;;  %v2477_v7 = vor.u32 %v2475_v1, %v7769_v42  ;;  %v6884_v33 = vld [vmem:[%s7159_s29 + $0x7c] sm:$0xff]  }
  0xd6   : > { %v885_v13 = vpop.permute.xlu1 %884  ;;  %v1257_v58 = vpop.permute.xlu0 %1256  ;;  %6668 = vmatprep.subr.bf16.mxu1 %v7040_v24  ;;  %5808 = vmatprep.subr.bf16.mxu0 %v7040_v24 }
  0xd7   : > { %934 = vst.msk [vmem:[#allocation2 + $0x50] sm:$0xff] %vm928_vm8, %v885_v13  ;;  %v3213_v28 = vld [vmem:[#allocation2 + $0x20] sm:$0xff]  ;;  %v1584_v60 = vsel %vm1077_vm1, %v1574_v34, %v7856_v45  ;;  %v2482_v43 = vsel %vm2023_vm2, %v2477_v7, %v2481_v49 }
  0xd8   : > { %1307 = vst.msk [vmem:[#allocation2 + $0x40] sm:$0xff] %vm1302_vm9, %v1257_v58  ;;  %2545 = vrot.lane.b32.xlu1 %v2474_v29, %s7037_s21  ;;  %6620 = vmatprep.mubr.msk.bf16.mxu0 %vm3256_vm7, %v3213_v28  ;;  %v1211_v29 = vsel %vm1077_vm1, %v1201_v55, %v7840_v17  ;;  %v2136_v58 = vshll.u32 %v7849_v39, 16  ;;  %v600_v28 = vrot.slane %v598_v3, 2  ;;  %v6881_v55 = vld [vmem:[%s7159_s29 + $0x88] sm:$0xff]  }
  0xd9   : > { %2784 = vrot.lane.b32.xlu0 %v2749_v51, %s9848_s27  ;;  %v1575_v51 = vsel %vm1077_vm1, %v7727_v44, %v1574_v34  ;;  %v2126_v44 = vor.u32 %v2124_v19, %v7746_v14  ;;  %v7886_v14 = vld [vmem:[%s7159_s29 + $0x88] sm:$0xff]   ;;  %v3094_v34 = vshrl.u32 %v6881_v55, 16 }
  0xda   : > { %v1259_v47 = vpop.permute.xlu1 %1258  ;;  %v1630_v46 = vpop.permute.xlu0 %1629 }
  0xdb   : > { %1308 = vst.msk [vmem:[#allocation2 + $0x50] sm:$0xff] %vm1302_vm9, %v1259_v47  ;;  %v3214_v12 = vld [vmem:[#allocation2 + $0x30] sm:$0xff]  ;;  %v2483_v47 = vshrl.u32 %v7843_v31, 16  ;;  %v3096_v32 = vrot.slane %v3094_v34, 1 }
  0xdc   : > { %1680 = vst.msk [vmem:[#allocation2 + $0x40] sm:$0xff] %vm1675_vm10, %v1630_v46  ;;  %2786 = vrot.lane.b32.xlu1 %v2751_v6, %s9848_s27  ;;  %6621 = vmatmul.mubr.msk.bf16.gmra.mrb[4].mxu0 %vm3256_vm7, %v3214_v12  ;;  %v603_v6 = vrot.slane %v601_v50, 3  ;;  %v3085_v46 = vshrl.u32 %v6880_v53, 16  ;;  %v3088_v12 = vshll.u32 %v6880_v53, 16  ;;  %v6919_v53 = vld [vmem:[%s7159_s29 + $0x74] sm:$0xff]  }
  0xdd   : > { %3158 = vrot.lane.b32.xlu0 %v3074_v2, %s9849_s28  ;;  %v7881_v2 = vld [vmem:[%s7159_s29 + $0x80] sm:$0xff]   ;;  %v2485_v52 = vor.u32 %v2483_v47, %v2481_v49  ;;  %v625_v18 = vshrl.u32 %v6919_v53, 16 }
  0xde   : > { %v1632_v37 = vpop.permute.xlu1 %1631  ;;  %v1829_v26 = vpop.permute.xlu0 %1828  ;;  %v604_v4 = vor.u32 %v603_v6, %v600_v28  ;;  %v2752_v22 = vrot.slane %v7881_v2, 1  ;;  %v3090_v31 = vrot.slane %v3088_v12, 2 }
  0xdf   : > { %1681 = vst.msk [vmem:[#allocation2 + $0x50] sm:$0xff] %vm1675_vm10, %v1632_v37  ;;  %v2131_v37 = vsel %vm2023_vm2, %v2126_v44, %v2130_v41  ;;  %v2490_v9 = vsel %vm2023_vm2, %v2485_v52, %v7909_v30  ;;  %v627_v23 = vrot.slane %v625_v18, 2 }
  0xe0   : > { %1879 = vst.msk [vmem:[#allocation2 + $0x40] sm:$0xff] %vm1874_vm11, %v1829_v26  ;;  %3160 = vrot.lane.b32.xlu1 %v3083_v57, %s9849_s28  ;;  %v605_v21 = vsel %vm498_vm5, %v7786_v10, %v604_v4  ;;  %v7890_v57 = vor.u32 %v612_v0, %v609_v59  ;;  %v7902_v10 = vrot.slane %v2136_v58, 1  ;;  %v2753_v3 = vsel %vm2726_vm3, %v2750_v8, %v2752_v22  ;;  %v6886_v58 = vld [vmem:[%s7159_s29 + $0x84] sm:$0xff]  }
  0xe1   : > { %898 = vrot.lane.b32.xlu0 %v863_v5, %s7033_s11  ;;  %v2134_v5 = vor.u32 %v2132_v63, %v2130_v41  ;;  %698 = vst.msk [vmem:[#allocation2 + $0xa0] sm:$0xff] %vm687_vm6, %v605_v21  ;;  %v3097_v41 = vshll.u32 %v6881_v55, 16  ;;  %v6918_v63 = vld [vmem:[%s7159_s29 + $0x6c] sm:$0xff]   ;;  %v1589_v7 = vshll.u32 %v6886_v58, 16 }
  0xe2   : > { %v1831_v36 = vpop.permute.xlu1 %1830  ;;  %v2181_v40 = vpop.permute.xlu0 %2180  ;;  %v614_v26 = vsel %vm498_vm5, %v604_v4, %v7890_v57  ;;  %v616_v28 = vshrl.u32 %v6918_v63, 16  ;;  %v619_v6 = vshll.u32 %v6918_v63, 16 }
  0xe3   : > { %1880 = vst.msk [vmem:[#allocation2 + $0x50] sm:$0xff] %vm1874_vm11, %v1831_v36  ;;  %v2754_v36 = vrot.slane %v7886_v14, 1  ;;  %v2139_v19 = vsel %vm2023_vm2, %v2134_v5, %v7902_v10  ;;  %v3099_v44 = vrot.slane %v3097_v41, 2 }
  0xe4   : > { %2231 = vst.msk [vmem:[#allocation2 + $0x40] sm:$0xff] %vm2226_vm12, %v2181_v40  ;;  %900 = vrot.lane.b32.xlu1 %v865_v35, %s7033_s11  ;;  %v3087_v35 = vrot.slane %v3085_v46, 1  ;;  %v7919_v40 = vld [vmem:[%s7159_s29 + $0x7c] sm:$0xff]   ;;  %v618_v59 = vrot.slane %v616_v28, 2  ;;  %v621_v49 = vrot.slane %v619_v6, 3 }
  0xe5   : > { %1272 = vrot.lane.b32.xlu0 %v1202_v38, %s7034_s12  ;;  %699 = vst.msk [vmem:[#allocation2 + $0xb0] sm:$0xff] %vm687_vm6, %v614_v26  ;;  %v6885_v38 = vld [vmem:[%s7159_s29 + $0x84] sm:$0xff]   ;;  %v866_v8 = vrot.slane %v7919_v40, 3  ;;  %v2755_v55 = vsel %vm2726_vm3, %v2752_v22, %v2754_v36 }
  0xe6   : > { %v2183_v13 = vpop.permute.xlu1 %2182  ;;  %v2532_v56 = vpop.permute.xlu0 %2531  ;;  %v7933_v50 = vor.u32 %v3090_v31, %v3087_v35  ;;  %v1225_v1 = vshll.u32 %v6885_v38, 16  ;;  %v622_v5 = vor.u32 %v621_v49, %v618_v59  ;;  %v7961_v35 = vor.u32 %v3099_v44, %v3096_v32  ;;  %v6890_v44 = vld [vmem:[%s7159_s29 + $0x88] sm:$0xff]  }
  0xe7   : > { %2232 = vst.msk [vmem:[#allocation2 + $0x50] sm:$0xff] %vm2226_vm12, %v2183_v13  ;;  %v7936_v13 = vld [vmem:[%s7159_s29 + $0x84] sm:$0xff]   ;;  %v2144_v40 = vshll.u32 %v6890_v44, 16 }
  0xe8   : > { %2582 = vst.msk [vmem:[#allocation2 + $0x40] sm:$0xff] %vm2577_vm13, %v2532_v56  ;;  %1274 = vrot.lane.b32.xlu1 %v1211_v29, %s7034_s12  ;;  %v1216_v56 = vshll.u32 %v6884_v33, 16  ;;  %v868_v4 = vrot.slane %v7936_v13, 3  ;;  %v3092_v52 = vsel %vm2967_vm4, %v7809_v25, %v7933_v50  ;;  %v1227_v31 = vrot.slane %v1225_v1, 4 }
  0xe9   : > { %1645 = vrot.lane.b32.xlu0 %v1575_v51, %s7035_s18  ;;  %v1213_v51 = vshrl.u32 %v6884_v33, 16  ;;  %v623_v33 = vsel %vm498_vm5, %v7890_v57, %v622_v5 }
  0xea   : > { %v2534_v11 = vpop.permute.xlu1 %2533  ;;  %v2773_v62 = vpop.permute.xlu0 %2772  ;;  %v1218_v21 = vrot.slane %v1216_v56, 4  ;;  %700 = vst.msk [vmem:[#allocation2 + $0xc0] sm:$0xff] %vm687_vm6, %v623_v33  ;;  %v869_v61 = vsel %vm836_vm0, %v866_v8, %v868_v4  ;;  %v2491_v33 = vshrl.u32 %v7864_v48, 16 }
  0xeb   : > { %2583 = vst.msk [vmem:[#allocation2 + $0x50] sm:$0xff] %vm2577_vm13, %v2534_v11  ;;  %v1215_v0 = vrot.slane %v1213_v51, 3  ;;  %v6887_v11 = vld [vmem:[%s7159_s29 + $0x8c] sm:$0xff]  }
  0xec   : > { %2823 = vst.msk [vmem:[#allocation2 + $0x40] sm:$0xff] %vm2818_vm14, %v2773_v62  ;;  %1647 = vrot.lane.b32.xlu1 %v1584_v60, %s7035_s18  ;;  %v628_v60 = vshll.u32 %v6919_v53, 16  ;;  %v1595_v2 = vshrl.u32 %v6887_v11, 16  ;;  %v1598_v25 = vshll.u32 %v6887_v11, 16  ;;  %v3101_v53 = vsel %vm2967_vm4, %v7933_v50, %v7961_v35 }
  0xed   : > { %1844 = vrot.lane.b32.xlu0 %v6870_v20, %s7032_s30  ;;  %v1222_v20 = vshrl.u32 %v6885_v38, 16  ;;  %v1219_v28 = vor.u32 %v1218_v21, %v1215_v0  ;;  %v2140_v21 = vshrl.u32 %v7849_v39, 16  ;;  %v6888_v39 = vld [vmem:[%s7159_s29 + $0x80] sm:$0xff]  }
  0xee   : > { %v2775_v27 = vpop.permute.xlu1 %2774  ;;  %v3147_v42 = vpop.permute.xlu0 %3146  ;;  %v630_v46 = vrot.slane %v628_v60, 3  ;;  %v1597_v18 = vrot.slane %v1595_v2, 3  ;;  %v1600_v50 = vrot.slane %v1598_v25, 4  ;;  %v6889_v2 = vld [vmem:[%s7159_s29 + $0x88] sm:$0xff]  }
  0xef   : > { %2824 = vst.msk [vmem:[#allocation2 + $0x50] sm:$0xff] %vm2818_vm14, %v2775_v27  ;;  %v6920_v27 = vld [vmem:[%s7159_s29 + $0x7c] sm:$0xff]  }
  0xf0   : > { %3197 = vst.msk [vmem:[#allocation2 + $0x40] sm:$0xff] %vm3192_vm15, %v3147_v42  ;;  %1846 = vrot.lane.b32.xlu1 %v6871_v15, %s7032_s30  ;;  %v1224_v15 = vrot.slane %v1222_v20, 3  ;;  %v631_v26 = vor.u32 %v630_v46, %v627_v23  ;;  %v6921_v42 = vld [vmem:[%s7159_s29 + $0x84] sm:$0xff]   ;;  %v634_v34 = vshrl.u32 %v6920_v27, 16  ;;  %v6892_v23 = vld [vmem:[%s7159_s29 + $0x90] sm:$0xff]   ;;  %v8013_v46 = vor.u32 %v1600_v50, %v1597_v18 }
  0xf1   : > { %2196 = vrot.lane.b32.xlu0 %v2131_v37, %s7036_s20  ;;  %v1586_v37 = vshrl.u32 %v6886_v58, 16  ;;  %v643_v63 = vshrl.u32 %v6921_v42, 16  ;;  %v867_v58 = vsel %vm836_vm0, %v864_v16, %v866_v8  ;;  %v8007_v8 = vld [vmem:[%s7159_s29 + $0x90] sm:$0xff]  }
  0xf2   : > { %v887_v29 = vpop.permute.xlu1 %886  ;;  %v3149_v54 = vpop.permute.xlu0 %3148  ;;  %v632_v22 = vsel %vm498_vm5, %v622_v5, %v631_v26  ;;  %v7995_v16 = vor.u32 %v1227_v31, %v1224_v15  ;;  %v2148_v5 = vshrl.u32 %v6890_v44, 16  ;;  %v2142_v31 = vor.u32 %v2140_v21, %v7902_v10  ;;  %v8059_v44 = vld [vmem:[%s7159_s29 + $0x8c] sm:$0xff]  }
  0xf3   : > { %935 = vst.msk [vmem:[#allocation2 + $0x60] sm:$0xff] %vm928_vm8, %v887_v29  ;;  %v646_v29 = vshll.u32 %v6921_v42, 16  ;;  %v1588_v57 = vrot.slane %v1586_v37, 3  ;;  %v2146_v37 = vrot.slane %v2144_v40, 1  ;;  %v2499_v10 = vshrl.u32 %v6892_v23, 16 }
  0xf4   : > { %3198 = vst.msk [vmem:[#allocation2 + $0x50] sm:$0xff] %vm3192_vm15, %v3149_v54  ;;  %2198 = vrot.lane.b32.xlu1 %v2139_v19, %s7036_s20  ;;  %v637_v19 = vshll.u32 %v6920_v27, 16  ;;  %v645_v54 = vrot.slane %v643_v63, 2  ;;  %v6898_v27 = vld [vmem:[%s7159_s29 + $0x90] sm:$0xff]  }
  0xf5   : > { %2547 = vrot.lane.b32.xlu0 %v2482_v43, %s7037_s21  ;;  %701 = vst.msk [vmem:[#allocation2 + $0xd0] sm:$0xff] %vm687_vm6, %v632_v22  ;;  %v648_v56 = vrot.slane %v646_v29, 3  ;;  %v2150_v22 = vor.u32 %v2148_v5, %v2146_v37  ;;  %v2147_v63 = vsel %vm2023_vm2, %v2142_v31, %v2146_v37  ;;  %v2493_v29 = vor.u32 %v2491_v33, %v7909_v30  ;;  %v6904_v37 = vld [vmem:[%s7159_s29 + $0x94] sm:$0xff]  }
  0xf6   : > { %v889_v47 = vpop.permute.xlu1 %888  ;;  %v1261_v12 = vpop.permute.xlu0 %1260  ;;  %v639_v51 = vrot.slane %v637_v19, 3  ;;  %v6923_v5 = vld [vmem:[%s7159_s29 + $0x94] ss:$0 sps:$4 sm:$0x77]  }
  0xf7   : > { %936 = vst.msk [vmem:[#allocation2 + $0x70] sm:$0xff] %vm928_vm8, %v889_v47  ;;  %v3215_v62 = vld [vmem:[#allocation2 + $0x40] sm:$0xff]  ;;  %v7983_v60 = vor.u32 %v648_v56, %v645_v54  ;;  %v1220_v47 = vsel %vm1077_vm1, %v7840_v17, %v1219_v28  ;;  %v1229_v17 = vsel %vm1077_vm1, %v1219_v28, %v7995_v16  ;;  %v6902_v54 = vld [vmem:[%s7159_s29 + $0x8c] sm:$0xff]   ;;  %v661_v31 = vshrl.u32 %v6923_v5, 16 }
  0xf8   : > { %2549 = vrot.lane.b32.xlu1 %v2490_v9, %s7037_s21  ;;  %1309 = vst.msk [vmem:[#allocation2 + $0x60] sm:$0xff] %vm1302_vm9, %v1261_v12  ;;  %6624 = vmatprep.mubr.msk.bf16.mxu0 %vm3256_vm7, %v3215_v62  ;;  %v1591_v9 = vrot.slane %v1589_v7, 4  ;;  %v2495_v7 = vshll.u32 %v6892_v23, 16  ;;  %v8069_v23 = vld [vmem:[%s7159_s29 + $0x94] ss:$0 sps:$4 sm:$0x77]  }
  0xf9   : > { %2788 = vrot.lane.b32.xlu0 %v2753_v3, %s9848_s27  ;;  %v636_v3 = vrot.slane %v634_v34, 2  ;;  %v664_v33 = vshll.u32 %v6923_v5, 16 }
  0xfa   : > { %v1263_v38 = vpop.permute.xlu1 %1262  ;;  %v1634_v41 = vpop.permute.xlu0 %1633  ;;  %v1592_v0 = vor.u32 %v1591_v9, %v1588_v57  ;;  %v2497_v19 = vrot.slane %v2495_v7, 1  ;;  %v6896_v57 = vld [vmem:[%s7159_s29 + $0x90] sm:$0xff]   ;;  %v8045_v9 = vld [vmem:[%s7159_s29 + $0x98] sm:$0xff]  }
  0xfb   : > { %1310 = vst.msk [vmem:[#allocation2 + $0x70] sm:$0xff] %vm1302_vm9, %v1263_v38  ;;  %v3216_v43 = vld [vmem:[#allocation2 + $0x50] sm:$0xff]  ;;  %v640_v6 = vor.u32 %v639_v51, %v636_v3  ;;  %v6899_v38 = vld [vmem:[%s7159_s29 + $0x98] sm:$0xff]   ;;  %v2756_v18 = vrot.slane %v6896_v57, 1  ;;  %v2758_v50 = vrot.slane %v8045_v9, 1  ;;  %v872_v57 = vrot.slane %v8069_v23, 3 }
  0xfc   : > { %2790 = vrot.lane.b32.xlu1 %v2755_v55, %s9848_s27  ;;  %6625 = vmatmul.mubr.msk.bf16.gmra.mrb[8].mxu0 %vm3256_vm7, %v3216_v43  ;;  %1682 = vst.msk [vmem:[#allocation2 + $0x60] sm:$0xff] %vm1675_vm10, %v1634_v41  ;;  %v1593_v62 = vsel %vm1077_vm1, %v7856_v45, %v1592_v0  ;;  %v2152_v55 = vshll.u32 %v8007_v8, 16  ;;  %v1602_v45 = vsel %vm1077_vm1, %v1592_v0, %v8013_v46  ;;  %v3103_v43 = vshrl.u32 %v6898_v27, 16  ;;  %v6903_v0 = vld [vmem:[%s7159_s29 + $0x94] ss:$0 sps:$4 sm:$0xff]  }
  0xfd   : > { %3162 = vrot.lane.b32.xlu0 %v3092_v52, %s9849_s28  ;;  %v641_v1 = vsel %vm498_vm5, %v631_v26, %v640_v6  ;;  %v650_v59 = vsel %vm498_vm5, %v640_v6, %v7983_v60  ;;  %v8027_v26 = vld [vmem:[%s7159_s29 + $0x98] sm:$0xff]   ;;  %v3106_v41 = vshll.u32 %v6898_v27, 16  ;;  %v3112_v51 = vshrl.u32 %v6899_v38, 16 }
  0xfe   : > { %v1636_v20 = vpop.permute.xlu1 %1635  ;;  %v1833_v32 = vpop.permute.xlu0 %1832  ;;  %702 = vst.msk [vmem:[#allocation2 + $0xe0] sm:$0xff] %vm687_vm6, %v641_v1  ;;  %703 = vst.msk [vmem:[#allocation2 + $0xf0] sm:$0xff] %vm687_vm6, %v650_v59  ;;  %v8037_v34 = vrot.slane %v2152_v55, 1  ;;  %v2503_v48 = vshll.u32 %v8027_v26, 16  ;;  %v2501_v30 = vor.u32 %v2499_v10, %v2497_v19  ;;  %v2759_v21 = vsel %vm2726_vm3, %v2756_v18, %v2758_v50 }
  0xff   : > { %1683 = vst.msk [vmem:[#allocation2 + $0x70] sm:$0xff] %vm1675_vm10, %v1636_v20  ;;  %v3108_v28 = vrot.slane %v3106_v41, 2  ;;  %v1607_v41 = vshll.u32 %v6904_v37, 16 }
 0x100   : > { %3164 = vrot.lane.b32.xlu1 %v3101_v53, %s9849_s28  ;;  %1881 = vst.msk [vmem:[#allocation2 + $0x60] sm:$0xff] %vm1874_vm11, %v1833_v32  ;;  %v3115_v53 = vshll.u32 %v6899_v38, 16  ;;  %v2155_v56 = vsel %vm2023_vm2, %v2150_v22, %v8037_v34  ;;  %v8054_v20 = vrot.slane %v2503_v48, 1  ;;  %v2498_v32 = vsel %vm2023_vm2, %v2493_v29, %v2497_v19 }
 0x101   : > { %902 = vrot.lane.b32.xlu0 %v867_v58, %s7033_s11  ;;  %v3105_v58 = vrot.slane %v3103_v43, 1  ;;  %v1243_v38 = vshll.u32 %v6903_v0, 16  ;;  %v1604_v43 = vshrl.u32 %v6904_v37, 16  ;;  %v2156_v37 = vshrl.u32 %v8007_v8, 16 }
 0x102   : > { %v1835_v49 = vpop.permute.xlu1 %1834  ;;  %v2185_v11 = vpop.permute.xlu0 %2184  ;;  %v3117_v59 = vrot.slane %v3115_v53, 2 }
 0x103   : > { %1882 = vst.msk [vmem:[#allocation2 + $0x70] sm:$0xff] %vm1874_vm11, %v1835_v49  ;;  %v1231_v49 = vshrl.u32 %v6902_v54, 16  ;;  %v3109_v40 = vor.u32 %v3108_v28, %v3105_v58 }
 0x104   : > { %904 = vrot.lane.b32.xlu1 %v869_v61, %s7033_s11  ;;  %2233 = vst.msk [vmem:[#allocation2 + $0x60] sm:$0xff] %vm2226_vm12, %v2185_v11  ;;  %v3114_v61 = vrot.slane %v3112_v51, 1  ;;  %v2506_v11 = vsel %vm2023_vm2, %v2501_v30, %v8054_v20 }
 0x105   : > { %1276 = vrot.lane.b32.xlu0 %v1220_v47, %s7034_s12  ;;  %v1234_v47 = vshll.u32 %v6902_v54, 16 }
 0x106   : > { %v2187_v12 = vpop.permute.xlu1 %2186  ;;  %v2536_v15 = vpop.permute.xlu0 %2535 }
 0x107   : > { %2234 = vst.msk [vmem:[#allocation2 + $0x70] sm:$0xff] %vm2226_vm12, %v2187_v12 }
 0x108   : > { %1278 = vrot.lane.b32.xlu1 %v1229_v17, %s7034_s12  ;;  %2584 = vst.msk [vmem:[#allocation2 + $0x60] sm:$0xff] %vm2577_vm13, %v2536_v15  ;;  %v6922_v17 = vld [vmem:[%s7159_s29 + $0x8c] sm:$0xff]   ;;  %v870_v15 = vrot.slane %v8059_v44, 3  ;;  %v1609_v44 = vrot.slane %v1607_v41, 4 }
 0x109   : > { %1649 = vrot.lane.b32.xlu0 %v1593_v62, %s7035_s18  ;;  %v2757_v62 = vsel %vm2726_vm3, %v2754_v36, %v2756_v18  ;;  %v652_v27 = vshrl.u32 %v6922_v17, 16  ;;  %v655_v14 = vshll.u32 %v6922_v17, 16  ;;  %v1236_v36 = vrot.slane %v1234_v47, 4  ;;  %v6909_v17 = vld [vmem:[%s7159_s29 + $0xa0] ss:$0 sps:$4 sm:$0x11]  }
 0x10a   : > { %v2538_v52 = vpop.permute.xlu1 %2537  ;;  %v2777_v42 = vpop.permute.xlu0 %2776  ;;  %v871_v51 = vsel %vm836_vm0, %v868_v4, %v870_v15  ;;  %v1606_v18 = vrot.slane %v1604_v43, 3 }
 0x10b   : > { %2585 = vst.msk [vmem:[#allocation2 + $0x70] sm:$0xff] %vm2577_vm13, %v2538_v52  ;;  %v1240_v52 = vshrl.u32 %v6903_v0, 16  ;;  %v654_v22 = vrot.slane %v652_v27, 2  ;;  %v657_v19 = vrot.slane %v655_v14, 3  ;;  %v6906_v14 = vld [vmem:[%s7159_s29 + $0x90] sm:$0xff]  }
 0x10c   : > { %1651 = vrot.lane.b32.xlu1 %v1602_v45, %s7035_s18  ;;  %2825 = vst.msk [vmem:[#allocation2 + $0x60] sm:$0xff] %vm2818_vm14, %v2777_v42  ;;  %v8082_v45 = vor.u32 %v3117_v59, %v3114_v61  ;;  %v3110_v42 = vsel %vm2967_vm4, %v7961_v35, %v3109_v40 }
 0x10d   : > { %1848 = vrot.lane.b32.xlu0 %v6888_v39, %s7032_s30  ;;  %v1233_v39 = vrot.slane %v1231_v49, 3  ;;  %v1242_v53 = vrot.slane %v1240_v52, 3  ;;  %v2158_v52 = vor.u32 %v2156_v37, %v8037_v34  ;;  %v6917_v34 = vld [vmem:[%s7159_s29 + $0xa8] ss:$0 sps:$4 sm:$0x33]   ;;  %v3536_v37 = vld [vmem:[%s9806_s1 + $0x40] sm:$0xff] }
 0x10e   : > { %v2779_v25 = vpop.permute.xlu1 %2778  ;;  %v3151_v3 = vpop.permute.xlu0 %3150  ;;  %v3119_v35 = vsel %vm2967_vm4, %v3109_v40, %v8082_v45 }
 0x10f   : > { %2826 = vst.msk [vmem:[#allocation2 + $0x70] sm:$0xff] %vm2818_vm14, %v2779_v25  ;;  %v663_v25 = vrot.slane %v661_v31, 2  ;;  %v2507_v31 = vshrl.u32 %v8027_v26, 16 }
 0x110   : > { %1850 = vrot.lane.b32.xlu1 %v6889_v2, %s7032_s30  ;;  %3199 = vst.msk [vmem:[#allocation2 + $0x60] sm:$0xff] %vm3192_vm15, %v3151_v3  ;;  %v6905_v2 = vld [vmem:[%s7159_s29 + $0x9c] ss:$0 sps:$4 sm:$0xff]   ;;  %v658_v3 = vor.u32 %v657_v19, %v654_v22 }
 0x111   : > { %2200 = vrot.lane.b32.xlu0 %v2147_v63, %s7036_s20  ;;  %v666_v63 = vrot.slane %v664_v33, 3  ;;  %v1613_v30 = vshrl.u32 %v6905_v2, 16  ;;  %v1616_v58 = vshll.u32 %v6905_v2, 16  ;;  %v6916_v33 = vld [vmem:[%s7159_s29 + $0xa0] sm:$0xff]   ;;  %v2509_v41 = vor.u32 %v2507_v31, %v8054_v20 }
 0x112   : > { %v3153_v6 = vpop.permute.xlu1 %3152  ;;  %v891_v1 = vpop.permute.xlu0 %890  ;;  %v659_v28 = vsel %vm498_vm5, %v7983_v60, %v658_v3  ;;  %v873_v60 = vsel %vm836_vm0, %v870_v15, %v872_v57  ;;  %vm3780_vm0 = vcmask 130048  }
 0x113   : > { %3200 = vst.msk [vmem:[#allocation2 + $0x70] sm:$0xff] %vm3192_vm15, %v3153_v6  ;;  %v667_v54 = vor.u32 %v666_v63, %v663_v25  ;;  %v1615_v59 = vrot.slane %v1613_v30, 3  ;;  %v1618_v49 = vrot.slane %v1616_v58, 4  ;;  %v6914_v25 = vld [vmem:[%s7159_s29 + $0xa0] sm:$0xff]   ;;  %v3121_v63 = vshrl.u32 %v6916_v33, 16 }
 0x114   : > { %2202 = vrot.lane.b32.xlu1 %v2155_v56, %s7036_s20  ;;  %937 = vst.msk [vmem:[#allocation2 + $0x80] sm:$0xff] %vm928_vm8, %v891_v1  ;;  %v1245_v56 = vrot.slane %v1243_v38, 4  ;;  %v6908_v1 = vld [vmem:[%s7159_s29 + $0x98] sm:$0xff]   ;;  %v2760_v58 = vrot.slane %v6914_v25, 1 }
 0x115   : > { %2551 = vrot.lane.b32.xlu0 %v2498_v32, %s7037_s21  ;;  %v1237_v32 = vor.u32 %v1236_v36, %v1233_v39  ;;  %704 = vst.msk [vmem:[#allocation2 + $0x100] sm:$0xff] %vm687_vm6, %v659_v28  ;;  %v668_v13 = vsel %vm498_vm5, %v658_v3, %v667_v54  ;;  %v2160_v23 = vshll.u32 %v6908_v1, 16  ;;  %v2168_v39 = vshll.u32 %v6909_v17, 16  ;;  %v6913_v36 = vld [vmem:[%s7159_s29 + $0xa8] ss:$0 sps:$4 sm:$0x11]  }
 0x116   : > { %v893_v12 = vpop.permute.xlu1 %892  ;;  %v1265_v55 = vpop.permute.xlu0 %1264  ;;  %705 = vst.msk [vmem:[#allocation2 + $0x110] sm:$0xff] %vm687_vm6, %v668_v13  ;;  %v1246_v61 = vor.u32 %v1245_v56, %v1242_v53  ;;  %v6907_v38 = vld [vmem:[%s7159_s29 + $0x98] sm:$0xff]   ;;  %v6915_v53 = vld [vmem:[%s7159_s29 + $0xa8] ss:$0 sps:$4 sm:$0x11]   ;;  %v3130_v54 = vshrl.u32 %v6917_v34, 16 }
 0x117   : > { %938 = vst.msk [vmem:[#allocation2 + $0x90] sm:$0xff] %vm928_vm8, %v893_v12  ;;  %v3217_v7 = vld [vmem:[#allocation2 + $0x60] sm:$0xff]  ;;  %v1238_v0 = vsel %vm1077_vm1, %v7995_v16, %v1237_v32  ;;  %v2170_v22 = vrot.slane %v2168_v39, 1  ;;  %v3133_v56 = vshll.u32 %v6917_v34, 16  ;;  %v3123_v28 = vrot.slane %v3121_v63, 1  ;;  %v3547_v25 = vld [vmem:[%s9806_s1 + $0x98] sm:$0xff] }
 0x118   : > { %2553 = vrot.lane.b32.xlu1 %v2506_v11, %s7037_s21  ;;  %1311 = vst.msk [vmem:[#allocation2 + $0x80] sm:$0xff] %vm1302_vm9, %v1265_v55  ;;  %6628 = vmatprep.mubr.msk.bf16.mxu0 %vm3256_vm7, %v3217_v7  ;;  %v1610_v11 = vor.u32 %v1609_v44, %v1606_v18  ;;  %v1247_v12 = vsel %vm1077_vm1, %v1237_v32, %v1246_v61  ;;  %v2162_v55 = vrot.slane %v2160_v23, 1  ;;  %v2164_v7 = vshrl.u32 %v6908_v1, 16  ;;  %v3532_v39 = vld [vmem:[%s9806_s1 + $0x20] sm:$0xff] }
 0x119   : > { %2792 = vrot.lane.b32.xlu0 %v2757_v62, %s9848_s27  ;;  %v1619_v62 = vor.u32 %v1618_v49, %v1615_v59  ;;  %v2762_v44 = vrot.slane %v6915_v53, 1  ;;  %v3132_v13 = vrot.slane %v3130_v54, 1  ;;  %3781 = vst.msk [vmem:[#allocation3] sm:$0xff] %vm3780_vm0, %v7040_v24  ;;  %3782 = vst.msk [vmem:[#allocation3 + $0x8] sm:$0xff] %vm3780_vm0, %v7040_v24  ;;  %v3551_v54 = vld [vmem:[%s9806_s1 + $0xb8] sm:$0xff] }
 0x11a   : > { %v1267_v10 = vpop.permute.xlu1 %1266  ;;  %v3218_v48 = vld [vmem:[#allocation2 + $0x70] sm:$0xff]  ;;  %v1638_v29 = vpop.permute.xlu0 %1637  ;;  %v1611_v16 = vsel %vm1077_vm1, %v8013_v46, %v1610_v11  ;;  %v2166_v2 = vor.u32 %v2164_v7, %v2162_v55  ;;  %v2163_v43 = vsel %vm2023_vm2, %v2158_v52, %v2162_v55  ;;  %3783 = vst.msk [vmem:[#allocation3 + $0xa0] sm:$0xff] %vm3780_vm0, %v7040_v24  ;;  %3784 = vst.msk [vmem:[#allocation3 + $0xa8] sm:$0xff] %vm3780_vm0, %v7040_v24  ;;  %v3533_v55 = vld [vmem:[%s9806_s1 + $0x28] sm:$0xff]  ;;  %vm4215_vm5 = vsmask.f32 256 }
 0x11b   : > { %1312 = vst.msk [vmem:[#allocation2 + $0x90] sm:$0xff] %vm1302_vm9, %v1267_v10  ;;  %6629 = vmatmul.mubr.msk.bf16.gmra.mrb[12].mxu0 %vm3256_vm7, %v3218_v48  ;;  %v1620_v27 = vsel %vm1077_vm1, %v1610_v11, %v1619_v62  ;;  %v2519_v48 = vshll.u32 %v6913_v36, 16  ;;  %v3535_v62 = vld [vmem:[%s9806_s1 + $0x38] sm:$0xff]  ;;  %v3538_v36 = vld [vmem:[%s9806_s1 + $0x50] sm:$0xff]  ;;  %v3541_v52 = vld [vmem:[%s9806_s1 + $0x68] sm:$0xff]  ;;  %vm4085_vm1 = vcmask 1040384  }
 0x11c   : > { %2794 = vrot.lane.b32.xlu1 %v2759_v21, %s9848_s27  ;;  %1684 = vst.msk [vmem:[#allocation2 + $0x80] sm:$0xff] %vm1675_vm10, %v1638_v29  ;;  %v6910_v21 = vld [vmem:[%s7159_s29 + $0xa0] sm:$0xff]   ;;  %v3124_v29 = vshll.u32 %v6916_v33, 16  ;;  %v2171_v3 = vsel %vm2023_vm2, %v2166_v2, %v2170_v22  ;;  %v3542_v22 = vld [vmem:[%s9806_s1 + $0x70] sm:$0xff]  ;;  %vm3840_vm6 = vsmask.f32 1280 }
 0x11d   : > { %3166 = vrot.lane.b32.xlu0 %v3110_v42, %s9849_s28  ;;  %v2511_v46 = vshll.u32 %v6910_v21, 16  ;;  %v2515_v10 = vshrl.u32 %v6910_v21, 16  ;;  %v3540_v33 = vld [vmem:[%s9806_s1 + $0x60] sm:$0xff]  ;;  %s9843_s29 = sshll.u32 %s7127_s17, 4 }
 0x11e   : > { %v1640_v6 = vpop.permute.xlu1 %1639  ;;  %v1837_v4 = vpop.permute.xlu0 %1836 }
 0x11f   : > { %1685 = vst.msk [vmem:[#allocation2 + $0x90] sm:$0xff] %vm1675_vm10, %v1640_v6  ;;  %v2513_v19 = vrot.slane %v2511_v46, 1  ;;  %v3126_v6 = vrot.slane %v3124_v29, 2  ;;  %v3546_v29 = vld [vmem:[%s9806_s1 + $0x90] sm:$0xff] }
 0x120   : > { %3168 = vrot.lane.b32.xlu1 %v3119_v35, %s9849_s28  ;;  %1883 = vst.msk [vmem:[#allocation2 + $0x80] sm:$0xff] %vm1874_vm11, %v1837_v4  ;;  %v3135_v4 = vrot.slane %v3133_v56, 2 }
 0x121   : > { %906 = vrot.lane.b32.xlu0 %v871_v51, %s7033_s11  ;;  %v2517_v35 = vor.u32 %v2515_v10, %v2513_v19  ;;  %v2521_v51 = vrot.slane %v2519_v48, 1  ;;  %v2514_v30 = vsel %vm2023_vm2, %v2509_v41, %v2513_v19  ;;  %v3127_v61 = vor.u32 %v3126_v6, %v3123_v28  ;;  %v3545_v10 = vld [vmem:[%s9806_s1 + $0x88] sm:$0xff]  ;;  %v3552_v6 = vld [vmem:[%s9806_s1 + $0xc0] sm:$0xff] }
 0x122   : > { %v1839_v47 = vpop.permute.xlu1 %1838  ;;  %v2189_v40 = vpop.permute.xlu0 %2188 }
 0x123   : > { %1884 = vst.msk [vmem:[#allocation2 + $0x90] sm:$0xff] %vm1874_vm11, %v1839_v47  ;;  %v2522_v18 = vsel %vm2023_vm2, %v2517_v35, %v2521_v51  ;;  %v2763_v47 = vsel %vm2726_vm3, %v2760_v58, %v2762_v44  ;;  %v3548_v51 = vld [vmem:[%s9806_s1 + $0xa0] sm:$0xff] }
 0x124   : > { %908 = vrot.lane.b32.xlu1 %v873_v60, %s7033_s11  ;;  %2235 = vst.msk [vmem:[#allocation2 + $0x80] sm:$0xff] %vm2226_vm12, %v2189_v40  ;;  %v2761_v60 = vsel %vm2726_vm3, %v2758_v50, %v2760_v58  ;;  %v3128_v50 = vsel %vm2967_vm4, %v8082_v45, %v3127_v61  ;;  %v3553_v58 = vld [vmem:[%s9806_s1 + $0xc8] sm:$0xff]  ;;  %s7045_s11 = smov 96  }
 0x125   : > { %1280 = vrot.lane.b32.xlu0 %v1238_v0, %s7034_s12  ;;  %v3136_v0 = vor.u32 %v3135_v4, %v3132_v13  ;;  %v3528_v13 = vld [vmem:[%s9806_s1] sm:$0xff] }
 0x126   : > { %v2191_v15 = vpop.permute.xlu1 %2190  ;;  %v2540_v5 = vpop.permute.xlu0 %2539 }
 0x127   : > { %2236 = vst.msk [vmem:[#allocation2 + $0x90] sm:$0xff] %vm2226_vm12, %v2191_v15  ;;  %v3137_v23 = vsel %vm2967_vm4, %v3127_v61, %v3136_v0  ;;  %v3537_v15 = vld [vmem:[%s9806_s1 + $0x48] sm:$0xff]  ;;  %v3530_v61 = vld [vmem:[%s9806_s1 + $0x10] sm:$0xff] }
 0x128   : > { %1282 = vrot.lane.b32.xlu1 %v1247_v12, %s7034_s12  ;;  %2586 = vst.msk [vmem:[#allocation2 + $0x80] sm:$0xff] %vm2577_vm13, %v2540_v5  ;;  %v3534_v12 = vld [vmem:[%s9806_s1 + $0x30] sm:$0xff]  ;;  %s7041_s12 = smov 64  }
 0x129   : > { %1653 = vrot.lane.b32.xlu0 %v1611_v16, %s7035_s18  ;;  %v3554_v0 = vld [vmem:[%s9806_s1 + $0xd0] sm:$0xff] }
 0x12a   : > { %v2542_v8 = vpop.permute.xlu1 %2541 }
 0x12b   : > { %2587 = vst.msk [vmem:[#allocation2 + $0x90] sm:$0xff] %vm2577_vm13, %v2542_v8  ;;  %v2781_v42 = vpop.permute.xlu0 %2780 }
 0x12c   : > { %1655 = vrot.lane.b32.xlu1 %v1620_v27, %s7035_s18  ;;  %2827 = vst.msk [vmem:[#allocation2 + $0x80] sm:$0xff] %vm2818_vm14, %v2781_v42 }
 0x12d   : > { %1852 = vrot.lane.b32.xlu0 %v6906_v14, %s7032_s30  ;;  %v3539_v14 = vld [vmem:[%s9806_s1 + $0x58] sm:$0xff] }
 0x12e   : > { %v2783_v26 = vpop.permute.xlu1 %2782 }
 0x12f   : > { %2828 = vst.msk [vmem:[#allocation2 + $0x90] sm:$0xff] %vm2818_vm14, %v2783_v26  ;;  %v3155_v57 = vpop.permute.xlu0 %3154  ;;  %v3544_v26 = vld [vmem:[%s9806_s1 + $0x80] sm:$0xff] }
 0x130   : > { %1854 = vrot.lane.b32.xlu1 %v6907_v38, %s7032_s30  ;;  %3201 = vst.msk [vmem:[#allocation2 + $0x80] sm:$0xff] %vm3192_vm15, %v3155_v57  ;;  %v3543_v38 = vld [vmem:[%s9806_s1 + $0x78] sm:$0xff] }
 0x131   : > { %2204 = vrot.lane.b32.xlu0 %v2163_v43, %s7036_s20 }
 0x132   : > { %v3157_v20 = vpop.permute.xlu1 %3156 }
 0x133   : > { %3202 = vst.msk [vmem:[#allocation2 + $0x90] sm:$0xff] %vm3192_vm15, %v3157_v20  ;;  %v895_v32 = vpop.permute.xlu0 %894  ;;  %v3550_v20 = vld [vmem:[%s9806_s1 + $0xb0] sm:$0xff] }
 0x134   : > { %2206 = vrot.lane.b32.xlu1 %v2171_v3, %s7036_s20  ;;  %939 = vst.msk [vmem:[#allocation2 + $0xa0] sm:$0xff] %vm928_vm8, %v895_v32  ;;  %v3549_v3 = vld [vmem:[%s9806_s1 + $0xa8] sm:$0xff]  ;;  %s9723_s20 = sand.u32 1, %s7022_s14  }
 0x135   : > { %2555 = vrot.lane.b32.xlu0 %v2514_v30, %s7037_s21  ;;  %s355_s25 = scalar_lea.vmem [#allocation4], %s9723_s20 }
 0x136   : > { %v897_v1 = vpop.permute.xlu1 %896 }
 0x137   : > { %940 = vst.msk [vmem:[#allocation2 + $0xb0] sm:$0xff] %vm928_vm8, %v897_v1  ;;  %v1269_v59 = vpop.permute.xlu0 %1268  ;;  %v3219_v49 = vld [vmem:[#allocation2 + $0x80] sm:$0xff]  ;;  %v3531_v1 = vld [vmem:[%s9806_s1 + $0x18] sm:$0xff] }
 0x138   : > { %2557 = vrot.lane.b32.xlu1 %v2522_v18, %s7037_s21  ;;  %1313 = vst.msk [vmem:[#allocation2 + $0xa0] sm:$0xff] %vm1302_vm9, %v1269_v59  ;;  %6632 = vmatprep.mubr.msk.bf16.mxu0 %vm3256_vm7, %v3219_v49  ;;  %v3529_v18 = vld [vmem:[%s9806_s1 + $0x8] sm:$0xff]  ;;  %v3555_v49 = vld [vmem:[%s9806_s1 + $0xd8] sm:$0xff]  ;;  %s7044_s21 = smov 112  }
 0x139   : > { %2796 = vrot.lane.b32.xlu0 %v2761_v60, %s9848_s27 }
 0x13a   : > { %v1271_v11 = vpop.permute.xlu1 %1270  ;;  %v3220_v9 = vld [vmem:[#allocation2 + $0x90] sm:$0xff] }
 0x13b   : > { %1314 = vst.msk [vmem:[#allocation2 + $0xb0] sm:$0xff] %vm1302_vm9, %v1271_v11  ;;  %6633 = vmatmul.mubr.msk.bf16.gmra.mrb[16].mxu0 %vm3256_vm7, %v3220_v9  ;;  %v1642_v40 = vpop.permute.xlu0 %1641  ;;  %v3557_v9 = vld [vmem:[%s9806_s1 + $0xe8] sm:$0xff] }
 0x13c   : > { %2798 = vrot.lane.b32.xlu1 %v2763_v47, %s9848_s27  ;;  %1686 = vst.msk [vmem:[#allocation2 + $0xa0] sm:$0xff] %vm1675_vm10, %v1642_v40  ;;  %s7043_s27 = smov 80  }
 0x13d   : > { %3170 = vrot.lane.b32.xlu0 %v3128_v50, %s9849_s28 }
 0x13e   : > { %v1644_v17 = vpop.permute.xlu1 %1643 }
 0x13f   : > { %1687 = vst.msk [vmem:[#allocation2 + $0xb0] sm:$0xff] %vm1675_vm10, %v1644_v17  ;;  %v1841_v45 = vpop.permute.xlu0 %1840 }
 0x140   : > { %3172 = vrot.lane.b32.xlu1 %v3137_v23, %s9849_s28  ;;  %1885 = vst.msk [vmem:[#allocation2 + $0xa0] sm:$0xff] %vm1874_vm11, %v1841_v45  ;;  %v3556_v23 = vld [vmem:[%s9806_s1 + $0xe0] sm:$0xff]  ;;  %v3559_v45 = vld [vmem:[%s9806_s1 + $0xf8] sm:$0xff] }
 0x141   : > { %3596 = vperm.xlu0 %6749, %v3534_v12  }
 0x142   : > { %v1843_v21 = vpop.permute.xlu1 %1842 }
 0x143   : > { %1886 = vst.msk [vmem:[#allocation2 + $0xb0] sm:$0xff] %vm1874_vm11, %v1843_v21  ;;  %v2193_v16 = vpop.permute.xlu0 %2192  ;;  %v3558_v21 = vld [vmem:[%s9806_s1 + $0xf0] sm:$0xff] }
 0x144   : > { %3601 = vperm.xlu1 %6750, %v3535_v62   ;;  %2237 = vst.msk [vmem:[#allocation2 + $0xa0] sm:$0xff] %vm2226_vm12, %v2193_v16  ;;  %v3560_v16 = vld [vmem:[%s9806_s1 + $0x100] sm:$0xff] }
 0x145   : > { %3611 = vperm.xlu0 %6749, %v3537_v15  }
 0x146   : > { %v2195_v5 = vpop.permute.xlu1 %2194 }
 0x147   : > { %2238 = vst.msk [vmem:[#allocation2 + $0xb0] sm:$0xff] %vm2226_vm12, %v2195_v5  ;;  %v2544_v7 = vpop.permute.xlu0 %2543  ;;  %v3561_v5 = vld [vmem:[%s9806_s1 + $0x108] sm:$0xff] }
 0x148   : > { %3606 = vperm.xlu1 %6750, %v3536_v37   ;;  %2588 = vst.msk [vmem:[#allocation2 + $0xa0] sm:$0xff] %vm2577_vm13, %v2544_v7  ;;  %v3563_v7 = vld [vmem:[%s9806_s1 + $0x118] sm:$0xff] }
 0x149   : > { %3591 = vperm.xlu0 %6749, %v3533_v55  }
 0x14a   : > { %v2546_v27 = vpop.permute.xlu1 %2545 }
 0x14b   : > { %2589 = vst.msk [vmem:[#allocation2 + $0xb0] sm:$0xff] %vm2577_vm13, %v2546_v27  ;;  %v2785_v46 = vpop.permute.xlu0 %2784  ;;  %v3562_v27 = vld [vmem:[%s9806_s1 + $0x110] sm:$0xff] }
 0x14c   : > { %3586 = vperm.xlu1 %6750, %v3532_v39   ;;  %2829 = vst.msk [vmem:[#allocation2 + $0xa0] sm:$0xff] %vm2818_vm14, %v2785_v46 }
 0x14d   : > { %3621 = vperm.xlu0 %6749, %v3539_v14  }
 0x14e   : > { %v2787_v8 = vpop.permute.xlu1 %2786 }
 0x14f   : > { %2830 = vst.msk [vmem:[#allocation2 + $0xb0] sm:$0xff] %vm2818_vm14, %v2787_v8  ;;  %v3159_v31 = vpop.permute.xlu0 %3158 }
 0x150   : > { %3616 = vperm.xlu1 %6750, %v3538_v36   ;;  %3203 = vst.msk [vmem:[#allocation2 + $0xa0] sm:$0xff] %vm3192_vm15, %v3159_v31 }
 0x151   : > { %3631 = vperm.xlu0 %6749, %v3541_v52  }
 0x152   : > { %v3161_v42 = vpop.permute.xlu1 %3160 }
 0x153   : > { %3204 = vst.msk [vmem:[#allocation2 + $0xb0] sm:$0xff] %vm3192_vm15, %v3161_v42  ;;  %v899_v2 = vpop.permute.xlu0 %898 }
 0x154   : > { %3626 = vperm.xlu1 %6750, %v3540_v33   ;;  %941 = vst.msk [vmem:[#allocation2 + $0xc0] sm:$0xff] %vm928_vm8, %v899_v2 }
 0x155   : > { %3641 = vperm.xlu0 %6749, %v3543_v38  }
 0x156   : > { %v901_v19 = vpop.permute.xlu1 %900 }
 0x157   : > { %942 = vst.msk [vmem:[#allocation2 + $0xd0] sm:$0xff] %vm928_vm8, %v901_v19  ;;  %v1273_v48 = vpop.permute.xlu0 %1272  ;;  %v3221_v34 = vld [vmem:[#allocation2 + $0xa0] sm:$0xff] }
 0x158   : > { %3636 = vperm.xlu1 %6750, %v3542_v22   ;;  %1315 = vst.msk [vmem:[#allocation2 + $0xc0] sm:$0xff] %vm1302_vm9, %v1273_v48  ;;  %6636 = vmatprep.mubr.msk.bf16.mxu0 %vm3256_vm7, %v3221_v34 }
 0x159   : > { %3651 = vperm.xlu0 %6749, %v3545_v10  }
 0x15a   : > { %v1275_v43 = vpop.permute.xlu1 %1274  ;;  %v3222_v41 = vld [vmem:[#allocation2 + $0xb0] sm:$0xff] }
 0x15b   : > { %1316 = vst.msk [vmem:[#allocation2 + $0xd0] sm:$0xff] %vm1302_vm9, %v1275_v43  ;;  %6637 = vmatmul.mubr.msk.bf16.gmra.mrb[20].mxu0 %vm3256_vm7, %v3222_v41  ;;  %v1646_v63 = vpop.permute.xlu0 %1645 }
 0x15c   : > { %3646 = vperm.xlu1 %6750, %v3544_v26   ;;  %1688 = vst.msk [vmem:[#allocation2 + $0xc0] sm:$0xff] %vm1675_vm10, %v1646_v63 }
 0x15d   : > { %3661 = vperm.xlu0 %6749, %v3547_v25  }
 0x15e   : > { %v1648_v57 = vpop.permute.xlu1 %1647 }
 0x15f   : > { %1689 = vst.msk [vmem:[#allocation2 + $0xd0] sm:$0xff] %vm1675_vm10, %v1648_v57  ;;  %v1845_v35 = vpop.permute.xlu0 %1844 }
 0x160   : > { %3656 = vperm.xlu1 %6750, %v3546_v29   ;;  %1887 = vst.msk [vmem:[#allocation2 + $0xc0] sm:$0xff] %vm1874_vm11, %v1845_v35 }
 0x161   : > { %3671 = vperm.xlu0 %6749, %v3549_v3  }
 0x162   : > { %v1847_v53 = vpop.permute.xlu1 %1846 }
 0x163   : > { %1888 = vst.msk [vmem:[#allocation2 + $0xd0] sm:$0xff] %vm1874_vm11, %v1847_v53  ;;  %v2197_v56 = vpop.permute.xlu0 %2196 }
 0x164   : > { %3666 = vperm.xlu1 %6750, %v3548_v51   ;;  %2239 = vst.msk [vmem:[#allocation2 + $0xc0] sm:$0xff] %vm2226_vm12, %v2197_v56 }
 0x165   : > { %3681 = vperm.xlu0 %6749, %v3551_v54  }
 0x166   : > { %v2199_v30 = vpop.permute.xlu1 %2198 }
 0x167   : > { %2240 = vst.msk [vmem:[#allocation2 + $0xd0] sm:$0xff] %vm2226_vm12, %v2199_v30  ;;  %v2548_v28 = vpop.permute.xlu0 %2547 }
 0x168   : > { %3676 = vperm.xlu1 %6750, %v3550_v20   ;;  %2590 = vst.msk [vmem:[#allocation2 + $0xc0] sm:$0xff] %vm2577_vm13, %v2548_v28 }
 0x169   : > { %3691 = vperm.xlu0 %6749, %v3553_v58  }
 0x16a   : > { %v2550_v32 = vpop.permute.xlu1 %2549 }
 0x16b   : > { %2591 = vst.msk [vmem:[#allocation2 + $0xd0] sm:$0xff] %vm2577_vm13, %v2550_v32  ;;  %v2789_v44 = vpop.permute.xlu0 %2788 }
 0x16c   : > { %3686 = vperm.xlu1 %6750, %v3552_v6   ;;  %2831 = vst.msk [vmem:[#allocation2 + $0xc0] sm:$0xff] %vm2818_vm14, %v2789_v44  ;;  %v8368_v44 = vld [vmem:[%s9809_s4] ss:$0 sm:$0xff] }
 0x16d   : > { %3571 = vperm.xlu0 %6749, %v3529_v18  }
 0x16e   : > { %v2791_v4 = vpop.permute.xlu1 %2790 }
 0x16f   : > { %2832 = vst.msk [vmem:[#allocation2 + $0xd0] sm:$0xff] %vm2818_vm14, %v2791_v4  ;;  %v3163_v60 = vpop.permute.xlu0 %3162 }
 0x170   : > { %3566 = vperm.xlu1 %6750, %v3528_v13   ;;  %3205 = vst.msk [vmem:[#allocation2 + $0xc0] sm:$0xff] %vm3192_vm15, %v3163_v60 }
 0x171   : > { %3581 = vperm.xlu0 %6749, %v3531_v1  }
 0x172   : > { %v3165_v59 = vpop.permute.xlu1 %3164 }
 0x173   : > { %3206 = vst.msk [vmem:[#allocation2 + $0xd0] sm:$0xff] %vm3192_vm15, %v3165_v59  ;;  %v903_v47 = vpop.permute.xlu0 %902 }
 0x174   : > { %3576 = vperm.xlu1 %6750, %v3530_v61   ;;  %943 = vst.msk [vmem:[#allocation2 + $0xe0] sm:$0xff] %vm928_vm8, %v903_v47 }
 0x175   : > { %3701 = vperm.xlu0 %6749, %v3555_v49  }
 0x176   : > { %v905_v11 = vpop.permute.xlu1 %904 }
 0x177   : > { %944 = vst.msk [vmem:[#allocation2 + $0xf0] sm:$0xff] %vm928_vm8, %v905_v11  ;;  %v1277_v50 = vpop.permute.xlu0 %1276  ;;  %v3223_v40 = vld [vmem:[#allocation2 + $0xc0] sm:$0xff] }
 0x178   : > { %3696 = vperm.xlu1 %6750, %v3554_v0   ;;  %1317 = vst.msk [vmem:[#allocation2 + $0xe0] sm:$0xff] %vm1302_vm9, %v1277_v50  ;;  %6640 = vmatprep.mubr.msk.bf16.mxu0 %vm3256_vm7, %v3223_v40 }
 0x179   : > { %3711 = vperm.xlu0 %6749, %v3557_v9  }
 0x17a   : > { %v1279_v17 = vpop.permute.xlu1 %1278  ;;  %v3224_v12 = vld [vmem:[#allocation2 + $0xd0] sm:$0xff] }
 0x17b   : > { %1318 = vst.msk [vmem:[#allocation2 + $0xf0] sm:$0xff] %vm1302_vm9, %v1279_v17  ;;  %6641 = vmatmul.mubr.msk.bf16.gmra.mrb[24].mxu0 %vm3256_vm7, %v3224_v12  ;;  %v1650_v62 = vpop.permute.xlu0 %1649 }
 0x17c   : > { %3706 = vperm.xlu1 %6750, %v3556_v23   ;;  %1690 = vst.msk [vmem:[#allocation2 + $0xe0] sm:$0xff] %vm1675_vm10, %v1650_v62 }
 0x17d   : > { %3721 = vperm.xlu0 %6749, %v3559_v45  }
 0x17e   : > { %v1652_v15 = vpop.permute.xlu1 %1651 }
 0x17f   : > { %1691 = vst.msk [vmem:[#allocation2 + $0xf0] sm:$0xff] %vm1675_vm10, %v1652_v15  ;;  %v1849_v37 = vpop.permute.xlu0 %1848 }
 0x180   : > { %3716 = vperm.xlu1 %6750, %v3558_v21   ;;  %1889 = vst.msk [vmem:[#allocation2 + $0xe0] sm:$0xff] %vm1874_vm11, %v1849_v37 }
 0x181   : > { %3726 = vperm.xlu0 %6749, %v3560_v16  }
 0x182   : > { %v1851_v55 = vpop.permute.xlu1 %1850 }
 0x183   : > { %1890 = vst.msk [vmem:[#allocation2 + $0xf0] sm:$0xff] %vm1874_vm11, %v1851_v55  ;;  %v2201_v39 = vpop.permute.xlu0 %2200 }
 0x184   : > { %3731 = vperm.xlu1 %6750, %v3561_v5   ;;  %2241 = vst.msk [vmem:[#allocation2 + $0xe0] sm:$0xff] %vm2226_vm12, %v2201_v39 }
 0x185   : > { %3741 = vperm.xlu0 %6749, %v3563_v7  }
 0x186   : > { %v2203_v14 = vpop.permute.xlu1 %2202 }
 0x187   : > { %2242 = vst.msk [vmem:[#allocation2 + $0xf0] sm:$0xff] %vm2226_vm12, %v2203_v14  ;;  %v2552_v46 = vpop.permute.xlu0 %2551 }
 0x188   : > { %3736 = vperm.xlu1 %6750, %v3562_v27   ;;  %2592 = vst.msk [vmem:[#allocation2 + $0xe0] sm:$0xff] %vm2577_vm13, %v2552_v46 }
 0x18a   : > { %v2554_v36 = vpop.permute.xlu1 %2553 }
 0x18b   : > { %2593 = vst.msk [vmem:[#allocation2 + $0xf0] sm:$0xff] %vm2577_vm13, %v2554_v36  ;;  %v2793_v8 = vpop.permute.xlu0 %2792 }
 0x18c   : > { %2833 = vst.msk [vmem:[#allocation2 + $0xe0] sm:$0xff] %vm2818_vm14, %v2793_v8 }
 0x18e   : > { %v2795_v52 = vpop.permute.xlu1 %2794 }
 0x18f   : > { %2834 = vst.msk [vmem:[#allocation2 + $0xf0] sm:$0xff] %vm2818_vm14, %v2795_v52  ;;  %v8335_v31 = vpop.f32.mrb[0].mxu0  ;;  %v3167_v33 = vpop.permute.xlu0 %3166 }
 0x190   : > { %v8337_v42 = vpop.f32.mrb[1].mxu0  ;;  %3207 = vst.msk [vmem:[#allocation2 + $0xe0] sm:$0xff] %vm3192_vm15, %v3167_v33 }
 0x191   : > { %v8340_v38 = vpop.f32.mrb[2].mxu0 }
 0x192   : > { %v3169_v2 = vpop.permute.xlu1 %3168  ;;  %v8342_v22 = vpop.f32.mrb[3].mxu0 }
 0x193   : > { %3208 = vst.msk [vmem:[#allocation2 + $0xf0] sm:$0xff] %vm3192_vm15, %v3169_v2  ;;  %v907_v19 = vpop.permute.xlu0 %906 }
 0x194   : > { %945 = vst.msk [vmem:[#allocation2 + $0x100] sm:$0xff] %vm928_vm8, %v907_v19 }
 0x196   : > { %v909_v10 = vpop.permute.xlu1 %908 }
 0x197   : > { %946 = vst.msk [vmem:[#allocation2 + $0x110] sm:$0xff] %vm928_vm8, %v909_v10  ;;  %v1281_v48 = vpop.permute.xlu0 %1280  ;;  %v3225_v34 = vld [vmem:[#allocation2 + $0xe0] sm:$0xff]  ;;  %vm4177_vm8 = vcmask 261248  }
 0x198   : > { %1319 = vst.msk [vmem:[#allocation2 + $0x100] sm:$0xff] %vm1302_vm9, %v1281_v48  ;;  %6644 = vmatprep.mubr.msk.bf16.mxu0 %vm3256_vm7, %v3225_v34 }
 0x19a   : > { %v1283_v26 = vpop.permute.xlu1 %1282  ;;  %v3226_v43 = vld [vmem:[#allocation2 + $0xf0] sm:$0xff] }
 0x19b   : > { %1320 = vst.msk [vmem:[#allocation2 + $0x110] sm:$0xff] %vm1302_vm9, %v1283_v26  ;;  %6645 = vmatmul.mubr.msk.bf16.gmra.mrb[28].mxu0 %vm3256_vm7, %v3226_v43  ;;  %v1654_v41 = vpop.permute.xlu0 %1653  ;;  %vm4418_vm9 = vcmask 392448  }
 0x19c   : > { %1692 = vst.msk [vmem:[#allocation2 + $0x100] sm:$0xff] %vm1675_vm10, %v1654_v41 }
 0x19e   : > { %v1656_v25 = vpop.permute.xlu1 %1655 }
 0x19f   : > { %1693 = vst.msk [vmem:[#allocation2 + $0x110] sm:$0xff] %vm1675_vm10, %v1656_v25  ;;  %v1853_v63 = vpop.permute.xlu0 %1852  ;;  %vm4658_vm10 = vcmask 523648  }
 0x1a0   : > { %1891 = vst.msk [vmem:[#allocation2 + $0x100] sm:$0xff] %vm1874_vm11, %v1853_v63 }
 0x1a2   : > { %v1855_v29 = vpop.permute.xlu1 %1854 }
 0x1a3   : > { %1892 = vst.msk [vmem:[#allocation2 + $0x110] sm:$0xff] %vm1874_vm11, %v1855_v29  ;;  %v2205_v57 = vpop.permute.xlu0 %2204  ;;  %vm4767_vm11 = vcmask 654848  }
 0x1a4   : > { %2243 = vst.msk [vmem:[#allocation2 + $0x100] sm:$0xff] %vm2226_vm12, %v2205_v57 }
 0x1a6   : > { %v2207_v3 = vpop.permute.xlu1 %2206 }
 0x1a7   : > { %2244 = vst.msk [vmem:[#allocation2 + $0x110] sm:$0xff] %vm2226_vm12, %v2207_v3  ;;  %v2556_v35 = vpop.permute.xlu0 %2555  ;;  %vm5007_vm12 = vcmask 786048  }
 0x1a8   : > { %2594 = vst.msk [vmem:[#allocation2 + $0x100] sm:$0xff] %vm2577_vm13, %v2556_v35 }
 0x1aa   : > { %v2558_v51 = vpop.permute.xlu1 %2557 }
 0x1ab   : > { %2595 = vst.msk [vmem:[#allocation2 + $0x110] sm:$0xff] %vm2577_vm13, %v2558_v51  ;;  %v2797_v53 = vpop.permute.xlu0 %2796  ;;  %vm5247_vm13 = vcmask 917248  }
 0x1ac   : > { %2835 = vst.msk [vmem:[#allocation2 + $0x100] sm:$0xff] %vm2818_vm14, %v2797_v53 }
 0x1ae   : > { %v2799_v54 = vpop.permute.xlu1 %2798 }
 0x1af   : > { %2836 = vst.msk [vmem:[#allocation2 + $0x110] sm:$0xff] %vm2818_vm14, %v2799_v54  ;;  %v6622_v56 = vpop.f32.mrb[4].mxu0  ;;  %v3171_v20 = vpop.permute.xlu0 %3170  ;;  %vm5395_vm14 = vcmask 1048448  }
 0x1b0   : > { %v3365_v30 = vpop.f32.mrb[5].mxu0  ;;  %3209 = vst.msk [vmem:[#allocation2 + $0x100] sm:$0xff] %vm3192_vm15, %v3171_v20  ;;  %v3374_v13 = vadd.f32 %v6622_v56, %v8368_v44 }
 0x1b1   : > { %v6623_v58 = vpop.f32.mrb[6].mxu0  ;;  %v3366_v11 = vadd.f32 %v8368_v44, %v3365_v30 }
 0x1b2   : > { %v3173_v28 = vpop.permute.xlu1 %3172  ;;  %v3368_v6 = vpop.f32.mrb[7].mxu0  ;;  %v3377_v4 = vadd.f32 %v6623_v58, %v8368_v44  ;;  %v3498_v60 = vmax.f32 %v3374_v13, 0.0 }
 0x1b3   : > { %3210 = vst.msk [vmem:[#allocation2 + $0x110] sm:$0xff] %vm3192_vm15, %v3173_v28  ;;  %v3369_v9 = vadd.f32 %v8368_v44, %v3368_v6  ;;  %v3496_v17 = vmax.f32 %v3366_v11, 0.0 }
 0x1b4   : > { %v3499_v61 = vmax.f32 %v3377_v4, 0.0 }
 0x1b5   : > { %v3497_v12 = vmax.f32 %v3369_v9, 0.0 }
 0x1b7   : > { %v3227_v32 = vld [vmem:[#allocation2 + $0x100] sm:$0xff] }
 0x1b8   : > { %6648 = vmatprep.mubr.msk.bf16.mxu0 %vm3256_vm7, %v3227_v32 }
 0x1ba   : > { %v3228_v18 = vld [vmem:[#allocation2 + $0x110] sm:$0xff] }
 0x1bb   : > { %6649 = vmatmul.mubr.msk.bf16.gmra.mrb[32].mxu0 %vm3256_vm7, %v3228_v18 }
 0x1c0   : > { %v3597_v1 = vpop.permute.xlu0 %3596 }
 0x1c1   : > { %v3750_v49 = vmul.f32 %v3597_v1, %v3498_v60 }
 0x1c3   : > { %v3602_v59 = vpop.permute.xlu1 %3601 }
 0x1c4   : > { %v3751_v47 = vmul.f32 %v3602_v59, %v3499_v61  ;;  %v3612_v0 = vpop.permute.xlu0 %3611 }
 0x1c6   : > { %v3788_v50 = vpack.c.bf16 %v3751_v47, %v3750_v49 }
 0x1c7   : > { %v3607_v40 = vpop.permute.xlu1 %3606 }
 0x1c8   : > { %3806 = vst.msk [vmem:[#allocation3 + $0x28] sm:$0xff] %vm3780_vm0, %v3788_v50  ;;  %v3592_v23 = vpop.permute.xlu0 %3591 }
 0x1c9   : > { %v3749_v62 = vmul.f32 %v3592_v23, %v3497_v12 }
 0x1cb   : > { %v3587_v45 = vpop.permute.xlu1 %3586 }
 0x1cc   : > { %v3748_v21 = vmul.f32 %v3587_v45, %v3496_v17  ;;  %v3622_v15 = vpop.permute.xlu0 %3621 }
 0x1ce   : > { %v3787_v16 = vpack.c.bf16 %v3749_v62, %v3748_v21 }
 0x1cf   : > { %v8375_v37 = vld [vmem:[#allocation3 + $0x28] sm:$0xff]  ;;  %v3617_v5 = vpop.permute.xlu1 %3616  ;;  %v6626_v55 = vpop.f32.mrb[8].mxu0 }
 0x1d0   : > { %3805 = vst.msk [vmem:[#allocation3 + $0x20] sm:$0xff] %vm3780_vm0, %v3787_v16  ;;  %v3390_v7 = vadd.f32 %v6626_v55, %v8368_v44  ;;  %v8379_v39 = vpop.permute.xlu0 %3631  ;;  %v3381_v27 = vpop.f32.mrb[9].mxu0  ;;  %v8382_v14 = vshrl.u32 %v8375_v37, 16  ;;  %v5454_v2 = vshll.u32 %v8375_v37, 16  ;;  %v4095_v57 = vrot.slane %v8375_v37, 7 }
 0x1d1   : > { %v3382_v46 = vadd.f32 %v8368_v44, %v3381_v27  ;;  %v6627_v36 = vpop.f32.mrb[10].mxu0 }
 0x1d2   : > { %v3502_v8 = vmax.f32 %v3390_v7, 0.0  ;;  %v3393_v52 = vadd.f32 %v6627_v36, %v8368_v44  ;;  %v3384_v33 = vpop.f32.mrb[11].mxu0  ;;  %v4255_v63 = vrot.slane %v8382_v14, 7  ;;  %v5453_v3 = vrot.slane %v8382_v14, 1 }
 0x1d3   : > { %v3500_v19 = vmax.f32 %v3382_v46, 0.0  ;;  %v3385_v10 = vadd.f32 %v8368_v44, %v3384_v33  ;;  %v8388_v48 = vpop.permute.xlu1 %3626  ;;  %v5456_v35 = vrot.slane %v5454_v2, 2  ;;  %v3888_v18 = vrot.slane %v8382_v14, 6 }
 0x1d4   : > { %v3754_v34 = vmul.f32 %v3617_v5, %v3502_v8  ;;  %v3503_v26 = vmax.f32 %v3393_v52, 0.0  ;;  %v8390_v43 = vpop.permute.xlu0 %3641  ;;  %v8406_v32 = vor.u32 %v5454_v2, %v4255_v63  ;;  %v3891_v13 = vrot.slane %v5454_v2, 7 }
 0x1d5   : > { %v3752_v41 = vmul.f32 %v3607_v40, %v3500_v19  ;;  %v3501_v25 = vmax.f32 %v3385_v10, 0.0  ;;  %v8423_v50 = vor.u32 %v5456_v35, %v5453_v3  ;;  %v6924_v3 = vld [vmem:[%s9810_s5] sm:$0xff]   ;;  %v3353_v35 = vadd.f32 %v8368_v44, %v8342_v22 }
 0x1d6   : > { %v3755_v29 = vmul.f32 %v3622_v15, %v3503_v26  ;;  %v8426_v40 = vor.u32 %v3891_v13, %v3888_v18  ;;  %6677 = vmatpush1.bf16.msra.mxu1 %v6924_v3  ;;  %5809 = vmatpush1.bf16.msra.mxu0 %v6924_v3 }
 0x1d7   : > { %v8395_v51 = vld [vmem:[#allocation3 + $0x20] sm:$0xff]  ;;  %v3753_v53 = vmul.f32 %v3612_v0, %v3501_v25  ;;  %v8397_v54 = vpop.permute.xlu1 %3636  ;;  %v3350_v25 = vadd.f32 %v8368_v44, %v8337_v42  ;;  %6669 = vmatprep.subr.bf16.mxu1 %v7040_v24  ;;  %5810 = vmatprep.subr.bf16.mxu0 %v7040_v24 }
 0x1d8   : > { %v5442_v56 = vshrl.u32 %v8395_v51, 16  ;;  %v5445_v20 = vshll.u32 %v8395_v51, 16  ;;  %v3790_v30 = vpack.c.bf16 %v3755_v29, %v3754_v34  ;;  %v8401_v58 = vpop.permute.xlu0 %3651  ;;  %v9822_v28 = vrot.slane %v8395_v51, 7 }
 0x1d9   : > { %v3789_v6 = vpack.c.bf16 %v3753_v53, %v3752_v41  ;;  %v8480_v41 = vadd.f32 %v8335_v31, %v8368_v44 }
 0x1da   : > { %v5444_v4 = vrot.slane %v5442_v56, 1  ;;  %v5447_v1 = vrot.slane %v5445_v20, 2  ;;  %3808 = vst.msk [vmem:[#allocation3 + $0x38] sm:$0xff] %vm3780_vm0, %v3790_v30  ;;  %v4096_v60 = vsel %vm4085_vm1, %v9822_v28, %v4095_v57  ;;  %v4247_v61 = vrot.slane %v5442_v56, 7  ;;  %v6925_v30 = vld [vmem:[%s9810_s5 + $0x8] sm:$0xff]  }
 0x1db   : > { %3807 = vst.msk [vmem:[#allocation3 + $0x30] sm:$0xff] %vm3780_vm0, %v3789_v6  ;;  %v8414_v59 = vpop.permute.xlu1 %3646  ;;  %4131 = vrot.lane.b32.xlu1 %v4096_v60, %s7032_s30  ;;  %v3879_v49 = vrot.slane %v5442_v56, 6  ;;  %v3882_v47 = vrot.slane %v5445_v20, 7  ;;  %v3361_v6 = vadd.f32 %v8340_v38, %v8368_v44  ;;  %v3492_v60 = vmax.f32 %v3350_v25, 0.0  ;;  %6678 = vmatpush1.bf16.msra.mxu1 %v6925_v30 }
 0x1dc   : > { %v8417_v0 = vpop.permute.xlu0 %3661  ;;  %v4259_v11 = vsel %vm4215_vm5, %v4247_v61, %v8406_v32  ;;  %v8421_v9 = vor.u32 %v5447_v1, %v5444_v4  ;;  %v8438_v62 = vor.u32 %v5445_v20, %v4247_v61  ;;  %v3494_v1 = vmax.f32 %v8480_v41, 0.0  ;;  %5811 = vmatpush1.bf16.msra.mxu0 %v6925_v30  ;;  %6670 = vmatprep.subr.bf16.mxu1 %v7040_v24 }
 0x1dd   : > { %4372 = vrot.lane.b32.xlu0 %v4259_v11, %s9849_s28  ;;  %v8428_v23 = vor.u32 %v3882_v47, %v3879_v49  ;;  %v3493_v49 = vmax.f32 %v3353_v35, 0.0  ;;  %5812 = vmatprep.subr.bf16.mxu0 %v7040_v24 }
 0x1de   : > { %v5458_v17 = vsel %vm2967_vm4, %v8421_v9, %v8423_v50 }
 0x1df   : > { %v8433_v12 = vpop.permute.xlu1 %3656  ;;  %v3893_v45 = vsel %vm3840_vm6, %v8428_v23, %v8426_v40  ;;  %5622 = vst.msk [vmem:[#allocation2 + $0x18] sm:$0xff] %vm3780_vm0, %v5458_v17 }
 0x1e0   : > { %v8441_v21 = vpop.permute.xlu0 %3671  ;;  %4033 = vst.msk [vmem:[#allocation2 + $0x40] sm:$0xff] %vm3780_vm0, %v3893_v45 }
 0x1e1   : > { %v8444_v15 = vld [vmem:[#allocation3 + $0x38] sm:$0xff] }
 0x1e2   : > { %v8447_v16 = vshrl.u32 %v8444_v15, 16  ;;  %v5417_v37 = vld [vmem:[#allocation3 + $0x30] sm:$0xff]  ;;  %4723 = vrot.lane.b32.xlu1 %v8444_v15, %s7041_s12  ;;  %v4099_v5 = vrot.slane %v8444_v15, 7  ;;  %v8460_v36 = vshll.u32 %v8444_v15, 16 }
 0x1e3   : > { %v8452_v55 = vshrl.u32 %v5417_v37, 16  ;;  %v8454_v7 = vshll.u32 %v5417_v37, 16  ;;  %v8456_v27 = vpop.permute.xlu1 %3666  ;;  %4721 = vrot.lane.b32.xlu0 %v5417_v37, %s7041_s12  ;;  %v4097_v46 = vrot.slane %v5417_v37, 7 }
 0x1e4   : > { %v8462_v8 = vpop.permute.xlu0 %3681  ;;  %v4503_v52 = vrot.slane %v8447_v16, 7  ;;  %v3906_v14 = vrot.slane %v8447_v16, 6  ;;  %v8513_v13 = vrot.slane %v8460_v36, 1 }
 0x1e5   : > { %v4100_v33 = vsel %vm4085_vm1, %v4097_v46, %v4099_v5  ;;  %v4098_v2 = vsel %vm4085_vm1, %v4095_v57, %v4097_v46  ;;  %v4495_v19 = vrot.slane %v8452_v55, 7  ;;  %v9821_v34 = vrot.slane %v8454_v7, 1 }
 0x1e6   : > { %4135 = vrot.lane.b32.xlu1 %v4100_v33, %s7032_s30  ;;  %v4506_v10 = vor.u32 %v8460_v36, %v4503_v52  ;;  %v3897_v53 = vrot.slane %v8452_v55, 6  ;;  %v3900_v20 = vrot.slane %v8454_v7, 7  ;;  %v5471_v46 = vrot.slane %v8447_v16, 1 }
 0x1e7   : > { %v8475_v26 = vpop.permute.xlu1 %3676  ;;  %4133 = vrot.lane.b32.xlu0 %v4098_v2, %s7032_s30  ;;  %v4498_v57 = vor.u32 %v8454_v7, %v4495_v19  ;;  %v4843_v42 = vor.u32 %v8452_v55, %v9821_v34  ;;  %v5474_v33 = vrot.slane %v8460_v36, 2  ;;  %v5465_v3 = vrot.slane %v8454_v7, 2 }
 0x1e8   : > { %v8484_v29 = vpop.permute.xlu0 %3691  ;;  %v4507_v56 = vsel %vm4215_vm5, %v4495_v19, %v4506_v10  ;;  %v3901_v4 = vor.u32 %v3900_v20, %v3897_v53 }
 0x1e9   : > { %v4499_v31 = vsel %vm4215_vm5, %v4255_v63, %v4498_v57  ;;  %v3909_v63 = vrot.slane %v8460_v36, 7  ;;  %v4848_v11 = vsel %vm2023_vm2, %v4843_v42, %v8513_v13  ;;  %v5462_v57 = vrot.slane %v8452_v55, 1 }
 0x1ea   : > { %4612 = vrot.lane.b32.xlu1 %v4499_v31, %s7042_s26  ;;  %v3902_v38 = vsel %vm3840_vm6, %v8426_v40, %v3901_v4  ;;  %v3495_v40 = vmax.f32 %v3361_v6, 0.0  ;;  %v8541_v6 = vor.u32 %v5474_v33, %v5471_v46 }
 0x1eb   : > { %v8505_v22 = vpop.permute.xlu1 %3686  ;;  %4614 = vrot.lane.b32.xlu0 %v4507_v56, %s7042_s26  ;;  %v8518_v61 = vor.u32 %v3909_v63, %v3906_v14  ;;  %4034 = vst.msk [vmem:[#allocation2 + $0x50] sm:$0xff] %vm3780_vm0, %v3902_v38 }
 0x1ec   : > { %v3572_v18 = vpop.permute.xlu0 %3571 }
 0x1ed   : > { %v3911_v2 = vsel %vm3840_vm6, %v3901_v4, %v8518_v61  ;;  %v3745_v19 = vmul.f32 %v3572_v18, %v3493_v49 }
 0x1ee   : > { %v6630_v47 = vpop.f32.mrb[12].mxu0  ;;  %4961 = vrot.lane.b32.xlu1 %v4848_v11, %s7043_s27  ;;  %4035 = vst.msk [vmem:[#allocation2 + $0x60] sm:$0xff] %vm3780_vm0, %v3911_v2  ;;  %v5466_v11 = vor.u32 %v5465_v3, %v5462_v57  ;;  %v6929_v3 = vld [vmem:[%s9810_s5 + $0x28] sm:$0xff]  }
 0x1ef   : > { %v3406_v17 = vadd.f32 %v6630_v47, %v8368_v44  ;;  %v3567_v45 = vpop.permute.xlu1 %3566  ;;  %v3397_v37 = vpop.f32.mrb[13].mxu0  ;;  %4376 = vrot.lane.b32.xlu0 %v4507_v56, %s9849_s28 }
 0x1f0   : > { %v3744_v10 = vmul.f32 %v3567_v45, %v3492_v60  ;;  %v3398_v41 = vadd.f32 %v8368_v44, %v3397_v37  ;;  %v6631_v25 = vpop.f32.mrb[14].mxu0  ;;  %v3582_v35 = vpop.permute.xlu0 %3581  ;;  %v6926_v60 = vld [vmem:[%s9810_s5 + $0x10] sm:$0xff]  }
 0x1f1   : > { %v3506_v36 = vmax.f32 %v3406_v17, 0.0  ;;  %v3409_v53 = vadd.f32 %v6631_v25, %v8368_v44  ;;  %v3400_v56 = vpop.f32.mrb[15].mxu0  ;;  %v3747_v55 = vmul.f32 %v3582_v35, %v3495_v40  ;;  %6679 = vmatpush1.bf16.msra.mxu1 %v6926_v60  ;;  %5813 = vmatpush1.bf16.msra.mxu0 %v6926_v60 }
 0x1f2   : > { %v3785_v42 = vpack.c.bf16 %v3745_v19, %v3744_v10  ;;  %v3504_v20 = vmax.f32 %v3398_v41, 0.0  ;;  %v3401_v30 = vadd.f32 %v8368_v44, %v3400_v56  ;;  %4374 = vrot.lane.b32.xlu1 %v4499_v31, %s9849_s28  ;;  %6671 = vmatprep.subr.bf16.mxu1 %v7040_v24 }
 0x1f3   : > { %v3507_v14 = vmax.f32 %v3409_v53, 0.0  ;;  %v3577_v63 = vpop.permute.xlu1 %3576  ;;  %v3758_v49 = vmul.f32 %v8397_v54, %v3506_v36  ;;  %5814 = vmatprep.subr.bf16.mxu0 %v7040_v24  ;;  %v5476_v54 = vsel %vm2967_vm4, %v5466_v11, %v8541_v6  ;;  %v9820_v36 = vrot.slane %v8444_v15, 1 }
 0x1f4   : > { %3803 = vst.msk [vmem:[#allocation3 + $0x10] sm:$0xff] %vm3780_vm0, %v3785_v42  ;;  %v3505_v18 = vmax.f32 %v3401_v30, 0.0  ;;  %v3746_v4 = vmul.f32 %v3577_v63, %v3494_v1  ;;  %v3756_v38 = vmul.f32 %v8388_v48, %v3504_v20  ;;  %v5467_v1 = vsel %vm2967_vm4, %v8423_v50, %v5466_v11  ;;  %5624 = vst.msk [vmem:[#allocation2 + $0x38] sm:$0xff] %vm3780_vm0, %v5476_v54  ;;  %v6928_v48 = vld [vmem:[%s9810_s5 + $0x20] sm:$0xff]   ;;  %v6930_v30 = vld [vmem:[%s9810_s5 + $0x30] sm:$0xff]  }
 0x1f5   : > { %v3759_v47 = vmul.f32 %v8390_v43, %v3507_v14  ;;  %5623 = vst.msk [vmem:[#allocation2 + $0x28] sm:$0xff] %vm3780_vm0, %v5467_v1  ;;  %v5083_v54 = vor.u32 %v8447_v16, %v8513_v13 }
 0x1f6   : > { %v3757_v31 = vmul.f32 %v8379_v39, %v3505_v18  ;;  %v3786_v17 = vpack.c.bf16 %v3747_v55, %v3746_v4  ;;  %v6927_v39 = vld [vmem:[%s9810_s5 + $0x18] sm:$0xff]  }
 0x1f7   : > { %v3792_v45 = vpack.c.bf16 %v3759_v47, %v3758_v49  ;;  %6680 = vmatpush1.bf16.msra.mxu1 %v6927_v39  ;;  %5815 = vmatpush1.bf16.msra.mxu0 %v6927_v39 }
 0x1f8   : > { %v3791_v43 = vpack.c.bf16 %v3757_v31, %v3756_v38  ;;  %3804 = vst.msk [vmem:[#allocation3 + $0x18] sm:$0xff] %vm3780_vm0, %v3786_v17  ;;  %6672 = vmatprep.subr.bf16.mxu1 %v7040_v24  ;;  %5816 = vmatprep.subr.bf16.mxu0 %v7040_v24  ;;  %v6931_v31 = vld [vmem:[%s9810_s5 + $0x38] sm:$0xff]  }
 0x1f9   : > { %3810 = vst.msk [vmem:[#allocation3 + $0x48] sm:$0xff] %vm3780_vm0, %v3792_v45 }
 0x1fa   : > { %3809 = vst.msk [vmem:[#allocation3 + $0x40] sm:$0xff] %vm3780_vm0, %v3791_v43  ;;  %v3822_v43 = vld [vmem:[#allocation3 + $0x8] sm:$0xff] }
 0x1fb   : > { %6681 = vmatpush1.bf16.msra.mxu1 %v6928_v48  ;;  %5817 = vmatpush1.bf16.msra.mxu0 %v6928_v48 }
 0x1fc   : > { %6673 = vmatprep.subr.bf16.mxu1 %v7040_v24  ;;  %5818 = vmatprep.subr.bf16.mxu0 %v7040_v24 }
 0x1ff   : > { %v5414_v50 = vld [vmem:[#allocation3 + $0x18] sm:$0xfe]  ;;  %6682 = vmatpush1.bf16.msra.mxu1 %v6929_v3  ;;  %5819 = vmatpush1.bf16.msra.mxu0 %v6929_v3 }
 0x200   : > { %v8570_v37 = vld [vmem:[#allocation3 + $0x48] sm:$0xff]  ;;  %v5434_v46 = vshrl.u32 %v5414_v50, 16  ;;  %v5437_v33 = vshll.u32 %v5414_v50, 16  ;;  %6674 = vmatprep.subr.bf16.mxu1 %v7040_v24  ;;  %5820 = vmatprep.subr.bf16.mxu0 %v7040_v24 }
 0x201   : > { %v8573_v2 = vshll.u32 %v8570_v37, 16  ;;  %v8575_v40 = vld [vmem:[#allocation3 + $0x40] sm:$0xff]  ;;  %4727 = vrot.lane.b32.xlu1 %v8570_v37, %s7041_s12  ;;  %v5315_v19 = vrot.slane %v8570_v37, 1  ;;  %v8612_v49 = vshrl.u32 %v8570_v37, 16 }
 0x202   : > { %v8582_v10 = vshrl.u32 %v8575_v40, 16  ;;  %v5481_v41 = vshll.u32 %v8575_v40, 16  ;;  %v5436_v25 = vrot.slane %v5434_v46, 1  ;;  %v5439_v57 = vrot.slane %v5437_v33, 2  ;;  %4725 = vrot.lane.b32.xlu0 %v8575_v40, %s7041_s12  ;;  %v3829_v1 = vld [vmem:[#allocation3 + $0x40] sm:$0xff]  ;;  %v3823_v33 = vld [vmem:[#allocation3 + $0x10] sm:$0xff] }
 0x203   : > { %v5313_v35 = vrot.slane %v8575_v40, 1  ;;  %v4101_v56 = vrot.slane %v8575_v40, 7  ;;  %v5095_v60 = vrot.slane %v8573_v2, 1  ;;  %6683 = vmatpush1.bf16.msra.mxu1 %v6930_v30  ;;  %5821 = vmatpush1.bf16.msra.mxu0 %v6930_v30  ;;  %v3913_v48 = vshrl.u32 %v3829_v1, 16  ;;  %v6932_v46 = vld [vmem:[%s9810_s5 + $0x40] sm:$0xff]  }
 0x204   : > { %v5087_v53 = vrot.slane %v5481_v41, 1  ;;  %v4511_v42 = vrot.slane %v8582_v10, 7  ;;  %v5440_v20 = vor.u32 %v5439_v57, %v5436_v25  ;;  %v5480_v55 = vrot.slane %v8582_v10, 1  ;;  %6675 = vmatprep.subr.bf16.mxu1 %v7040_v24  ;;  %5822 = vmatprep.subr.bf16.mxu0 %v7040_v24 }
 0x205   : > { %v5314_v14 = vsel %vm2726_vm3, %v9820_v36, %v5313_v35  ;;  %v5316_v63 = vsel %vm2726_vm3, %v5313_v35, %v5315_v19  ;;  %v5483_v18 = vrot.slane %v5481_v41, 2  ;;  %v4102_v17 = vsel %vm4085_vm1, %v4099_v5, %v4101_v56 }
 0x206   : > { %5349 = vrot.lane.b32.xlu1 %v5314_v14, %s7044_s21  ;;  %5351 = vrot.lane.b32.xlu0 %v5316_v63, %s7044_s21  ;;  %v5091_v4 = vor.u32 %v8582_v10, %v5087_v53  ;;  %v5449_v47 = vsel %vm2967_vm4, %v5440_v20, %v8421_v9  ;;  %v4514_v9 = vor.u32 %v5481_v41, %v4511_v42  ;;  %v5489_v5 = vrot.slane %v8612_v49, 1 }
 0x207   : > { %v5484_v11 = vor.u32 %v5483_v18, %v5480_v55  ;;  %5621 = vst.msk [vmem:[#allocation2 + $0x8] sm:$0xff] %vm3780_vm0, %v5449_v47  ;;  %v5088_v39 = vsel %vm2023_vm2, %v5083_v54, %v5087_v53  ;;  %v3916_v50 = vshll.u32 %v3829_v1, 16  ;;  %6684 = vmatpush1.bf16.msra.mxu1 %v6931_v31  ;;  %v4519_v25 = vrot.slane %v8612_v49, 7  ;;  %5823 = vmatpush1.bf16.msra.mxu0 %v6931_v31 }
 0x208   : > { %v5096_v38 = vsel %vm2023_vm2, %v5091_v4, %v5095_v60  ;;  %v4515_v41 = vsel %vm4215_vm5, %v4503_v52, %v4514_v9  ;;  %6676 = vmatprep.subr.bf16.mxu1 %v7040_v24  ;;  %v3915_v3 = vrot.slane %v3913_v48, 6  ;;  %v3850_v53 = vshrl.u32 %v3822_v43, 16  ;;  %5824 = vmatprep.subr.bf16.mxu0 %v7040_v24  ;;  %v3830_v24 = vld [vmem:[#allocation3 + $0x48] sm:$0xff] }
 0x209   : > { %v5485_v45 = vsel %vm2967_vm4, %v8541_v6, %v5484_v11  ;;  %v5492_v6 = vrot.slane %v8573_v2, 2  ;;  %v3918_v35 = vrot.slane %v3916_v50, 7  ;;  %v3853_v20 = vshll.u32 %v3822_v43, 16 }
 0x20a   : > { %5203 = vrot.lane.b32.xlu1 %v5096_v38, %s7045_s11  ;;  %4137 = vrot.lane.b32.xlu0 %v4102_v17, %s7032_s30  ;;  %5625 = vst.msk [vmem:[#allocation2 + $0x48] sm:$0xff] %vm3780_vm0, %v5485_v45  ;;  %v3859_v63 = vshrl.u32 %v3823_v33, 16  ;;  %v3862_v47 = vshll.u32 %v3823_v33, 16  ;;  %v4522_v1 = vor.u32 %v8573_v2, %v4519_v25  ;;  %v3852_v50 = vrot.slane %v3850_v53, 6 }
 0x20b   : > { %v3919_v18 = vor.u32 %v3918_v35, %v3915_v3  ;;  %6685 = vmatpush1.bf16.msra.mxu1 %v6932_v46  ;;  %v8656_v4 = vor.u32 %v5492_v6, %v5489_v5  ;;  %5825 = vmatpush1.bf16.msra.mxu0 %v6932_v46  ;;  %v3855_v46 = vrot.slane %v3853_v20, 7  ;;  %v3824_v20 = vld [vmem:[#allocation3 + $0x18] sm:$0xff] }
 0x20c   : > { %v3861_v3 = vrot.slane %v3859_v63, 6  ;;  %v3864_v35 = vrot.slane %v3862_v47, 7  ;;  %v3871_v10 = vshll.u32 %v3824_v20, 16 }
 0x20d   : > { %v3920_v5 = vsel %vm3840_vm6, %v8518_v61, %v3919_v18  ;;  %v5494_v6 = vsel %vm2967_vm4, %v5484_v11, %v8656_v4 }
 0x20e   : > { %4616 = vrot.lane.b32.xlu1 %v4515_v41, %s7042_s26  ;;  %v6634_v57 = vpop.f32.mrb[16].mxu0  ;;  %5201 = vrot.lane.b32.xlu0 %v5088_v39, %s7045_s11  ;;  %v5640_v16 = vld [vmem:[#allocation2 + $0x8] sm:$0xff]  ;;  %4036 = vst.msk [vmem:[#allocation2 + $0x70] sm:$0xff] %vm3780_vm0, %v3920_v5  ;;  %5626 = vst.msk [vmem:[#allocation2 + $0x58] sm:$0xff] %vm3780_vm0, %v5494_v6  ;;  %v3873_v47 = vrot.slane %v3871_v10, 7  ;;  %v5099_v6 = vor.u32 %v8612_v49, %v5095_v60 }
 0x20f   : > { %v3422_v30 = vadd.f32 %v6634_v57, %v8368_v44  ;;  %v3413_v14 = vpop.f32.mrb[17].mxu0  ;;  %6534 = vmatprep.mubr.msk.bf16.mxu0 %vm3780_vm0, %v5640_v16  ;;  %v3922_v57 = vshrl.u32 %v3830_v24, 16 }
 0x210   : > { %v3414_v52 = vadd.f32 %v8368_v44, %v3413_v14  ;;  %v6635_v55 = vpop.f32.mrb[18].mxu0 }
 0x211   : > { %v3510_v31 = vmax.f32 %v3422_v30, 0.0  ;;  %v3425_v17 = vadd.f32 %v6635_v55, %v8368_v44  ;;  %v3416_v9 = vpop.f32.mrb[19].mxu0  ;;  %v5648_v45 = vld [vmem:[#allocation2 + $0x48] sm:$0xff]  ;;  %v3925_v30 = vshll.u32 %v3830_v24, 16  ;;  %v3924_v53 = vrot.slane %v3922_v57, 6 }
 0x212   : > { %v3508_v54 = vmax.f32 %v3414_v52, 0.0  ;;  %v3417_v43 = vadd.f32 %v8368_v44, %v3416_v9  ;;  %6538 = vmatprep.mubr.msk.bf16.mxu1 %vm3780_vm0, %v5648_v45  ;;  %4965 = vrot.lane.b32.xlu1 %v5096_v38, %s7043_s27 }
 0x213   : > { %v3511_v48 = vmax.f32 %v3425_v17, 0.0  ;;  %4963 = vrot.lane.b32.xlu0 %v5088_v39, %s7043_s27  ;;  %v3762_v38 = vmul.f32 %v8433_v12, %v3510_v31  ;;  %v8680_v39 = vsel %vm4215_vm5, %v4511_v42, %v4522_v1  ;;  %v3927_v12 = vrot.slane %v3925_v30, 7 }
 0x214   : > { %v3509_v33 = vmax.f32 %v3417_v43, 0.0  ;;  %v3760_v11 = vmul.f32 %v8414_v59, %v3508_v54  ;;  %v3865_v59 = vor.u32 %v3864_v35, %v3861_v3 }
 0x215   : > { %v3763_v61 = vmul.f32 %v8417_v0, %v3511_v48  ;;  %v8684_v0 = vor.u32 %v3855_v46, %v3852_v50  ;;  %v4103_v50 = vrot.slane %v8570_v37, 7 }
 0x216   : > { %v3761_v14 = vmul.f32 %v8401_v58, %v3509_v33  ;;  %4378 = vrot.lane.b32.xlu1 %v4515_v41, %s9849_s28  ;;  %v8687_v58 = vor.u32 %v3927_v12, %v3924_v53  ;;  %v3868_v41 = vshrl.u32 %v3824_v20, 16 }
 0x217   : > { %v3794_v16 = vpack.c.bf16 %v3763_v61, %v3762_v38  ;;  %4618 = vrot.lane.b32.xlu0 %v8680_v39, %s7042_s26  ;;  %v3866_v52 = vsel %vm3840_vm6, %v8684_v0, %v3865_v59  ;;  %v4104_v38 = vsel %vm4085_vm1, %v4101_v56, %v4103_v50 }
 0x218   : > { %v3793_v63 = vpack.c.bf16 %v3761_v14, %v3760_v11  ;;  %v3929_v42 = vsel %vm3840_vm6, %v3919_v18, %v8687_v58  ;;  %v3870_v55 = vrot.slane %v3868_v41, 6  ;;  %4030 = vst.msk [vmem:[#allocation2 + $0x10] sm:$0xff] %vm3780_vm0, %v3866_v52 }
 0x219   : > { %3812 = vst.msk [vmem:[#allocation3 + $0x58] sm:$0xff] %vm3780_vm0, %v3794_v16  ;;  %4037 = vst.msk [vmem:[#allocation2 + $0x80] sm:$0xff] %vm3780_vm0, %v3929_v42 }
 0x21a   : > { %3811 = vst.msk [vmem:[#allocation3 + $0x50] sm:$0xff] %vm3780_vm0, %v3793_v63  ;;  %v3874_v31 = vor.u32 %v3873_v47, %v3870_v55 }
 0x21c   : > { %v3875_v17 = vsel %vm3840_vm6, %v3865_v59, %v3874_v31  ;;  %v3884_v9 = vsel %vm3840_vm6, %v3874_v31, %v8428_v23 }
 0x21d   : > { %4031 = vst.msk [vmem:[#allocation2 + $0x20] sm:$0xff] %vm3780_vm0, %v3875_v17  ;;  %4032 = vst.msk [vmem:[#allocation2 + $0x30] sm:$0xff] %vm3780_vm0, %v3884_v9 }
 0x220   : > { %v8699_v45 = vld [vmem:[#allocation3 + $0x58] sm:$0xff] }
 0x221   : > { %v8704_v18 = vshrl.u32 %v8699_v45, 16  ;;  %v8707_v1 = vshll.u32 %v8699_v45, 16  ;;  %v8709_v24 = vld [vmem:[#allocation3 + $0x50] sm:$0xff]  ;;  %v3832_v61 = vld [vmem:[#allocation3 + $0x58] sm:$0xff]  ;;  %v5319_v11 = vrot.slane %v8699_v45, 1 }
 0x222   : > { %v8712_v54 = vshrl.u32 %v8709_v24, 16  ;;  %v5499_v43 = vshll.u32 %v8709_v24, 16  ;;  %v5317_v23 = vrot.slane %v8709_v24, 1  ;;  %v3831_v60 = vld [vmem:[#allocation3 + $0x50] sm:$0xff]  ;;  %v3940_v12 = vshrl.u32 %v3832_v61, 16 }
 0x223   : > { %v5507_v46 = vrot.slane %v8704_v18, 1  ;;  %v5510_v33 = vrot.slane %v8707_v1, 2  ;;  %v5111_v30 = vrot.slane %v8707_v1, 1  ;;  %v3931_v20 = vshrl.u32 %v3831_v60, 16 }
 0x224   : > { %v5318_v5 = vsel %vm2726_vm3, %v5315_v19, %v5317_v23  ;;  %v5103_v48 = vrot.slane %v5499_v43, 1  ;;  %v5498_v57 = vrot.slane %v8712_v54, 1  ;;  %v5501_v3 = vrot.slane %v5499_v43, 2 }
 0x225   : > { %5353 = vrot.lane.b32.xlu1 %v5318_v5, %s7044_s21  ;;  %v4527_v19 = vrot.slane %v8712_v54, 7  ;;  %v8739_v53 = vor.u32 %v5510_v33, %v5507_v46  ;;  %v3934_v56 = vshll.u32 %v3831_v60, 16  ;;  %v3933_v41 = vrot.slane %v3931_v20, 6  ;;  %v8765_v46 = vpop.permute.xlu1 %3696 }
 0x226   : > { %v5104_v35 = vsel %vm2023_vm2, %v5099_v6, %v5103_v48  ;;  %v5107_v2 = vor.u32 %v8712_v54, %v5103_v48  ;;  %v5502_v14 = vor.u32 %v5501_v3, %v5498_v57  ;;  %v3943_v10 = vshll.u32 %v3832_v61, 16 }
 0x227   : > { %5205 = vrot.lane.b32.xlu0 %v5104_v35, %s7045_s11  ;;  %v4530_v40 = vor.u32 %v5499_v43, %v4527_v19  ;;  %v3936_v42 = vrot.slane %v3934_v56, 7  ;;  %v3942_v52 = vrot.slane %v3940_v12, 6  ;;  %v5320_v47 = vsel %vm2726_vm3, %v5317_v23, %v5319_v11 }
 0x228   : > { %v5112_v16 = vsel %vm2023_vm2, %v5107_v2, %v5111_v30  ;;  %v5503_v63 = vsel %vm2967_vm4, %v8656_v4, %v5502_v14  ;;  %v5512_v59 = vsel %vm2967_vm4, %v5502_v14, %v8739_v53  ;;  %v3945_v31 = vrot.slane %v3943_v10, 7 }
 0x229   : > { %4139 = vrot.lane.b32.xlu1 %v4104_v38, %s7032_s30  ;;  %5627 = vst.msk [vmem:[#allocation2 + $0x68] sm:$0xff] %vm3780_vm0, %v5503_v63  ;;  %5628 = vst.msk [vmem:[#allocation2 + $0x78] sm:$0xff] %vm3780_vm0, %v5512_v59  ;;  %v3937_v9 = vor.u32 %v3936_v42, %v3933_v41  ;;  %v4531_v6 = vsel %vm4215_vm5, %v4519_v25, %v4530_v40  ;;  %v8775_v25 = vpop.permute.xlu0 %3701  ;;  %v8785_v20 = vpop.permute.xlu1 %3706 }
 0x22a   : > { %v8763_v48 = vor.u32 %v3945_v31, %v3942_v52  ;;  %v5115_v52 = vor.u32 %v8704_v18, %v5111_v30 }
 0x22b   : > { %4967 = vrot.lane.b32.xlu0 %v5104_v35, %s7043_s27  ;;  %v3938_v3 = vsel %vm3840_vm6, %v8687_v58, %v3937_v9 }
 0x22c   : > { %4038 = vst.msk [vmem:[#allocation2 + $0x90] sm:$0xff] %vm3780_vm0, %v3938_v3  ;;  %v3947_v49 = vsel %vm3840_vm6, %v3937_v9, %v8763_v48 }
 0x22d   : > { %5207 = vrot.lane.b32.xlu1 %v5112_v16, %s7045_s11  ;;  %4039 = vst.msk [vmem:[#allocation2 + $0xa0] sm:$0xff] %vm3780_vm0, %v3947_v49  ;;  %v8789_v56 = vpop.permute.xlu0 %3711 }
 0x22e   : > { %v6638_v55 = vpop.f32.mrb[20].mxu0 }
 0x22f   : > { %v3438_v4 = vadd.f32 %v6638_v55, %v8368_v44  ;;  %v3429_v17 = vpop.f32.mrb[21].mxu0  ;;  %5355 = vrot.lane.b32.xlu0 %v5320_v47, %s7044_s21 }
 0x230   : > { %v3430_v43 = vadd.f32 %v8368_v44, %v3429_v17  ;;  %v6639_v5 = vpop.f32.mrb[22].mxu0  ;;  %v4535_v17 = vrot.slane %v8704_v18, 7  ;;  %v4196_v18 = vld [vmem:[#allocation3] sm:$0x80] }
 0x231   : > { %v3514_v33 = vmax.f32 %v3438_v4, 0.0  ;;  %v3441_v23 = vadd.f32 %v6639_v5, %v8368_v44  ;;  %v3432_v57 = vpop.f32.mrb[23].mxu0  ;;  %4620 = vrot.lane.b32.xlu1 %v4531_v6, %s7042_s26  ;;  %v4105_v4 = vrot.slane %v8709_v24, 7 }
 0x232   : > { %v3512_v35 = vmax.f32 %v3430_v43, 0.0  ;;  %v3433_v2 = vadd.f32 %v8368_v44, %v3432_v57  ;;  %v4538_v3 = vor.u32 %v8707_v1, %v4535_v17 }
 0x233   : > { %v3515_v60 = vmax.f32 %v3441_v23, 0.0  ;;  %4380 = vrot.lane.b32.xlu0 %v8680_v39, %s9849_s28  ;;  %v3766_v61 = vmul.f32 %v8475_v26, %v3514_v33  ;;  %v8795_v26 = vpop.permute.xlu0 %3721  ;;  %v4106_v57 = vsel %vm4085_vm1, %v4103_v50, %v4105_v4 }
 0x234   : > { %v3513_v38 = vmax.f32 %v3433_v2, 0.0  ;;  %v3764_v44 = vmul.f32 %v8456_v27, %v3512_v35 }
 0x235   : > { %v3767_v58 = vmul.f32 %v8462_v8, %v3515_v60  ;;  %4969 = vrot.lane.b32.xlu1 %v5112_v16, %s7043_s27  ;;  %v8793_v8 = vpop.permute.xlu1 %3716 }
 0x236   : > { %v3765_v14 = vmul.f32 %v8441_v21, %v3513_v38 }
 0x237   : > { %v3796_v40 = vpack.c.bf16 %v3767_v58, %v3766_v61  ;;  %4729 = vrot.lane.b32.xlu0 %v8709_v24, %s7041_s12  ;;  %v8825_v47 = vpop.permute.xlu0 %3726 }
 0x238   : > { %v3795_v39 = vpack.c.bf16 %v3765_v14, %v3764_v44  ;;  %v4107_v14 = vrot.slane %v8699_v45, 7 }
 0x239   : > { %3814 = vst.msk [vmem:[#allocation3 + $0x68] sm:$0xff] %vm3780_vm0, %v3796_v40  ;;  %v8814_v10 = vpop.permute.xlu1 %3731 }
 0x23a   : > { %3813 = vst.msk [vmem:[#allocation3 + $0x60] sm:$0xff] %vm3780_vm0, %v3795_v39 }
 0x23b   : > { %v8849_v60 = vpop.permute.xlu0 %3741 }
 0x23d   : > { %v8836_v23 = vpop.permute.xlu1 %3736 }
 0x240   : > { %v8797_v27 = vld [vmem:[#allocation3 + $0x68] sm:$0xff] }
 0x241   : > { %v8800_v21 = vshrl.u32 %v8797_v27, 16  ;;  %v8802_v16 = vld [vmem:[#allocation3 + $0x60] sm:$0xff]  ;;  %v8805_v12 = vshll.u32 %v8797_v27, 16  ;;  %v3834_v33 = vld [vmem:[#allocation3 + $0x68] sm:$0xff] }
 0x242   : > { %v8808_v63 = vshrl.u32 %v8802_v16, 16  ;;  %v8811_v59 = vshll.u32 %v8802_v16, 16  ;;  %v5321_v41 = vrot.slane %v8802_v16, 1  ;;  %v3833_v5 = vld [vmem:[#allocation3 + $0x60] sm:$0xff]  ;;  %v3958_v61 = vshrl.u32 %v3834_v33, 16 }
 0x243   : > { %v5525_v31 = vrot.slane %v8800_v21, 1  ;;  %v5528_v9 = vrot.slane %v8805_v12, 2  ;;  %v3949_v49 = vshrl.u32 %v3833_v5, 16  ;;  %v3952_v38 = vshll.u32 %v3833_v5, 16 }
 0x244   : > { %v5322_v42 = vsel %vm2726_vm3, %v5319_v11, %v5321_v41  ;;  %v5119_v55 = vrot.slane %v8811_v59, 1  ;;  %v5516_v11 = vrot.slane %v8808_v63, 1  ;;  %v5519_v43 = vrot.slane %v8811_v59, 2 }
 0x245   : > { %5357 = vrot.lane.b32.xlu1 %v5322_v42, %s7044_s21  ;;  %v8847_v2 = vor.u32 %v5528_v9, %v5525_v31  ;;  %v3951_v1 = vrot.slane %v3949_v49, 6  ;;  %v3961_v58 = vshll.u32 %v3834_v33, 16  ;;  %v3954_v40 = vrot.slane %v3952_v38, 7  ;;  %v8870_v31 = vld [vmem:[%s9809_s4] ss:$0 sm:$0xff] }
 0x246   : > { %v5120_v30 = vsel %vm2023_vm2, %v5115_v52, %v5119_v55  ;;  %v5520_v35 = vor.u32 %v5519_v43, %v5516_v11  ;;  %v3960_v39 = vrot.slane %v3958_v61, 6  ;;  %v4539_v42 = vsel %vm4215_vm5, %v4527_v19, %v4538_v3 }
 0x247   : > { %5209 = vrot.lane.b32.xlu0 %v5120_v30, %s7045_s11  ;;  %v5127_v52 = vrot.slane %v8805_v12, 1  ;;  %v3955_v5 = vor.u32 %v3954_v40, %v3951_v1  ;;  %v5323_v61 = vrot.slane %v8797_v27, 1 }
 0x248   : > { %v5521_v37 = vsel %vm2967_vm4, %v8739_v53, %v5520_v35  ;;  %v5530_v50 = vsel %vm2967_vm4, %v5520_v35, %v8847_v2 }
 0x249   : > { %4382 = vrot.lane.b32.xlu1 %v4531_v6, %s9849_s28  ;;  %v5123_v6 = vor.u32 %v8808_v63, %v5119_v55  ;;  %5629 = vst.msk [vmem:[#allocation2 + $0x88] sm:$0xff] %vm3780_vm0, %v5521_v37  ;;  %5630 = vst.msk [vmem:[#allocation2 + $0x98] sm:$0xff] %vm3780_vm0, %v5530_v50  ;;  %v3963_v55 = vrot.slane %v3961_v58, 7  ;;  %v3956_v37 = vsel %vm3840_vm6, %v8763_v48, %v3955_v5 }
 0x24a   : > { %4040 = vst.msk [vmem:[#allocation2 + $0xb0] sm:$0xff] %vm3780_vm0, %v3956_v37  ;;  %v4108_v48 = vsel %vm4085_vm1, %v4105_v4, %v4107_v14  ;;  %v5324_v24 = vsel %vm2726_vm3, %v5321_v41, %v5323_v61 }
 0x24b   : > { %4141 = vrot.lane.b32.xlu0 %v4106_v57, %s7032_s30  ;;  %v5128_v19 = vsel %vm2023_vm2, %v5123_v6, %v5127_v52  ;;  %v4543_v57 = vrot.slane %v8808_v63, 7  ;;  %v8880_v3 = vor.u32 %v3963_v55, %v3960_v39 }
 0x24d   : > { %4731 = vrot.lane.b32.xlu1 %v8699_v45, %s7041_s12  ;;  %v4132_v44 = vpop.permute.xlu1 %4131  ;;  %v3965_v6 = vsel %vm3840_vm6, %v3955_v5, %v8880_v3  ;;  %v4546_v39 = vor.u32 %v8811_v59, %v4543_v57  ;;  %v4437_v5 = vld [vmem:[#allocation3 + $0x8] sm:$0x80] }
 0x24e   : > { %4182 = vst.msk [vmem:[#allocation2 + $0x40] sm:$0xff] %vm4177_vm8, %v4132_v44  ;;  %v6642_v53 = vpop.f32.mrb[24].mxu0 }
 0x24f   : > { %v3454_v9 = vadd.f32 %v8870_v31, %v6642_v53  ;;  %v3445_v11 = vpop.f32.mrb[25].mxu0  ;;  %4622 = vrot.lane.b32.xlu0 %v4539_v42, %s7042_s26  ;;  %v4373_v43 = vpop.permute.xlu0 %4372  ;;  %4041 = vst.msk [vmem:[#allocation2 + $0xc0] sm:$0xff] %vm3780_vm0, %v3965_v6 }
 0x250   : > { %v3446_v33 = vadd.f32 %v8870_v31, %v3445_v11  ;;  %4423 = vst.msk [vmem:[#allocation2 + $0x40] sm:$0xff] %vm4418_vm9, %v4373_v43  ;;  %v6643_v54 = vpop.f32.mrb[26].mxu0 }
 0x251   : > { %v3518_v35 = vmax.f32 %v3454_v9, 0.0  ;;  %v3457_v49 = vadd.f32 %v8870_v31, %v6643_v54  ;;  %v3448_v38 = vpop.f32.mrb[27].mxu0  ;;  %5211 = vrot.lane.b32.xlu1 %v5128_v19, %s7045_s11  ;;  %v8931_v54 = vld [vmem:[#allocation3 + $0x10] sm:$0xff] }
 0x252   : > { %v3516_v50 = vmax.f32 %v3446_v33, 0.0  ;;  %v3449_v1 = vadd.f32 %v8870_v31, %v3448_v38  ;;  %v4047_v33 = vld [vmem:[#allocation3] sm:$0x80] }
 0x253   : > { %v3519_v58 = vmax.f32 %v3457_v49, 0.0  ;;  %4971 = vrot.lane.b32.xlu0 %v5120_v30, %s7043_s27  ;;  %v3770_v53 = vmul.f32 %v8765_v46, %v3518_v35  ;;  %v3821_v35 = vld [vmem:[#allocation3] sm:$0xc0] }
 0x254   : > { %v3517_v44 = vmax.f32 %v3449_v1, 0.0  ;;  %v8893_v40 = vpop.permute.xlu1 %4723  ;;  %v3768_v9 = vmul.f32 %v8505_v22, %v3516_v50  ;;  %v8926_v22 = vld [vmem:[#allocation3 + $0x8] sm:$0xff] }
 0x255   : > { %v3771_v55 = vmul.f32 %v8775_v25, %v3519_v58  ;;  %v4722_v30 = vpop.permute.xlu0 %4721  ;;  %4143 = vrot.lane.b32.xlu1 %v4108_v48, %s7032_s30  ;;  %v8917_v25 = vsel %vm4215_vm5, %v4535_v17, %v4546_v39  ;;  %v4221_v41 = vshrl.u32 %v8926_v22, 16  ;;  %v9824_v38 = vrot.slane %v8926_v22, 7 }
 0x256   : > { %v3769_v11 = vmul.f32 %v8484_v29, %v3517_v44  ;;  %v4086_v58 = vrot.slane %v4047_v33, 7  ;;  %v4224_v44 = vshll.u32 %v8926_v22, 16  ;;  %v4461_v48 = vshrl.u32 %v8931_v54, 16 }
 0x257   : > { %v3798_v4 = vpack.c.bf16 %v3771_v55, %v3770_v53  ;;  %5359 = vrot.lane.b32.xlu0 %v5324_v24, %s7044_s21  ;;  %v8939_v37 = vrot.slane %v4221_v41, 7  ;;  %v3842_v39 = vshrl.u32 %v3821_v35, 16 }
 0x258   : > { %v3797_v59 = vpack.c.bf16 %v3769_v11, %v3768_v9  ;;  %v4136_v46 = vpop.permute.xlu1 %4135  ;;  %v3845_v9 = vshll.u32 %v3821_v35, 16  ;;  %v8975_v33 = vrot.slane %v4461_v48, 7 }
 0x259   : > { %3816 = vst.msk [vmem:[#allocation3 + $0x78] sm:$0xff] %vm3780_vm0, %v3798_v4  ;;  %v4134_v29 = vpop.permute.xlu0 %4133  ;;  %4624 = vrot.lane.b32.xlu1 %v8917_v25, %s7042_s26 }
 0x25a   : > { %4184 = vst.msk [vmem:[#allocation2 + $0x60] sm:$0xff] %vm4177_vm8, %v4136_v46  ;;  %4183 = vst.msk [vmem:[#allocation2 + $0x50] sm:$0xff] %vm4177_vm8, %v4134_v29  ;;  %v5131_v46 = vor.u32 %v8800_v21, %v5127_v52 }
 0x25b   : > { %3815 = vst.msk [vmem:[#allocation3 + $0x70] sm:$0xff] %vm3780_vm0, %v3797_v59  ;;  %4384 = vrot.lane.b32.xlu0 %v4539_v42, %s9849_s28  ;;  %v4217_v42 = vshrl.u32 %v4196_v18, 16  ;;  %v9823_v18 = vrot.slane %v8802_v16, 7 }
 0x25c   : > { %v4613_v17 = vpop.permute.xlu1 %4612 }
 0x25d   : > { %v4615_v43 = vpop.permute.xlu0 %4614  ;;  %4973 = vrot.lane.b32.xlu1 %v5128_v19, %s7043_s27  ;;  %4663 = vst.msk [vmem:[#allocation2 + $0x40] sm:$0xff] %vm4658_vm10, %v4613_v17  ;;  %v4457_v19 = vshrl.u32 %v4437_v5, 16  ;;  %v4219_v4 = vrot.slane %v4217_v42, 7  ;;  %v4226_v17 = vor.u32 %v4224_v44, %v8939_v37  ;;  %v4551_v5 = vrot.slane %v8800_v21, 7 }
 0x25e   : > { %4772 = vst.msk [vmem:[#allocation2 + $0x40] sm:$0xff] %vm4767_vm11, %v4722_v30 }
 0x25f   : > { %4733 = vrot.lane.b32.xlu0 %v8802_v16, %s7041_s12  ;;  %v4459_v36 = vrot.slane %v4457_v19, 7  ;;  %v4554_v45 = vor.u32 %v8805_v12, %v4551_v5 }
 0x260   : > { %v8936_v49 = vld [vmem:[#allocation3 + $0x78] sm:$0xff]  ;;  %v4962_v1 = vpop.permute.xlu1 %4961 }
 0x261   : > { %v4377_v6 = vpop.permute.xlu0 %4376  ;;  %5012 = vst.msk [vmem:[#allocation2 + $0x40] sm:$0xff] %vm5007_vm12, %v4962_v1  ;;  %v8955_v11 = vshrl.u32 %v8936_v49, 16  ;;  %v8958_v24 = vshll.u32 %v8936_v49, 16  ;;  %v8985_v1 = vld [vmem:[#allocation3 + $0x78] sm:$0xff] }
 0x262   : > { %v8941_v50 = vld [vmem:[#allocation3 + $0x70] sm:$0xff]  ;;  %4425 = vst.msk [vmem:[#allocation2 + $0x60] sm:$0xff] %vm4418_vm9, %v4377_v6  ;;  %v3847_v6 = vrot.slane %v3845_v9, 7  ;;  %v4110_v9 = vsel %vm4085_vm1, %v4107_v14, %v9823_v18  ;;  %v4336_v14 = vshll.u32 %v8985_v1, 16 }
 0x263   : > { %v8946_v53 = vshrl.u32 %v8941_v50, 16  ;;  %v8949_v55 = vshll.u32 %v8941_v50, 16  ;;  %v9825_v30 = vrot.slane %v8941_v50, 1  ;;  %v5543_v44 = vrot.slane %v8955_v11, 1 }
 0x264   : > { %v4375_v41 = vpop.permute.xlu1 %4374 }
 0x265   : > { %v5326_v59 = vsel %vm2726_vm3, %v5323_v61, %v9825_v30  ;;  %v5135_v29 = vrot.slane %v8949_v55, 1  ;;  %v3844_v61 = vrot.slane %v3842_v39, 6  ;;  %v5534_v35 = vrot.slane %v8946_v53, 1  ;;  %4424 = vst.msk [vmem:[#allocation2 + $0x50] sm:$0xff] %vm4418_vm9, %v4375_v41  ;;  %v3835_v41 = vld [vmem:[#allocation3 + $0x70] sm:$0xff] }
 0x266   : > { %5361 = vrot.lane.b32.xlu1 %v5326_v59, %s7044_s21  ;;  %v5537_v52 = vrot.slane %v8949_v55, 2  ;;  %v5546_v59 = vrot.slane %v8958_v24, 2  ;;  %4664 = vst.msk [vmem:[#allocation2 + $0x50] sm:$0xff] %vm4658_vm10, %v4615_v43  ;;  %v4464_v39 = vshll.u32 %v8931_v54, 16  ;;  %v4227_v43 = vsel %vm4215_vm5, %v4219_v4, %v4226_v17 }
 0x267   : > { %v8983_v42 = vsel %vm2023_vm2, %v5131_v46, %v5135_v29  ;;  %4773 = vst.msk [vmem:[#allocation2 + $0x50] sm:$0xff] %vm4767_vm11, %v8893_v40  ;;  %v4088_v46 = vsel %vm4085_vm1, %v4086_v58, %v9824_v38  ;;  %v4333_v40 = vshrl.u32 %v8985_v1, 16  ;;  %v3848_v18 = vor.u32 %v3847_v6, %v3844_v61  ;;  %v9031_v6 = vld [vmem:[#allocation3 + $0x18] sm:$0xff] }
 0x268   : > { %5213 = vrot.lane.b32.xlu0 %v8983_v42, %s7045_s11  ;;  %v9006_v34 = vor.u32 %v4464_v39, %v8975_v33  ;;  %v5538_v28 = vor.u32 %v5537_v52, %v5534_v35  ;;  %v3967_v19 = vshrl.u32 %v3835_v41, 16  ;;  %v3970_v38 = vshll.u32 %v3835_v41, 16 }
 0x269   : > { %v9014_v58 = vrot.slane %v4333_v40, 7  ;;  %v3857_v17 = vsel %vm3840_vm6, %v3848_v18, %v8684_v0  ;;  %v3978_v30 = vrot.slane %v4333_v40, 6 }
 0x26a   : > { %4145 = vrot.lane.b32.xlu1 %v4110_v9, %s7032_s30  ;;  %v9016_v9 = vor.u32 %v5546_v59, %v5543_v44  ;;  %v5539_v4 = vsel %vm2967_vm4, %v8847_v2, %v5538_v28  ;;  %4029 = vst.msk [vmem:[#allocation2] sm:$0xff] %vm3780_vm0, %v3857_v17  ;;  %v3969_v35 = vrot.slane %v3967_v19, 6  ;;  %v3981_v2 = vrot.slane %v4336_v14, 7 }
 0x26b   : > { %v9025_v12 = vor.u32 %v4336_v14, %v9014_v58  ;;  %5631 = vst.msk [vmem:[#allocation2 + $0xa8] sm:$0xff] %vm3780_vm0, %v5539_v4  ;;  %v3972_v0 = vrot.slane %v3970_v38, 7 }
 0x26c   : > { %4123 = vrot.lane.b32.xlu0 %v4088_v46, %s7032_s30  ;;  %v5548_v61 = vsel %vm2967_vm4, %v5538_v28, %v9016_v9  ;;  %v9036_v44 = vor.u32 %v3981_v2, %v3978_v30  ;;  %v9042_v28 = vsel %vm4215_vm5, %v4543_v57, %v4554_v45  ;;  %v4467_v30 = vsel %vm4215_vm5, %v4459_v36, %v9006_v34  ;;  %v9060_v2 = vld [vmem:[#allocation3 + $0x20] sm:$0xff] }
 0x26d   : > { %5632 = vst.msk [vmem:[#allocation2 + $0xb8] sm:$0xff] %vm3780_vm0, %v5548_v61  ;;  %v3973_v41 = vor.u32 %v3972_v0, %v3969_v35  ;;  %v4810_v61 = vrot.slane %v4464_v39, 1 }
 0x26e   : > { %4386 = vrot.lane.b32.xlu1 %v8917_v25, %s9849_s28  ;;  %v6646_v52 = vpop.f32.mrb[28].mxu0 }
 0x26f   : > { %v3470_v25 = vadd.f32 %v8870_v31, %v6646_v52  ;;  %v3461_v18 = vpop.f32.mrb[29].mxu0  ;;  %v3974_v63 = vsel %vm3840_vm6, %v8880_v3, %v3973_v41  ;;  %v3983_v57 = vsel %vm3840_vm6, %v3973_v41, %v9036_v44 }
 0x270   : > { %4364 = vrot.lane.b32.xlu0 %v4227_v43, %s9849_s28  ;;  %v3462_v59 = vadd.f32 %v8870_v31, %v3461_v18  ;;  %v6647_v46 = vpop.f32.mrb[30].mxu0  ;;  %v4813_v43 = vshll.u32 %v9031_v6, 16  ;;  %4042 = vst.msk [vmem:[#allocation2 + $0xd0] sm:$0xff] %vm3780_vm0, %v3974_v63  ;;  %4043 = vst.msk [vmem:[#allocation2 + $0xe0] sm:$0xff] %vm3780_vm0, %v3983_v57 }
 0x271   : > { %v3522_v40 = vmax.f32 %v3470_v25, 0.0  ;;  %v3473_v14 = vadd.f32 %v8870_v31, %v6647_v46  ;;  %v3464_v38 = vpop.f32.mrb[31].mxu0 }
 0x272   : > { %4626 = vrot.lane.b32.xlu1 %v9042_v28, %s7042_s26  ;;  %v3520_v19 = vmax.f32 %v3462_v59, 0.0  ;;  %v3465_v4 = vadd.f32 %v8870_v31, %v3464_v38  ;;  %v4815_v39 = vrot.slane %v4813_v43, 1  ;;  %v4811_v59 = vor.u32 %v4810_v61, %v4461_v48  ;;  %v5266_v38 = vld [vmem:[#allocation3 + $0x18] sm:$0xfe] }
 0x273   : > { %v3523_v45 = vmax.f32 %v3473_v14, 0.0  ;;  %v9055_v17 = vpop.permute.xlu1 %4727  ;;  %v3774_v52 = vmul.f32 %v8793_v8, %v3522_v40  ;;  %v9826_v8 = vshll.u32 %v9060_v2, 16  ;;  %v9829_v40 = vrot.slane %v8958_v24, 1 }
 0x274   : > { %4604 = vrot.lane.b32.xlu0 %v4467_v30, %s7042_s26  ;;  %v3521_v36 = vmax.f32 %v3465_v4, 0.0  ;;  %v4726_v35 = vpop.permute.xlu0 %4725  ;;  %v3772_v0 = vmul.f32 %v8785_v20, %v3520_v19  ;;  %v5139_v20 = vor.u32 %v8946_v53, %v5135_v29  ;;  %v4816_v48 = vsel %vm2023_vm2, %v4811_v59, %v4815_v39 }
 0x275   : > { %v3775_v3 = vmul.f32 %v8795_v26, %v3523_v45  ;;  %v9828_v4 = vrot.slane %v8936_v49, 1  ;;  %v5304_v63 = vrot.slane %v5266_v38, 1  ;;  %v9827_v45 = vrot.slane %v9060_v2, 1 }
 0x276   : > { %4735 = vrot.lane.b32.xlu1 %v8797_v27, %s7041_s12  ;;  %v3773_v25 = vmul.f32 %v8789_v56, %v3521_v36  ;;  %v5046_v56 = vshrl.u32 %v9031_v6, 16  ;;  %v9091_v29 = vsel %vm2023_vm2, %v5139_v20, %v9829_v40 }
 0x277   : > { %v3800_v18 = vpack.c.bf16 %v3775_v3, %v3774_v52  ;;  %v9850_v3 = vrot.slane %v8941_v50, 1 }
 0x278   : > { %4713 = vrot.lane.b32.xlu0 %v8931_v54, %s7041_s12  ;;  %v3799_v26 = vpack.c.bf16 %v3773_v25, %v3772_v0  ;;  %v5350_v46 = vpop.permute.xlu1 %5349  ;;  %v9075_v41 = vpop.permute.xlu0 %5351  ;;  %v5051_v14 = vor.u32 %v5046_v56, %v4815_v39  ;;  %v9831_v25 = vrot.slane %v8797_v27, 7  ;;  %v9830_v39 = vrot.slane %v8931_v54, 7 }
 0x279   : > { %3818 = vst.msk [vmem:[#allocation3 + $0x88] sm:$0xff] %vm3780_vm0, %v3800_v18  ;;  %v5328_v0 = vsel %vm2726_vm3, %v9850_v3, %v9828_v4  ;;  %v9157_v40 = vrot.slane %v5046_v56, 7 }
 0x27a   : > { %4975 = vrot.lane.b32.xlu1 %v8983_v42, %s7043_s27  ;;  %3817 = vst.msk [vmem:[#allocation3 + $0x80] sm:$0xff] %vm3780_vm0, %v3799_v26  ;;  %v9095_v42 = vrot.slane %v9826_v8, 1  ;;  %v5306_v26 = vsel %vm2726_vm3, %v5304_v63, %v9827_v45  ;;  %v9140_v63 = vrot.slane %v8946_v53, 7 }
 0x27c   : > { %4953 = vrot.lane.b32.xlu0 %v4816_v48, %s7043_s27  ;;  %v5204_v30 = vpop.permute.xlu1 %5203  ;;  %v4138_v19 = vpop.permute.xlu0 %4137  ;;  %v9103_v57 = vsel %vm2023_vm2, %v5051_v14, %v9095_v42  ;;  %v4562_v56 = vor.u32 %v8949_v55, %v9140_v63 }
 0x27d   : > { %4185 = vst.msk [vmem:[#allocation2 + $0x70] sm:$0xff] %vm4177_vm8, %v4138_v19 }
 0x27e   : > { %5215 = vrot.lane.b32.xlu1 %v9091_v29, %s7045_s11 }
 0x280   : > { %5193 = vrot.lane.b32.xlu0 %v9103_v57, %s7045_s11  ;;  %v9108_v61 = vld [vmem:[#allocation3 + $0x88] sm:$0xff]  ;;  %v4617_v36 = vpop.permute.xlu1 %4616  ;;  %v5202_v52 = vpop.permute.xlu0 %5201 }
 0x281   : > { %v9117_v18 = vld [vmem:[#allocation3 + $0x88] sm:$0xff]  ;;  %v9119_v59 = vld [vmem:[#allocation3 + $0x80] sm:$0xff]  ;;  %4665 = vst.msk [vmem:[#allocation2 + $0x60] sm:$0xff] %vm4658_vm10, %v4617_v36  ;;  %v5562_v48 = vshll.u32 %v9108_v61, 16  ;;  %v5559_v36 = vshrl.u32 %v9108_v61, 16 }
 0x282   : > { %5252 = vst.msk [vmem:[#allocation2 + $0x40] sm:$0xff] %vm5247_vm13, %v5202_v52  ;;  %5363 = vrot.lane.b32.xlu1 %v5328_v0, %s7044_s21  ;;  %v9127_v20 = vld [vmem:[#allocation3 + $0x80] sm:$0xff]  ;;  %v5550_v14 = vshrl.u32 %v9119_v59, 16  ;;  %v9132_v38 = vshll.u32 %v9119_v59, 16  ;;  %v4581_v52 = vshrl.u32 %v9117_v18, 16  ;;  %v9851_v0 = vrot.slane %v8802_v16, 7 }
 0x283   : > { %4774 = vst.msk [vmem:[#allocation2 + $0x60] sm:$0xff] %vm4767_vm11, %v4726_v35  ;;  %v9832_v19 = vrot.slane %v9127_v20, 7 }
 0x284   : > { %5400 = vst.msk [vmem:[#allocation2 + $0x40] sm:$0xff] %vm5395_vm14, %v5350_v46  ;;  %5341 = vrot.lane.b32.xlu0 %v5306_v26, %s7044_s21  ;;  %v4966_v3 = vpop.permute.xlu1 %4965  ;;  %v4112_v35 = vsel %vm4085_vm1, %v9851_v0, %v9831_v25  ;;  %v9852_v46 = vrot.slane %v8926_v22, 7  ;;  %v9833_v26 = vrot.slane %v8985_v1, 7  ;;  %v5552_v45 = vrot.slane %v5550_v14, 1 }
 0x285   : > { %v5555_v53 = vrot.slane %v9132_v38, 2  ;;  %5014 = vst.msk [vmem:[#allocation2 + $0x60] sm:$0xff] %vm5007_vm12, %v4966_v3  ;;  %v4964_v4 = vpop.permute.xlu0 %4963  ;;  %v9834_v16 = vrot.slane %v9132_v38, 1  ;;  %v4927_v0 = vrot.slane %v5562_v48, 1  ;;  %v4343_v22 = vrot.slane %v5550_v14, 7 }
 0x286   : > { %v4090_v8 = vsel %vm4085_vm1, %v9852_v46, %v9830_v39  ;;  %4147 = vrot.lane.b32.xlu1 %v4112_v35, %s7032_s30  ;;  %5013 = vst.msk [vmem:[#allocation2 + $0x50] sm:$0xff] %vm5007_vm12, %v4964_v4  ;;  %v9166_v46 = vsel %vm4085_vm1, %v9833_v26, %v9832_v19  ;;  %v5561_v39 = vrot.slane %v5559_v36, 1  ;;  %v9174_v3 = vrot.slane %v4581_v52, 7  ;;  %v5650_v26 = vld [vmem:[#allocation2 + $0x58] sm:$0xff] }
 0x287   : > { %5253 = vst.msk [vmem:[#allocation2 + $0x50] sm:$0xff] %vm5247_vm13, %v5204_v30  ;;  %v4923_v4 = vor.u32 %v5550_v14, %v9834_v16  ;;  %v5564_v35 = vrot.slane %v5562_v48, 2  ;;  %v9179_v19 = vor.u32 %v9132_v38, %v4343_v22  ;;  %v4584_v30 = vshll.u32 %v9117_v18, 16 }
 0x288   : > { %4125 = vrot.lane.b32.xlu0 %v4090_v8, %s7032_s30  ;;  %5401 = vst.msk [vmem:[#allocation2 + $0x50] sm:$0xff] %vm5395_vm14, %v9075_v41  ;;  %v4379_v25 = vpop.permute.xlu1 %4378  ;;  %v4235_v48 = vsel %vm4215_vm5, %v8939_v37, %v9006_v34  ;;  %v5556_v41 = vor.u32 %v5555_v53, %v5552_v45  ;;  %v9201_v34 = vor.u32 %v5559_v36, %v4927_v0  ;;  %v3988_v36 = vshll.u32 %v9127_v20, 16 }
 0x289   : > { %4426 = vst.msk [vmem:[#allocation2 + $0x70] sm:$0xff] %vm4418_vm9, %v4379_v25  ;;  %v4619_v8 = vpop.permute.xlu0 %4618  ;;  %v9189_v14 = vsel %vm2023_vm2, %v4923_v4, %v4927_v0  ;;  %v4474_v25 = vor.u32 %v4813_v43, %v9157_v40  ;;  %v4586_v16 = vor.u32 %v4584_v30, %v9174_v3  ;;  %v9212_v43 = vsel %vm4215_vm5, %v4551_v5, %v4562_v56 }
 0x28a   : > { %4388 = vrot.lane.b32.xlu1 %v9042_v28, %s9849_s28  ;;  %4666 = vst.msk [vmem:[#allocation2 + $0x70] sm:$0xff] %vm4658_vm10, %v4619_v8  ;;  %v9198_v28 = vsel %vm4215_vm5, %v9014_v58, %v9179_v19  ;;  %v5557_v37 = vsel %vm2967_vm4, %v9016_v9, %v5556_v41  ;;  %v9218_v45 = vor.u32 %v5564_v35, %v5561_v39  ;;  %v3996_v9 = vrot.slane %v4581_v52, 6 }
 0x28b   : > { %v5647_v55 = vld [vmem:[#allocation2 + $0x40] sm:$0xff]  ;;  %4775 = vst.msk [vmem:[#allocation2 + $0x70] sm:$0xff] %vm4767_vm11, %v9055_v17  ;;  %v9215_v58 = vsel %vm4215_vm5, %v4343_v22, %v4586_v16  ;;  %v3985_v17 = vshrl.u32 %v9127_v20, 16  ;;  %v9226_v21 = vsel %vm4215_vm5, %v8975_v33, %v4474_v25  ;;  %v3999_v16 = vrot.slane %v4584_v30, 7 }
 0x28c   : > { %5873 = vmatmul.mubr.bf16.vlgmr.msra.gmra.mrb[0].mxu1 %v5647_v55  ;;  %4366 = vrot.lane.b32.xlu0 %v4235_v48, %s9849_s28  ;;  %5633 = vst.msk [vmem:[#allocation2 + $0xc8] sm:$0xff] %vm3780_vm0, %v5557_v37  ;;  %v5566_v5 = vsel %vm2967_vm4, %v5556_v41, %v9218_v45  ;;  %v3990_v22 = vrot.slane %v3988_v36, 7  ;;  %v9240_v55 = vld [vmem:[#allocation3 + $0x28] sm:$0xff]  ;;  %v5057_v36 = vshrl.u32 %v9060_v2, 16 }
 0x28d   : > { %6539 = vmatprep.mubr.msk.bf16.mxu1 %vm3780_vm0, %v5650_v26  ;;  %v3987_v53 = vrot.slane %v3985_v17, 6  ;;  %5634 = vst.msk [vmem:[#allocation2 + $0xd8] sm:$0xff] %vm3780_vm0, %v5566_v5  ;;  %v9235_v4 = vor.u32 %v3999_v16, %v3996_v9  ;;  %v5652_v37 = vld [vmem:[#allocation2 + $0x68] sm:$0xff] }
 0x28e   : > { %4628 = vrot.lane.b32.xlu1 %v9212_v43, %s7042_s26  ;;  %v6650_v26 = vpop.f32.mrb[32].mxu0 }
 0x28f   : > { %v3486_v39 = vadd.f32 %v8870_v31, %v6650_v26  ;;  %v3477_v0 = vpop.f32.mrb[33].mxu0  ;;  %v5649_v30 = vld [vmem:[#allocation2 + $0x50] sm:$0xff]  ;;  %v3991_v48 = vor.u32 %v3990_v22, %v3987_v53  ;;  %v5061_v53 = vshll.u32 %v9240_v55, 16  ;;  %v9853_v22 = vrot.slane %v8958_v24, 1 }
 0x290   : > { %4606 = vrot.lane.b32.xlu0 %v9226_v21, %s7042_s26  ;;  %v3478_v52 = vadd.f32 %v8870_v31, %v3477_v0  ;;  %v6651_v56 = vpop.f32.mrb[34].mxu0 }
 0x291   : > { %v3526_v33 = vmax.f32 %v3486_v39, 0.0  ;;  %v3489_v35 = vadd.f32 %v8870_v31, %v6651_v56  ;;  %v3480_v8 = vpop.f32.mrb[35].mxu0  ;;  %v3992_v9 = vsel %vm3840_vm6, %v9036_v44, %v3991_v48  ;;  %v4001_v26 = vsel %vm3840_vm6, %v3991_v48, %v9235_v4 }
 0x292   : > { %4737 = vrot.lane.b32.xlu1 %v8941_v50, %s7041_s12  ;;  %v3524_v41 = vmax.f32 %v3478_v52, 0.0  ;;  %v3481_v25 = vadd.f32 %v8870_v31, %v3480_v8  ;;  %4044 = vst.msk [vmem:[#allocation2 + $0xf0] sm:$0xff] %vm3780_vm0, %v3992_v9  ;;  %4045 = vst.msk [vmem:[#allocation2 + $0x100] sm:$0xff] %vm3780_vm0, %v4001_v26  ;;  %v5059_v39 = vor.u32 %v5057_v36, %v9095_v42  ;;  %v9271_v42 = vrot.slane %v5061_v53, 1 }
 0x293   : > { %v3527_v17 = vmax.f32 %v3489_v35, 0.0  ;;  %v3778_v31 = vmul.f32 %v8836_v23, %v3526_v33  ;;  %v5147_v52 = vor.u32 %v8955_v11, %v9853_v22  ;;  %v9841_v33 = vrot.slane %v9240_v55, 1 }
 0x294   : > { %5881 = vmatmul.mubr.bf16.gmra.mrb[4].mxu1 %v5649_v30  ;;  %4715 = vrot.lane.b32.xlu0 %v9031_v6, %s7041_s12  ;;  %v3525_v5 = vmax.f32 %v3481_v25, 0.0  ;;  %v3776_v44 = vmul.f32 %v8825_v47, %v3524_v41  ;;  %v9842_v47 = vrot.slane %v9119_v59, 1  ;;  %v9855_v8 = vrot.slane %v8936_v49, 1  ;;  %v9294_v41 = vld [vmem:[#allocation3 + $0xa0] sm:$0xff] }
 0x295   : > { %6540 = vmatprep.mubr.msk.bf16.mxu1 %vm3780_vm0, %v5652_v37  ;;  %v3779_v16 = vmul.f32 %v8849_v60, %v3527_v17  ;;  %v9854_v60 = vrot.slane %v9132_v38, 1  ;;  %v9839_v48 = vrot.slane %v8941_v50, 7  ;;  %v9856_v37 = vrot.slane %v9060_v2, 1 }
 0x296   : > { %4977 = vrot.lane.b32.xlu1 %v9091_v29, %s7043_s27  ;;  %v3777_v0 = vmul.f32 %v8814_v10, %v3525_v5  ;;  %v5330_v30 = vsel %vm2726_vm3, %v9855_v8, %v9842_v47  ;;  %v9837_v9 = vrot.slane %v9031_v6, 7  ;;  %v9305_v5 = vrot.slane %v5057_v36, 7 }
 0x297   : > { %v3802_v56 = vpack.c.bf16 %v3779_v16, %v3778_v31  ;;  %v5354_v35 = vpop.permute.xlu1 %5353  ;;  %v9269_v29 = vsel %vm2023_vm2, %v5147_v52, %v9854_v60  ;;  %v5308_v17 = vsel %vm2726_vm3, %v9856_v37, %v9841_v33  ;;  %v5181_v53 = vshll.u32 %v9294_v41, 16 }
 0x298   : > { %4955 = vrot.lane.b32.xlu0 %v9103_v57, %s7043_s27  ;;  %v3801_v23 = vpack.c.bf16 %v3777_v0, %v3776_v44  ;;  %v9281_v57 = vsel %vm2023_vm2, %v5059_v39, %v9271_v42  ;;  %v9835_v31 = vshrl.u32 %v9294_v41, 16  ;;  %v9857_v39 = vrot.slane %v8797_v27, 7 }
 0x299   : > { %3820 = vst.msk [vmem:[#allocation3 + $0x98] sm:$0xff] %vm3780_vm0, %v3802_v56  ;;  %v5206_v10 = vpop.permute.xlu0 %5205  ;;  %v9836_v0 = vrot.slane %v8955_v11, 7  ;;  %v9858_v60 = vrot.slane %v8931_v54, 7  ;;  %v9859_v8 = vshll.u32 %v9060_v2, 16 }
 0x29a   : > { %5217 = vrot.lane.b32.xlu1 %v9269_v29, %s7045_s11  ;;  %3819 = vst.msk [vmem:[#allocation3 + $0x90] sm:$0xff] %vm3780_vm0, %v3801_v23  ;;  %v4114_v44 = vsel %vm4085_vm1, %v9857_v39, %v9839_v48  ;;  %v5588_v37 = vrot.slane %v9835_v31, 1  ;;  %v9345_v39 = vrot.slane %v5181_v53, 1 }
 0x29b   : > { %5254 = vst.msk [vmem:[#allocation2 + $0x60] sm:$0xff] %vm5247_vm13, %v5206_v10  ;;  %v4140_v38 = vpop.permute.xlu1 %4139  ;;  %v4092_v10 = vsel %vm4085_vm1, %v9858_v60, %v9837_v9  ;;  %v4570_v54 = vor.u32 %v8958_v24, %v9836_v0 }
 0x29c   : > { %5402 = vst.msk [vmem:[#allocation2 + $0x60] sm:$0xff] %vm5395_vm14, %v5354_v35  ;;  %5195 = vrot.lane.b32.xlu0 %v9281_v57, %s7045_s11 }
 0x29d   : > { %4186 = vst.msk [vmem:[#allocation2 + $0x80] sm:$0xff] %vm4177_vm8, %v4140_v38  ;;  %v4968_v25 = vpop.permute.xlu0 %4967  ;;  %v5654_v38 = vld [vmem:[#allocation2 + $0x78] sm:$0xff] }
 0x29e   : > { %5365 = vrot.lane.b32.xlu1 %v5330_v30, %s7044_s21  ;;  %5015 = vst.msk [vmem:[#allocation2 + $0x70] sm:$0xff] %vm5007_vm12, %v4968_v25  ;;  %v4482_v30 = vor.u32 %v9859_v8, %v9305_v5 }
 0x29f   : > { %v5208_v26 = vpop.permute.xlu1 %5207 }
 0x2a0   : > { %5343 = vrot.lane.b32.xlu0 %v5308_v17, %s7044_s21  ;;  %v9309_v16 = vld [vmem:[#allocation3 + $0x98] sm:$0xff]  ;;  %5255 = vst.msk [vmem:[#allocation2 + $0x70] sm:$0xff] %vm5247_vm13, %v5208_v26  ;;  %v5591_v17 = vrot.slane %v5181_v53, 2  ;;  %v4483_v48 = vsel %vm4215_vm5, %v9157_v40, %v4482_v30  ;;  %v5656_v30 = vld [vmem:[#allocation2 + $0x88] sm:$0xff] }
 0x2a1   : > { %v5580_v22 = vshll.u32 %v9309_v16, 16  ;;  %v9319_v36 = vld [vmem:[#allocation3 + $0x90] sm:$0xff]  ;;  %v5356_v52 = vpop.permute.xlu0 %5355  ;;  %v5577_v56 = vshrl.u32 %v9309_v16, 16 }
 0x2a2   : > { %4149 = vrot.lane.b32.xlu1 %v4114_v44, %s7032_s30  ;;  %v9324_v35 = vshrl.u32 %v9319_v36, 16  ;;  %v9327_v23 = vshll.u32 %v9319_v36, 16  ;;  %5403 = vst.msk [vmem:[#allocation2 + $0x70] sm:$0xff] %vm5395_vm14, %v5356_v52  ;;  %v9365_v53 = vor.u32 %v5591_v17, %v5588_v37  ;;  %v3839_v0 = vld [vmem:[#allocation3 + $0x90] sm:$0x7f] }
 0x2a3   : > { %v5651_v27 = vld [vmem:[#allocation2 + $0x60] sm:$0xff]  ;;  %v5175_v25 = vrot.slane %v5580_v22, 1  ;;  %v4621_v26 = vpop.permute.xlu1 %4620  ;;  %v5579_v8 = vrot.slane %v5577_v56, 1  ;;  %v4003_v47 = vshrl.u32 %v3839_v0, 16 }
 0x2a4   : > { %5889 = vmatmul.mubr.bf16.gmra.mrb[8].mxu1 %v5651_v27  ;;  %4127 = vrot.lane.b32.xlu0 %v4092_v10, %s7032_s30  ;;  %v5570_v44 = vrot.slane %v9324_v35, 1  ;;  %v5573_v52 = vrot.slane %v9327_v23, 2  ;;  %v9840_v60 = vrot.slane %v9327_v23, 1  ;;  %v9838_v10 = vrot.slane %v9324_v35, 7 }
 0x2a5   : > { %6541 = vmatprep.mubr.msk.bf16.mxu1 %vm3780_vm0, %v5654_v38  ;;  %v4381_v27 = vpop.permute.xlu0 %4380  ;;  %v5582_v38 = vrot.slane %v5580_v22, 2  ;;  %v9354_v31 = vor.u32 %v5577_v56, %v5175_v25 }
 0x2a6   : > { %4390 = vrot.lane.b32.xlu1 %v9212_v43, %s9849_s28  ;;  %4427 = vst.msk [vmem:[#allocation2 + $0x80] sm:$0xff] %vm4418_vm9, %v4381_v27  ;;  %v4594_v24 = vor.u32 %v9327_v23, %v9838_v10  ;;  %v4939_v43 = vor.u32 %v9324_v35, %v9840_v60  ;;  %v4571_v27 = vsel %vm4215_vm5, %v9140_v63, %v4570_v54 }
 0x2a7   : > { %4667 = vst.msk [vmem:[#allocation2 + $0x80] sm:$0xff] %vm4658_vm10, %v4621_v26  ;;  %v9372_v26 = vsel %vm2023_vm2, %v9354_v31, %v9345_v39  ;;  %v5574_v54 = vor.u32 %v5573_v52, %v5570_v44  ;;  %v4970_v60 = vpop.permute.xlu1 %4969  ;;  %v4005_v44 = vrot.slane %v4003_v47, 6  ;;  %v5065_v52 = vshrl.u32 %v9240_v55, 16 }
 0x2a8   : > { %4368 = vrot.lane.b32.xlu0 %v9226_v21, %s9849_s28  ;;  %v4599_v21 = vrot.slane %v5577_v56, 7  ;;  %v9379_v37 = vsel %vm4215_vm5, %v9174_v3, %v4594_v24  ;;  %v9382_v17 = vsel %vm2023_vm2, %v4939_v43, %v5175_v25  ;;  %v5583_v56 = vor.u32 %v5582_v38, %v5579_v8 }
 0x2a9   : > { %v4730_v9 = vpop.permute.xlu0 %4729  ;;  %v5653_v10 = vld [vmem:[#allocation2 + $0x70] sm:$0xff]  ;;  %v5575_v3 = vsel %vm2967_vm4, %v9218_v45, %v5574_v54  ;;  %v4006_v25 = vshll.u32 %v3839_v0, 16  ;;  %v9860_v8 = vrot.slane %v9119_v59, 1 }
 0x2aa   : > { %4630 = vrot.lane.b32.xlu1 %v4571_v27, %s7042_s26  ;;  %4776 = vst.msk [vmem:[#allocation2 + $0x80] sm:$0xff] %vm4767_vm11, %v4730_v9  ;;  %v9385_v33 = vor.u32 %v5580_v22, %v4599_v21  ;;  %v9389_v27 = vld [vmem:[#allocation3 + $0x30] sm:$0xff]  ;;  %v5584_v9 = vsel %vm2967_vm4, %v5574_v54, %v5583_v56  ;;  %v5593_v22 = vsel %vm2967_vm4, %v5583_v56, %v9365_v53  ;;  %v9862_v21 = vrot.slane %v8985_v1, 7 }
 0x2ab   : > { %5016 = vst.msk [vmem:[#allocation2 + $0x80] sm:$0xff] %vm5007_vm12, %v4970_v60  ;;  %v5069_v45 = vshll.u32 %v9389_v27, 16  ;;  %v5067_v60 = vor.u32 %v5065_v52, %v9271_v42  ;;  %v9861_v42 = vrot.slane %v9240_v55, 1  ;;  %v9863_v54 = vrot.slane %v8941_v50, 7 }
 0x2ac   : > { %5897 = vmatmul.mubr.bf16.gmra.mrb[12].mxu1 %v5653_v10  ;;  %4608 = vrot.lane.b32.xlu0 %v4483_v48, %s7042_s26  ;;  %5635 = vst.msk [vmem:[#allocation2 + $0xe8] sm:$0xff] %vm3780_vm0, %v5575_v3  ;;  %5636 = vst.msk [vmem:[#allocation2 + $0xf8] sm:$0xff] %vm3780_vm0, %v5584_v9  ;;  %v4008_v48 = vrot.slane %v4006_v25, 7  ;;  %v5331_v10 = vrot.slane %v9108_v61, 1  ;;  %v9864_v3 = vrot.slane %v8395_v51, 7  ;;  %v9865_v25 = vrot.slane %v9031_v6, 7 }
 0x2ad   : > { %6542 = vmatprep.mubr.msk.bf16.mxu1 %vm3780_vm0, %v5656_v30  ;;  %5637 = vst.msk [vmem:[#allocation2 + $0x108] sm:$0xff] %vm3780_vm0, %v5593_v22  ;;  %v4116_v56 = vsel %vm4085_vm1, %v9863_v54, %v9862_v21  ;;  %v4339_v50 = vsel %vm4215_vm5, %v9140_v63, %v9025_v12  ;;  %v4251_v51 = vsel %vm4215_vm5, %v9157_v40, %v8438_v62  ;;  %v9866_v12 = vrot.slane %v8955_v11, 7 }
 0x2ae   : > { %4739 = vrot.lane.b32.xlu1 %v8936_v49, %s7041_s12  ;;  %v4009_v0 = vor.u32 %v4008_v48, %v4005_v44  ;;  %v5071_v49 = vrot.slane %v5069_v45, 1  ;;  %v4094_v9 = vsel %vm4085_vm1, %v9865_v25, %v9864_v3  ;;  %v5658_v48 = vld [vmem:[#allocation2 + $0x98] sm:$0xff]  ;;  %v4491_v62 = vsel %vm4215_vm5, %v9305_v5, %v8406_v32 }
 0x2af   : > { %v4579_v63 = vsel %vm4215_vm5, %v9866_v12, %v9179_v19  ;;  %v5073_v19 = vshrl.u32 %v9389_v27, 16  ;;  %v9867_v5 = vrot.slane %v8454_v7, 1  ;;  %v5660_v7 = vld [vmem:[#allocation2 + $0xa8] sm:$0xff]  ;;  %v9871_v12 = vshrl.u32 %v9294_v41, 16 }
 0x2b0   : > { %4717 = vrot.lane.b32.xlu0 %v9060_v2, %s7041_s12  ;;  %v4010_v47 = vsel %vm3840_vm6, %v9235_v4, %v4009_v0  ;;  %v5072_v2 = vsel %vm2023_vm2, %v5067_v60, %v5071_v49 }
 0x2b1   : > { %4046 = vst.msk [vmem:[#allocation2 + $0x110] sm:$0xff] %vm3780_vm0, %v4010_v47  ;;  %v4840_v47 = vsel %vm2023_vm2, %v5067_v60, %v9867_v5  ;;  %v5075_v52 = vor.u32 %v5073_v19, %v5071_v49 }
 0x2b2   : > { %4979 = vrot.lane.b32.xlu1 %v9269_v29, %s7043_s27  ;;  %v5309_v29 = vrot.slane %v9389_v27, 1 }
 0x2b3   : > { %v5080_v49 = vsel %vm2023_vm2, %v5075_v52, %v8513_v13 }
 0x2b4   : > { %4957 = vrot.lane.b32.xlu0 %v9281_v57, %s7043_s27  ;;  %v5332_v57 = vsel %vm2726_vm3, %v9860_v8, %v5331_v10  ;;  %v5310_v24 = vsel %vm2726_vm3, %v9861_v42, %v5309_v29  ;;  %v5662_v42 = vld [vmem:[#allocation2 + $0xb8] sm:$0xff] }
 0x2b6   : > { %5219 = vrot.lane.b32.xlu1 %v9189_v14, %s7045_s11 }
 0x2b7   : > { %v5358_v4 = vpop.permute.xlu1 %5357 }
 0x2b8   : > { %5197 = vrot.lane.b32.xlu0 %v5072_v2, %s7045_s11  ;;  %v5333_v2 = vrot.slane %v9319_v36, 1 }
 0x2b9   : > { %v5210_v38 = vpop.permute.xlu0 %5209 }
 0x2ba   : > { %5367 = vrot.lane.b32.xlu1 %v5332_v57, %s7044_s21  ;;  %5256 = vst.msk [vmem:[#allocation2 + $0x80] sm:$0xff] %vm5247_vm13, %v5210_v38 }
 0x2bb   : > { %5404 = vst.msk [vmem:[#allocation2 + $0x80] sm:$0xff] %vm5395_vm14, %v5358_v4  ;;  %v4383_v43 = vpop.permute.xlu1 %4382 }
 0x2bc   : > { %5345 = vrot.lane.b32.xlu0 %v5310_v24, %s7044_s21 }
 0x2bd   : > { %v4142_v30 = vpop.permute.xlu0 %4141 }
 0x2be   : > { %4151 = vrot.lane.b32.xlu1 %v4116_v56, %s7032_s30  ;;  %4187 = vst.msk [vmem:[#allocation2 + $0x90] sm:$0xff] %vm4177_vm8, %v4142_v30  ;;  %v5337_v30 = vrot.slane %v9294_v41, 1 }
 0x2bf   : > { %4428 = vst.msk [vmem:[#allocation2 + $0x90] sm:$0xff] %vm4418_vm9, %v4383_v43  ;;  %v4732_v22 = vpop.permute.xlu1 %4731 }
 0x2c0   : > { %4129 = vrot.lane.b32.xlu0 %v4094_v9, %s7032_s30  ;;  %v4065_v9 = vld [vmem:[#allocation3 + $0x90] sm:$0x7f] }
 0x2c1   : > { %v4623_v1 = vpop.permute.xlu0 %4622 }
 0x2c2   : > { %4392 = vrot.lane.b32.xlu1 %v4339_v50, %s9849_s28  ;;  %4668 = vst.msk [vmem:[#allocation2 + $0x90] sm:$0xff] %vm4658_vm10, %v4623_v1  ;;  %v5655_v44 = vld [vmem:[#allocation2 + $0x80] sm:$0xff]  ;;  %v4121_v1 = vrot.slane %v4065_v9, 7 }
 0x2c3   : > { %4777 = vst.msk [vmem:[#allocation2 + $0x90] sm:$0xff] %vm4767_vm11, %v4732_v22  ;;  %v5212_v6 = vpop.permute.xlu1 %5211  ;;  %5905 = vmatmul.mubr.bf16.gmra.mrb[16].mxu1 %v5655_v44  ;;  %v5044_v22 = vld [vmem:[#allocation3 + $0xa8] sm:$0x1] }
 0x2c4   : > { %4370 = vrot.lane.b32.xlu0 %v4251_v51, %s9849_s28  ;;  %6543 = vmatprep.mubr.msk.bf16.mxu1 %vm3780_vm0, %v5658_v48  ;;  %v4804_v51 = vld [vmem:[#allocation3 + $0xa0] sm:$0x1] }
 0x2c5   : > { %v4972_v45 = vpop.permute.xlu0 %4971  ;;  %v4949_v48 = vshll.u32 %v4804_v51, 16 }
 0x2c6   : > { %4632 = vrot.lane.b32.xlu1 %v4579_v63, %s7042_s26  ;;  %5017 = vst.msk [vmem:[#allocation2 + $0x90] sm:$0xff] %vm5007_vm12, %v4972_v45  ;;  %v5187_v63 = vor.u32 %v9871_v12, %v9345_v39 }
 0x2c7   : > { %5257 = vst.msk [vmem:[#allocation2 + $0x90] sm:$0xff] %vm5247_vm13, %v5212_v6  ;;  %v4144_v40 = vpop.permute.xlu1 %4143  ;;  %v4951_v41 = vrot.slane %v4949_v48, 1 }
 0x2c8   : > { %4610 = vrot.lane.b32.xlu0 %v4491_v62, %s7042_s26  ;;  %4188 = vst.msk [vmem:[#allocation2 + $0xa0] sm:$0xff] %vm4177_vm8, %v4144_v40  ;;  %v9872_v40 = vrot.slane %v9324_v35, 7  ;;  %v5432_v35 = vld [vmem:[#allocation3 + $0xa8] sm:$0x3] }
 0x2c9   : > { %v5360_v0 = vpop.permute.xlu0 %5359  ;;  %v4952_v52 = vsel %vm2023_vm2, %v9354_v31, %v4951_v41 }
 0x2ca   : > { %4741 = vrot.lane.b32.xlu1 %v9119_v59, %s7041_s12  ;;  %5405 = vst.msk [vmem:[#allocation2 + $0x90] sm:$0xff] %vm5395_vm14, %v5360_v0  ;;  %v9868_v59 = vrot.slane %v9327_v23, 1  ;;  %v9869_v23 = vrot.slane %v8444_v15, 1  ;;  %v4603_v0 = vsel %vm4215_vm5, %v9872_v40, %v9385_v33  ;;  %v5642_v33 = vld [vmem:[#allocation2 + $0x18] sm:$0xff] }
 0x2cb   : > { %v4625_v11 = vpop.permute.xlu1 %4624 }
 0x2cc   : > { %4719 = vrot.lane.b32.xlu0 %v9240_v55, %s7041_s12  ;;  %v5168_v55 = vsel %vm2023_vm2, %v9201_v34, %v9868_v59  ;;  %v5334_v34 = vsel %vm2726_vm3, %v5331_v10, %v5333_v2  ;;  %v5312_v60 = vsel %vm2726_vm3, %v5309_v29, %v9869_v23  ;;  %v5335_v29 = vrot.slane %v9309_v16, 1 }
 0x2cd   : > { %v4385_v32 = vpop.permute.xlu0 %4384  ;;  %v5595_v59 = vshrl.u32 %v5432_v35, 16 }
 0x2ce   : > { %4981 = vrot.lane.b32.xlu1 %v9189_v14, %s7043_s27  ;;  %4429 = vst.msk [vmem:[#allocation2 + $0xa0] sm:$0xff] %vm4418_vm9, %v4385_v32  ;;  %v5336_v21 = vsel %vm2726_vm3, %v5333_v2, %v5335_v29 }
 0x2cf   : > { %4669 = vst.msk [vmem:[#allocation2 + $0xa0] sm:$0xff] %vm4658_vm10, %v4625_v11  ;;  %v4974_v8 = vpop.permute.xlu1 %4973 }
 0x2d0   : > { %4959 = vrot.lane.b32.xlu0 %v4840_v47, %s7043_s27 }
 0x2d1   : > { %v4734_v4 = vpop.permute.xlu0 %4733  ;;  %v5657_v14 = vld [vmem:[#allocation2 + $0x90] sm:$0xff] }
 0x2d2   : > { %5221 = vrot.lane.b32.xlu1 %v5168_v55, %s7045_s11  ;;  %4778 = vst.msk [vmem:[#allocation2 + $0xa0] sm:$0xff] %vm4767_vm11, %v4734_v4  ;;  %5913 = vmatmul.mubr.bf16.gmra.mrb[20].mxu1 %v5657_v14  ;;  %v5597_v14 = vrot.slane %v5595_v59, 1 }
 0x2d3   : > { %5018 = vst.msk [vmem:[#allocation2 + $0xa0] sm:$0xff] %vm5007_vm12, %v4974_v8  ;;  %6544 = vmatprep.mubr.msk.bf16.mxu1 %vm3780_vm0, %v5660_v7 }
 0x2d4   : > { %5199 = vrot.lane.b32.xlu0 %v5080_v49, %s7045_s11 }
 0x2d6   : > { %5369 = vrot.lane.b32.xlu1 %v5334_v34, %s7044_s21 }
 0x2d8   : > { %v5362_v57 = vpop.permute.xlu1 %5361  ;;  %5347 = vrot.lane.b32.xlu0 %v5312_v60, %s7044_s21 }
 0x2da   : > { %v5214_v13 = vpop.permute.xlu0 %5213  ;;  %4394 = vrot.lane.b32.xlu1 %v9198_v28, %s9849_s28  ;;  %v4119_v28 = vrot.slane %v9117_v18, 7 }
 0x2db   : > { %5258 = vst.msk [vmem:[#allocation2 + $0xa0] sm:$0xff] %vm5247_vm13, %v5214_v13 }
 0x2dc   : > { %5406 = vst.msk [vmem:[#allocation2 + $0xa0] sm:$0xff] %vm5395_vm14, %v5362_v57  ;;  %v4146_v61 = vpop.permute.xlu1 %4145  ;;  %4153 = vrot.lane.b32.xlu0 %v9166_v46, %s7032_s30  ;;  %v4122_v6 = vsel %vm4085_vm1, %v4119_v28, %v4121_v1 }
 0x2dd   : > { %4189 = vst.msk [vmem:[#allocation2 + $0xb0] sm:$0xff] %vm4177_vm8, %v4146_v61 }
 0x2de   : > { %v4124_v15 = vpop.permute.xlu0 %4123  ;;  %4743 = vrot.lane.b32.xlu1 %v9117_v18, %s7041_s12  ;;  %v9870_v18 = vrot.slane %v9127_v20, 7 }
 0x2df   : > { %4178 = vst.msk [vmem:[#allocation2] sm:$0xff] %vm4177_vm8, %v4124_v15 }
 0x2e0   : > { %v4387_v27 = vpop.permute.xlu1 %4386  ;;  %4634 = vrot.lane.b32.xlu0 %v9215_v58, %s7042_s26  ;;  %v4120_v24 = vsel %vm4085_vm1, %v9870_v18, %v4119_v28  ;;  %v5644_v18 = vld [vmem:[#allocation2 + $0x28] sm:$0xff] }
 0x2e1   : > { %4430 = vst.msk [vmem:[#allocation2 + $0xb0] sm:$0xff] %vm4418_vm9, %v4387_v27 }
 0x2e2   : > { %v4365_v10 = vpop.permute.xlu0 %4364  ;;  %5223 = vrot.lane.b32.xlu1 %v9382_v17, %s7045_s11 }
 0x2e3   : > { %4419 = vst.msk [vmem:[#allocation2] sm:$0xff] %vm4418_vm9, %v4365_v10  ;;  %v5659_v46 = vld [vmem:[#allocation2 + $0xa0] sm:$0xff] }
 0x2e4   : > { %v4627_v38 = vpop.permute.xlu1 %4626  ;;  %5921 = vmatmul.mubr.bf16.gmra.mrb[24].mxu1 %v5659_v46  ;;  %4983 = vrot.lane.b32.xlu0 %v5168_v55, %s7043_s27  ;;  %v5598_v55 = vshll.u32 %v5432_v35, 16 }
 0x2e5   : > { %4670 = vst.msk [vmem:[#allocation2 + $0xb0] sm:$0xff] %vm4658_vm10, %v4627_v38  ;;  %6545 = vmatprep.mubr.msk.bf16.mxu1 %vm3780_vm0, %v5662_v42 }
 0x2e6   : > { %4155 = vrot.lane.b32.xlu1 %v4120_v24, %s7032_s30  ;;  %v4605_v43 = vpop.permute.xlu0 %4604  ;;  %v5600_v8 = vrot.slane %v5598_v55, 2  ;;  %v9640_v55 = vld [vmem:[%s9811_s6] ss:$0 sm:$0xff] }
 0x2e7   : > { %4659 = vst.msk [vmem:[#allocation2] sm:$0xff] %vm4658_vm10, %v4605_v43 }
 0x2e8   : > { %v4736_v54 = vpop.permute.xlu1 %4735  ;;  %5371 = vrot.lane.b32.xlu0 %v5336_v21, %s7044_s21  ;;  %v5601_v49 = vor.u32 %v5600_v8, %v5597_v14 }
 0x2e9   : > { %4779 = vst.msk [vmem:[#allocation2 + $0xb0] sm:$0xff] %vm4767_vm11, %v4736_v54 }
 0x2ea   : > { %4636 = vrot.lane.b32.xlu1 %v9379_v37, %s7042_s26  ;;  %v4714_v56 = vpop.permute.xlu0 %4713  ;;  %v5602_v31 = vsel %vm2967_vm4, %v9365_v53, %v5601_v49  ;;  %vm6150_vm4 = vcmask 253952  }
 0x2eb   : > { %4768 = vst.msk [vmem:[#allocation2] sm:$0xff] %vm4767_vm11, %v4714_v56 }
 0x2ec   : > { %v4976_v20 = vpop.permute.xlu1 %4975  ;;  %4396 = vrot.lane.b32.xlu0 %v9215_v58, %s9849_s28  ;;  %v5338_v58 = vsel %vm2726_vm3, %v5335_v29, %v5337_v30  ;;  %5638 = vst.msk [vmem:[#allocation2 + $0x118] sm:$0xff] %vm3780_vm0, %v5602_v31  ;;  %v5666_v29 = vld [vmem:[#allocation2 + $0xd8] sm:$0xff] }
 0x2ed   : > { %5019 = vst.msk [vmem:[#allocation2 + $0xb0] sm:$0xff] %vm5007_vm12, %v4976_v20 }
 0x2ee   : > { %4985 = vrot.lane.b32.xlu1 %v9382_v17, %s7043_s27  ;;  %v4954_v3 = vpop.permute.xlu0 %4953  ;;  %v5189_v17 = vshll.u32 %v5044_v22, 16 }
 0x2ef   : > { %5008 = vst.msk [vmem:[#allocation2] sm:$0xff] %vm5007_vm12, %v4954_v3 }
 0x2f0   : > { %v5216_v25 = vpop.permute.xlu1 %5215  ;;  %4745 = vrot.lane.b32.xlu0 %v9319_v36, %s7041_s12  ;;  %v5191_v45 = vrot.slane %v5189_v17, 1  ;;  %v5668_v17 = vld [vmem:[#allocation2 + $0xe8] sm:$0xff] }
 0x2f1   : > { %5259 = vst.msk [vmem:[#allocation2 + $0xb0] sm:$0xff] %vm5247_vm13, %v5216_v25 }
 0x2f2   : > { %5373 = vrot.lane.b32.xlu1 %v5338_v58, %s7044_s21  ;;  %v5194_v50 = vpop.permute.xlu0 %5193  ;;  %v5192_v39 = vsel %vm2023_vm2, %v5187_v63, %v5191_v45  ;;  %vm7048_vm2 = vmmov 0  }
 0x2f3   : > { %5248 = vst.msk [vmem:[#allocation2] sm:$0xff] %vm5247_vm13, %v5194_v50 }
 0x2f4   : > { %v5364_v44 = vpop.permute.xlu1 %5363  ;;  %5225 = vrot.lane.b32.xlu0 %v9372_v26, %s7045_s11 }
 0x2f5   : > { %5407 = vst.msk [vmem:[#allocation2 + $0xb0] sm:$0xff] %vm5395_vm14, %v5364_v44 }
 0x2f6   : > { %4398 = vrot.lane.b32.xlu1 %v9379_v37, %s9849_s28  ;;  %v5342_v36 = vpop.permute.xlu0 %5341  ;;  %v5284_v37 = vld [vmem:[#allocation3 + $0xa8] sm:$0x1] }
 0x2f7   : > { %5396 = vst.msk [vmem:[#allocation2] sm:$0xff] %vm5395_vm14, %v5342_v36  ;;  %v5339_v32 = vrot.slane %v5284_v37, 1  ;;  %v5646_v36 = vld [vmem:[#allocation2 + $0x38] sm:$0xff] }
 0x2f8   : > { %v4148_v62 = vpop.permute.xlu1 %4147  ;;  %4157 = vrot.lane.b32.xlu0 %v4122_v6, %s7032_s30 }
 0x2f9   : > { %4190 = vst.msk [vmem:[#allocation2 + $0xc0] sm:$0xff] %vm4177_vm8, %v4148_v62  ;;  %v5340_v4 = vsel %vm2726_vm3, %v5337_v30, %v5339_v32  ;;  %vm6066_vm3 = vcmask 261120  }
 0x2fa   : > { %4747 = vrot.lane.b32.xlu1 %v9309_v16, %s7041_s12  ;;  %v4126_v26 = vpop.permute.xlu0 %4125  ;;  %v5664_v16 = vld [vmem:[#allocation2 + $0xc8] sm:$0xff]  ;;  %s9733_s12 = scalar_lea.hbm %s9814_s9, %s9843_s29 }
 0x2fb   : > { %4179 = vst.msk [vmem:[#allocation2 + $0x10] sm:$0xff] %vm4177_vm8, %v4126_v26 }
 0x2fc   : > { %v4389_v11 = vpop.permute.xlu1 %4388  ;;  %4638 = vrot.lane.b32.xlu0 %v4603_v0, %s7042_s26  ;;  %v5661_v19 = vld [vmem:[#allocation2 + $0xb0] sm:$0xff]  ;;  %s6231_s26 = sshll.u32 %s355_s25, 4  ;;  %s6232_s26 = int_to_ptr.vmem [resolvable:$true] %s6231_s26 }
 0x2fd   : > { %4431 = vst.msk [vmem:[#allocation2 + $0xc0] sm:$0xff] %vm4418_vm9, %v4389_v11  ;;  %5929 = vmatmul.mubr.bf16.gmra.mrb[28].mxu1 %v5661_v19 }
 0x2fe   : > { %6546 = vmatprep.mubr.msk.bf16.mxu1 %vm3780_vm0, %v5664_v16  ;;  %v4367_v5 = vpop.permute.xlu0 %4366  ;;  %v5639_v47 = vld [vmem:[#allocation2] sm:$0xff]  ;;  %5227 = vrot.lane.b32.xlu1 %v5192_v39, %s7045_s11  ;;  %v5670_v16 = vld [vmem:[#allocation2 + $0xf8] sm:$0xff]  ;;  %s7049_s11 = smov [#allocation4]  }
 0x2ff   : > { %4420 = vst.msk [vmem:[#allocation2 + $0x10] sm:$0xff] %vm4418_vm9, %v4367_v5  ;;  %5841 = vmatmul.mubr.bf16.vlgmr.msra.gmra.mrb[36].mxu0 %v5639_v47  ;;  %s6940_s18 = sshll.u32 %s7049_s11, 4  ;;  %s6941_s18 = int_to_ptr.vmem [resolvable:$false] %s6940_s18 }
 0x300   : > { %v4629_v2 = vpop.permute.xlu1 %4628  ;;  %6535 = vmatprep.mubr.msk.bf16.mxu0 %vm3780_vm0, %v5642_v33  ;;  %4987 = vrot.lane.b32.xlu0 %v4952_v52, %s7043_s27  ;;  %s6215_s27 = scalar_lea.sflag [#allocation5], %s9723_s20  ;;  %s6942_s0 = scalar_lea.vmem %s6941_s18, 32 }
 0x301   : > { %4671 = vst.msk [vmem:[#allocation2 + $0xc0] sm:$0xff] %vm4658_vm10, %v4629_v2  ;;  %p6943_p0 = scmp.lt.s32.totalorder %s6232_s26, %s6941_s18 }
 0x302   : > { %v4607_v7 = vpop.permute.xlu0 %4606 }
 0x303   : > { %4660 = vst.msk [vmem:[#allocation2 + $0x10] sm:$0xff] %vm4658_vm10, %v4607_v7 }
 0x304   : > { %v4738_v34 = vpop.permute.xlu1 %4737  ;;  %5375 = vrot.lane.b32.xlu0 %v5340_v4, %s7044_s21  ;;  %s6936_s21 = scalar_lea.vmem %s6232_s26, 16 }
 0x305   : > { %4780 = vst.msk [vmem:[#allocation2 + $0xc0] sm:$0xff] %vm4767_vm11, %v4738_v34  ;;  %p6937_p11 = scmp.ne.s32.totalorder %s6232_s26, %s6936_s21  ;;  %p6944_p1 = scmp.lt.s32.totalorder %s6942_s0, %s6936_s21 }
 0x306   : > { %v4716_v23 = vpop.permute.xlu0 %4715 }
 0x307   : > { %4769 = vst.msk [vmem:[#allocation2 + $0x10] sm:$0xff] %vm4767_vm11, %v4716_v23  ;;  %p6938_p12 = pnand %p6937_p11, %p7144_p5  ;;  %p6945_p2 = por %p6944_p1, %p6943_p0 }
 0x308   : > { %v4978_v60 = vpop.permute.xlu1 %4977 }
 0x309   : > { %5020 = vst.msk [vmem:[#allocation2 + $0xc0] sm:$0xff] %vm5007_vm12, %v4978_v60  ;;  %p6939_p13 = pneg %p6938_p12 }
 0x30a   : > { %v4956_v57 = vpop.permute.xlu0 %4955 }
 0x30b   : > { %5009 = vst.msk [vmem:[#allocation2 + $0x10] sm:$0xff] %vm5007_vm12, %v4956_v57  ;;  %p6946_p3 = pnand %p6945_p2, %p6939_p13 }
 0x30c   : > { %v5218_v13 = vpop.permute.xlu1 %5217 }
 0x30d   : > { %5260 = vst.msk [vmem:[#allocation2 + $0xc0] sm:$0xff] %vm5247_vm13, %v5218_v13 }
 0x30e   : > { %v5196_v61 = vpop.permute.xlu0 %5195 }
 0x30f   : > { %5249 = vst.msk [vmem:[#allocation2 + $0x10] sm:$0xff] %vm5247_vm13, %v5196_v61  ;;  %v5672_v61 = vld [vmem:[#allocation2 + $0x108] sm:$0xff] }
 0x310   : > { %v5366_v15 = vpop.permute.xlu1 %5365 }
 0x311   : > { %5408 = vst.msk [vmem:[#allocation2 + $0xc0] sm:$0xff] %vm5395_vm14, %v5366_v15 }
 0x312   : > { %v5344_v53 = vpop.permute.xlu0 %5343 }
 0x313   : > { %5397 = vst.msk [vmem:[#allocation2 + $0x10] sm:$0xff] %vm5395_vm14, %v5344_v53 }
 0x314   : > { %v4150_v27 = vpop.permute.xlu1 %4149 }
 0x315   : > { %4191 = vst.msk [vmem:[#allocation2 + $0xd0] sm:$0xff] %vm4177_vm8, %v4150_v27 }
 0x316   : > { %v4128_v28 = vpop.permute.xlu0 %4127 }
 0x317   : > { %4180 = vst.msk [vmem:[#allocation2 + $0x20] sm:$0xff] %vm4177_vm8, %v4128_v28 }
 0x318   : > { %v4391_v10 = vpop.permute.xlu1 %4390  ;;  %v5663_v46 = vld [vmem:[#allocation2 + $0xc0] sm:$0xff] }
 0x319   : > { %4432 = vst.msk [vmem:[#allocation2 + $0xd0] sm:$0xff] %vm4418_vm9, %v4391_v10  ;;  %5937 = vmatmul.mubr.bf16.gmra.mrb[32].mxu1 %v5663_v46 }
 0x31a   : > { %6547 = vmatprep.mubr.msk.bf16.mxu1 %vm3780_vm0, %v5666_v29  ;;  %v4369_v38 = vpop.permute.xlu0 %4368  ;;  %v5641_v42 = vld [vmem:[#allocation2 + $0x10] sm:$0xff] }
 0x31b   : > { %4421 = vst.msk [vmem:[#allocation2 + $0x20] sm:$0xff] %vm4418_vm9, %v4369_v38  ;;  %5849 = vmatmul.mubr.bf16.gmra.mrb[40].mxu0 %v5641_v42 }
 0x31c   : > { %v4631_v24 = vpop.permute.xlu1 %4630  ;;  %6536 = vmatprep.mubr.msk.bf16.mxu0 %vm3780_vm0, %v5644_v18 }
 0x31d   : > { %4672 = vst.msk [vmem:[#allocation2 + $0xd0] sm:$0xff] %vm4658_vm10, %v4631_v24 }
 0x31e   : > { %v4609_v43 = vpop.permute.xlu0 %4608 }
 0x31f   : > { %4661 = vst.msk [vmem:[#allocation2 + $0x20] sm:$0xff] %vm4658_vm10, %v4609_v43 }
 0x320   : > { %v4740_v21 = vpop.permute.xlu1 %4739 }
 0x321   : > { %4781 = vst.msk [vmem:[#allocation2 + $0xd0] sm:$0xff] %vm4767_vm11, %v4740_v21 }
 0x322   : > { %v4718_v54 = vpop.permute.xlu0 %4717 }
 0x323   : > { %4770 = vst.msk [vmem:[#allocation2 + $0x20] sm:$0xff] %vm4767_vm11, %v4718_v54 }
 0x324   : > { %v4980_v56 = vpop.permute.xlu1 %4979 }
 0x325   : > { %5021 = vst.msk [vmem:[#allocation2 + $0xd0] sm:$0xff] %vm5007_vm12, %v4980_v56 }
 0x326   : > { %v4958_v20 = vpop.permute.xlu0 %4957 }
 0x327   : > { %5010 = vst.msk [vmem:[#allocation2 + $0x20] sm:$0xff] %vm5007_vm12, %v4958_v20 }
 0x328   : > { %v5220_v30 = vpop.permute.xlu1 %5219 }
 0x329   : > { %5261 = vst.msk [vmem:[#allocation2 + $0xd0] sm:$0xff] %vm5247_vm13, %v5220_v30  ;;  %v5674_v30 = vld [vmem:[#allocation2 + $0x118] sm:$0xff] }
 0x32a   : > { %v5198_v3 = vpop.permute.xlu0 %5197 }
 0x32b   : > { %5250 = vst.msk [vmem:[#allocation2 + $0x20] sm:$0xff] %vm5247_vm13, %v5198_v3 }
 0x32c   : > { %v5368_v25 = vpop.permute.xlu1 %5367 }
 0x32d   : > { %5409 = vst.msk [vmem:[#allocation2 + $0xd0] sm:$0xff] %vm5395_vm14, %v5368_v25 }
 0x32e   : > { %v5346_v9 = vpop.permute.xlu0 %5345 }
 0x32f   : > { %5398 = vst.msk [vmem:[#allocation2 + $0x20] sm:$0xff] %vm5395_vm14, %v5346_v9 }
 0x330   : > { %v4152_v22 = vpop.permute.xlu1 %4151 }
 0x331   : > { %4192 = vst.msk [vmem:[#allocation2 + $0xe0] sm:$0xff] %vm4177_vm8, %v4152_v22 }
 0x332   : > { %v4130_v58 = vpop.permute.xlu0 %4129 }
 0x333   : > { %4181 = vst.msk [vmem:[#allocation2 + $0x30] sm:$0xff] %vm4177_vm8, %v4130_v58 }
 0x334   : > { %v4393_v50 = vpop.permute.xlu1 %4392  ;;  %v5665_v1 = vld [vmem:[#allocation2 + $0xd0] sm:$0xff] }
 0x335   : > { %4433 = vst.msk [vmem:[#allocation2 + $0xe0] sm:$0xff] %vm4418_vm9, %v4393_v50  ;;  %5945 = vmatmul.mubr.bf16.gmra.mrb[36].mxu1 %v5665_v1 }
 0x336   : > { %6548 = vmatprep.mubr.msk.bf16.mxu1 %vm3780_vm0, %v5668_v17  ;;  %v4371_v44 = vpop.permute.xlu0 %4370  ;;  %v5643_v51 = vld [vmem:[#allocation2 + $0x20] sm:$0xff] }
 0x337   : > { %4422 = vst.msk [vmem:[#allocation2 + $0x30] sm:$0xff] %vm4418_vm9, %v4371_v44  ;;  %5857 = vmatmul.mubr.bf16.gmra.mrb[44].mxu0 %v5643_v51 }
 0x338   : > { %v4633_v6 = vpop.permute.xlu1 %4632  ;;  %6537 = vmatprep.mubr.msk.bf16.mxu0 %vm3780_vm0, %v5646_v36 }
 0x339   : > { %4673 = vst.msk [vmem:[#allocation2 + $0xe0] sm:$0xff] %vm4658_vm10, %v4633_v6 }
 0x33a   : > { %v4611_v48 = vpop.permute.xlu0 %4610 }
 0x33b   : > { %4662 = vst.msk [vmem:[#allocation2 + $0x30] sm:$0xff] %vm4658_vm10, %v4611_v48 }
 0x33c   : > { %v4742_v12 = vpop.permute.xlu1 %4741 }
 0x33d   : > { %4782 = vst.msk [vmem:[#allocation2 + $0xe0] sm:$0xff] %vm4767_vm11, %v4742_v12 }
 0x33e   : > { %v4720_v63 = vpop.permute.xlu0 %4719 }
 0x33f   : > { %4771 = vst.msk [vmem:[#allocation2 + $0x30] sm:$0xff] %vm4767_vm11, %v4720_v63 }
 0x340   : > { %v4982_v45 = vpop.permute.xlu1 %4981 }
 0x341   : > { %5022 = vst.msk [vmem:[#allocation2 + $0xe0] sm:$0xff] %vm5007_vm12, %v4982_v45 }
 0x342   : > { %v4960_v62 = vpop.permute.xlu0 %4959 }
 0x343   : > { %5011 = vst.msk [vmem:[#allocation2 + $0x30] sm:$0xff] %vm5007_vm12, %v4960_v62 }
 0x344   : > { %v5222_v26 = vpop.permute.xlu1 %5221 }
 0x345   : > { %5262 = vst.msk [vmem:[#allocation2 + $0xe0] sm:$0xff] %vm5247_vm13, %v5222_v26 }
 0x346   : > { %v5200_v37 = vpop.permute.xlu0 %5199 }
 0x347   : > { %5251 = vst.msk [vmem:[#allocation2 + $0x30] sm:$0xff] %vm5247_vm13, %v5200_v37 }
 0x348   : > { %v5370_v40 = vpop.permute.xlu1 %5369 }
 0x349   : > { %5410 = vst.msk [vmem:[#allocation2 + $0xe0] sm:$0xff] %vm5395_vm14, %v5370_v40 }
 0x34a   : > { %v5348_v0 = vpop.permute.xlu0 %5347 }
 0x34b   : > { %5399 = vst.msk [vmem:[#allocation2 + $0x30] sm:$0xff] %vm5395_vm14, %v5348_v0 }
 0x34c   : > { %v4395_v41 = vpop.permute.xlu1 %4394 }
 0x34e   : > { %v4154_v39 = vpop.permute.xlu0 %4153 }
 0x34f   : > { %4193 = vst.msk [vmem:[#allocation2 + $0xf0] sm:$0xff] %vm4177_vm8, %v4154_v39 }
 0x350   : > { %4434 = vst.msk [vmem:[#allocation2 + $0xf0] sm:$0xff] %vm4418_vm9, %v4395_v41  ;;  %v4744_v11 = vpop.permute.xlu1 %4743  ;;  %v5667_v19 = vld [vmem:[#allocation2 + $0xe0] sm:$0xff] }
 0x351   : > { %5953 = vmatmul.mubr.bf16.gmra.mrb[40].mxu1 %v5667_v19 }
 0x352   : > { %6549 = vmatprep.mubr.msk.bf16.mxu1 %vm3780_vm0, %v5670_v16  ;;  %v4635_v32 = vpop.permute.xlu0 %4634  ;;  %v5645_v5 = vld [vmem:[#allocation2 + $0x30] sm:$0xff] }
 0x353   : > { %4674 = vst.msk [vmem:[#allocation2 + $0xf0] sm:$0xff] %vm4658_vm10, %v4635_v32  ;;  %5865 = vmatmul.mubr.bf16.gmra.mrb[48].mxu0 %v5645_v5 }
 0x354   : > { %4783 = vst.msk [vmem:[#allocation2 + $0xf0] sm:$0xff] %vm4767_vm11, %v4744_v11  ;;  %v5224_v47 = vpop.permute.xlu1 %5223 }
 0x356   : > { %v4984_v35 = vpop.permute.xlu0 %4983 }
 0x357   : > { %5023 = vst.msk [vmem:[#allocation2 + $0xf0] sm:$0xff] %vm5007_vm12, %v4984_v35 }
 0x358   : > { %5263 = vst.msk [vmem:[#allocation2 + $0xf0] sm:$0xff] %vm5247_vm13, %v5224_v47  ;;  %v4156_v33 = vpop.permute.xlu1 %4155 }
 0x359   : > { %4194 = vst.msk [vmem:[#allocation2 + $0x100] sm:$0xff] %vm4177_vm8, %v4156_v33 }
 0x35a   : > { %v5372_v52 = vpop.permute.xlu0 %5371 }
 0x35b   : > { %5411 = vst.msk [vmem:[#allocation2 + $0xf0] sm:$0xff] %vm5395_vm14, %v5372_v52 }
 0x35c   : > { %v4637_v59 = vpop.permute.xlu1 %4636 }
 0x35e   : > { %v4397_v4 = vpop.permute.xlu0 %4396 }
 0x35f   : > { %v5874_v2 = vpop.f32.mrb[0].mxu1  ;;  %4435 = vst.msk [vmem:[#allocation2 + $0x100] sm:$0xff] %vm4418_vm9, %v4397_v4 }
 0x360   : > { %v5875_v14 = vadd.f32 %v9640_v55, %v5874_v2  ;;  %v5876_v8 = vpop.f32.mrb[1].mxu1  ;;  %4675 = vst.msk [vmem:[#allocation2 + $0x100] sm:$0xff] %vm4658_vm10, %v4637_v59  ;;  %v4986_v7 = vpop.permute.xlu1 %4985 }
 0x361   : > { %v5877_v49 = vpop.f32.mrb[2].mxu1 }
 0x362   : > { %v5878_v34 = vadd.f32 %v9640_v55, %v5877_v49  ;;  %v5879_v31 = vpop.f32.mrb[3].mxu1  ;;  %v4746_v23 = vpop.permute.xlu0 %4745  ;;  %v5669_v60 = vld [vmem:[#allocation2 + $0xf0] sm:$0xff]  ;;  %v5993_v57 = vmax.f32 %v5875_v14, 0.0 }
 0x363   : > { %4784 = vst.msk [vmem:[#allocation2 + $0x100] sm:$0xff] %vm4767_vm11, %v4746_v23  ;;  %5961 = vmatmul.mubr.bf16.gmra.mrb[44].mxu1 %v5669_v60 }
 0x364   : > { %v5994_v13 = vmax.f32 %v5878_v34, 0.0  ;;  %5024 = vst.msk [vmem:[#allocation2 + $0x100] sm:$0xff] %vm5007_vm12, %v4986_v7  ;;  %v5374_v15 = vpop.permute.xlu1 %5373  ;;  %6550 = vmatprep.mubr.msk.bf16.mxu1 %vm3780_vm0, %v5672_v61 }
 0x366   : > { %v9649_v53 = vpack.c.bf16 %v5994_v13, %v5993_v57  ;;  %v5226_v28 = vpop.permute.xlu0 %5225 }
 0x367   : > { %v5882_v27 = vpop.f32.mrb[4].mxu1  ;;  %5264 = vst.msk [vmem:[#allocation2 + $0x100] sm:$0xff] %vm5247_vm13, %v5226_v28 }
 0x368   : > { %v5883_v10 = vadd.f32 %v9640_v55, %v5882_v27  ;;  %v5884_v46 = vpop.f32.mrb[5].mxu1  ;;  %5412 = vst.msk [vmem:[#allocation2 + $0x100] sm:$0xff] %vm5395_vm14, %v5374_v15  ;;  %v4399_v29 = vpop.permute.xlu1 %4398 }
 0x369   : > { %v5885_v38 = vpop.f32.mrb[6].mxu1  ;;  %v6552_v46 = vld.sshfl [vmem:[%s9807_s2] sm:$0x13 pattern:$0x75316420] }
 0x36a   : > { %v5886_v42 = vadd.f32 %v9640_v55, %v5885_v38  ;;  %v5887_v18 = vpop.f32.mrb[7].mxu1  ;;  %v4158_v24 = vpop.permute.xlu0 %4157  ;;  %v5995_v43 = vmax.f32 %v5883_v10, 0.0  ;;  %v7046_v38 = vmov 1966171168  }
 0x36b   : > { %4195 = vst.msk [vmem:[#allocation2 + $0x110] sm:$0xff] %vm4177_vm8, %v4158_v24  ;;  %v6048_v24 = vcombine.high %v6552_v46, %v6552_v46 }
 0x36c   : > { %v5996_v21 = vmax.f32 %v5886_v42, 0.0  ;;  %4436 = vst.msk [vmem:[#allocation2 + $0x110] sm:$0xff] %vm4418_vm9, %v4399_v29  ;;  %v4748_v56 = vpop.permute.xlu1 %4747  ;;  %v6052_v29 = vlaneseq  ;;  %v6050_v42 = vunpack.c.l.s4 %v7046_v38 }
 0x36e   : > { %v9657_v54 = vpack.c.bf16 %v5996_v21, %v5995_v43  ;;  %v4639_v20 = vpop.permute.xlu0 %4638  ;;  %v6053_v18 = vshrl.u32 %v6052_v29, 7  ;;  %v6051_v43 = vunpack.c.0.s8 %v6050_v42 }
 0x36f   : > { %4676 = vst.msk [vmem:[#allocation2 + $0x110] sm:$0xff] %vm4658_vm10, %v4639_v20  ;;  %v5671_v3 = vld [vmem:[#allocation2 + $0x100] sm:$0xff] }
 0x370   : > { %4785 = vst.msk [vmem:[#allocation2 + $0x110] sm:$0xff] %vm4767_vm11, %v4748_v56  ;;  %5969 = vmatmul.mubr.bf16.gmra.mrb[48].mxu1 %v5671_v3  ;;  %v5228_v25 = vpop.permute.xlu1 %5227  ;;  %v6054_v21 = vsub.s32 %v6051_v43, %v6053_v18 }
 0x371   : > { %6551 = vmatprep.mubr.msk.bf16.mxu1 %vm3780_vm0, %v5674_v30 }
 0x372   : > { %v4988_v9 = vpop.permute.xlu0 %4987  ;;  %v9683_v3 = vrot.slane %v6552_v46, %v6054_v21 }
 0x373   : > { %5025 = vst.msk [vmem:[#allocation2 + $0x110] sm:$0xff] %vm5007_vm12, %v4988_v9 }
 0x374   : > { %5265 = vst.msk [vmem:[#allocation2 + $0x110] sm:$0xff] %vm5247_vm13, %v5228_v25  ;;  %v6062_v25 = vrot.slane %v6048_v24, %v6054_v21 }
 0x376   : > { %v5376_v22 = vpop.permute.xlu0 %5375  ;;  %6102 = vmatprep.mubr.bf16.mxu0 %v6062_v25 }
 0x377   : > { %5413 = vst.msk [vmem:[#allocation2 + $0x110] sm:$0xff] %vm5395_vm14, %v5376_v22  ;;  %v5890_v58 = vpop.f32.mrb[8].mxu1 }
 0x378   : > { %v5891_v50 = vadd.f32 %v9640_v55, %v5890_v58  ;;  %v5892_v1 = vpop.f32.mrb[9].mxu1 }
 0x379   : > { %v5893_v17 = vpop.f32.mrb[10].mxu1 }
 0x37a   : > { %v5894_v44 = vadd.f32 %v9640_v55, %v5893_v17  ;;  %v5895_v51 = vpop.f32.mrb[11].mxu1  ;;  %v5997_v36 = vmax.f32 %v5891_v50, 0.0 }
 0x37c   : > { %v5998_v6 = vmax.f32 %v5894_v44, 0.0 }
 0x37e   : > { %v9667_v48 = vpack.c.bf16 %v5998_v6, %v5997_v36  ;;  %v5673_v12 = vld [vmem:[#allocation2 + $0x110] sm:$0xff] }
 0x37f   : > { %v5898_v63 = vpop.f32.mrb[12].mxu1  ;;  %5977 = vmatmul.mubr.bf16.gmra.mrb[52].mxu1 %v5673_v12 }
 0x380   : > { %v5899_v45 = vadd.f32 %v9640_v55, %v5898_v63  ;;  %v5900_v62 = vpop.f32.mrb[13].mxu1 }
 0x381   : > { %v5901_v26 = vpop.f32.mrb[14].mxu1 }
 0x382   : > { %v5902_v37 = vadd.f32 %v9640_v55, %v5901_v26  ;;  %v5903_v40 = vpop.f32.mrb[15].mxu1  ;;  %v5999_v0 = vmax.f32 %v5899_v45, 0.0 }
 0x384   : > { %v6000_v41 = vmax.f32 %v5902_v37, 0.0 }
 0x386   : > { %v9671_v39 = vpack.c.bf16 %v6000_v41, %v5999_v0 }
 0x396   : > { %v5906_v11 = vpop.f32.mrb[16].mxu1 }
 0x397   : > { %v5907_v19 = vadd.f32 %v9640_v55, %v5906_v11  ;;  %v5908_v16 = vpop.f32.mrb[17].mxu1 }
 0x398   : > { %v5909_v32 = vpop.f32.mrb[18].mxu1 }
 0x399   : > { %v5910_v5 = vadd.f32 %v9640_v55, %v5909_v32  ;;  %v5911_v47 = vpop.f32.mrb[19].mxu1  ;;  %v6001_v35 = vmax.f32 %v5907_v19, 0.0 }
 0x39b   : > { %v6002_v33 = vmax.f32 %v5910_v5, 0.0 }
 0x39d   : > { %v6029_v52 = vpack.c.bf16 %v6002_v33, %v6001_v35 }
 0x39f   : > { %6582 = vmatprep.subr.bf16.mxu0 %v6029_v52 }
 0x3a5   : > { %v5914_v59 = vpop.f32.mrb[20].mxu1 }
 0x3a6   : > { %v5915_v2 = vadd.f32 %v9640_v55, %v5914_v59  ;;  %v5916_v4 = vpop.f32.mrb[21].mxu1 }
 0x3a7   : > { %v5917_v14 = vpop.f32.mrb[22].mxu1 }
 0x3a8   : > { %v5918_v8 = vadd.f32 %v9640_v55, %v5917_v14  ;;  %v5919_v7 = vpop.f32.mrb[23].mxu1  ;;  %v6003_v49 = vmax.f32 %v5915_v2, 0.0 }
 0x3aa   : > { %v6004_v34 = vmax.f32 %v5918_v8, 0.0 }
 0x3ac   : > { %v6030_v31 = vpack.c.bf16 %v6004_v34, %v6003_v49 }
 0x3b7   : > { %v5922_v23 = vpop.f32.mrb[24].mxu1 }
 0x3b8   : > { %v5923_v60 = vadd.f32 %v9640_v55, %v5922_v23  ;;  %v5924_v57 = vpop.f32.mrb[25].mxu1 }
 0x3b9   : > { %v5925_v13 = vpop.f32.mrb[26].mxu1 }
 0x3ba   : > { %v5926_v61 = vadd.f32 %v9640_v55, %v5925_v13  ;;  %v5927_v15 = vpop.f32.mrb[27].mxu1  ;;  %v6005_v27 = vmax.f32 %v5923_v60, 0.0 }
 0x3bc   : > { %v6006_v28 = vmax.f32 %v5926_v61, 0.0 }
 0x3be   : > { %v6031_v10 = vpack.c.bf16 %v6006_v28, %v6005_v27 }
 0x3d0   : > { %v5930_v56 = vpop.f32.mrb[28].mxu1 }
 0x3d1   : > { %v5931_v20 = vadd.f32 %v9640_v55, %v5930_v56  ;;  %v5932_v30 = vpop.f32.mrb[29].mxu1 }
 0x3d2   : > { %v5842_v9 = vpop.f32.mrb[36].mxu0  ;;  %v5933_v22 = vpop.f32.mrb[30].mxu1 }
 0x3d3   : > { %v5843_v58 = vadd.f32 %v9640_v55, %v5842_v9  ;;  %v5934_v50 = vadd.f32 %v9640_v55, %v5933_v22  ;;  %v5844_v1 = vpop.f32.mrb[37].mxu0  ;;  %v5935_v17 = vpop.f32.mrb[31].mxu1  ;;  %v6007_v51 = vmax.f32 %v5931_v20, 0.0 }
 0x3d4   : > { %v5845_v44 = vpop.f32.mrb[38].mxu0 }
 0x3d5   : > { %v6008_v36 = vmax.f32 %v5934_v50, 0.0  ;;  %v5846_v6 = vadd.f32 %v9640_v55, %v5845_v44  ;;  %v5847_v12 = vpop.f32.mrb[39].mxu0  ;;  %v5985_v63 = vmax.f32 %v5843_v58, 0.0 }
 0x3d7   : > { %v6032_v45 = vpack.c.bf16 %v6008_v36, %v6007_v51  ;;  %v5986_v62 = vmax.f32 %v5846_v6, 0.0 }
 0x3d9   : > { %v6021_v26 = vpack.c.bf16 %v5986_v62, %v5985_v63 }
 0x3db   : > { %6583 = vmatpush3.bf16.msra.mxu0 %v6021_v26 }
 0x3dc   : > { %6584 = vmatprep.subr.bf16.mxu0 %v6030_v31 }
 0x3ec   : > { %v5938_v37 = vpop.f32.mrb[32].mxu1 }
 0x3ed   : > { %v5939_v40 = vadd.f32 %v9640_v55, %v5938_v37  ;;  %v5940_v0 = vpop.f32.mrb[33].mxu1 }
 0x3ee   : > { %v5850_v41 = vpop.f32.mrb[40].mxu0  ;;  %v5941_v11 = vpop.f32.mrb[34].mxu1 }
 0x3ef   : > { %v5851_v19 = vadd.f32 %v9640_v55, %v5850_v41  ;;  %v5942_v16 = vadd.f32 %v9640_v55, %v5941_v11  ;;  %v5852_v32 = vpop.f32.mrb[41].mxu0  ;;  %v5943_v5 = vpop.f32.mrb[35].mxu1  ;;  %v6009_v35 = vmax.f32 %v5939_v40, 0.0 }
 0x3f0   : > { %v5853_v47 = vpop.f32.mrb[42].mxu0 }
 0x3f1   : > { %v6010_v33 = vmax.f32 %v5942_v16, 0.0  ;;  %v5854_v52 = vadd.f32 %v9640_v55, %v5853_v47  ;;  %v5855_v59 = vpop.f32.mrb[43].mxu0  ;;  %v5987_v2 = vmax.f32 %v5851_v19, 0.0 }
 0x3f3   : > { %v6033_v4 = vpack.c.bf16 %v6010_v33, %v6009_v35  ;;  %v5988_v14 = vmax.f32 %v5854_v52, 0.0 }
 0x3f5   : > { %v6022_v8 = vpack.c.bf16 %v5988_v14, %v5987_v2 }
 0x3f7   : > { %6585 = vmatpush3.bf16.msra.mxu0 %v6022_v8 }
 0x3f8   : > { %6586 = vmatprep.subr.bf16.mxu0 %v6031_v10 }
 0x408   : > { %v5946_v7 = vpop.f32.mrb[36].mxu1 }
 0x409   : > { %v5947_v49 = vadd.f32 %v9640_v55, %v5946_v7  ;;  %v5948_v34 = vpop.f32.mrb[37].mxu1 }
 0x40a   : > { %v5858_v31 = vpop.f32.mrb[44].mxu0  ;;  %v5949_v23 = vpop.f32.mrb[38].mxu1  ;;  %v6063_v34 = vcombine.high %v9683_v3, %v9683_v3 }
 0x40b   : > { %v5859_v60 = vadd.f32 %v9640_v55, %v5858_v31  ;;  %v5950_v57 = vadd.f32 %v9640_v55, %v5949_v23  ;;  %v5860_v13 = vpop.f32.mrb[45].mxu0  ;;  %v5951_v61 = vpop.f32.mrb[39].mxu1  ;;  %v6011_v27 = vmax.f32 %v5947_v49, 0.0  ;;  %v6933_v31 = vld [vmem:[%s9812_s7] sm:$0xff]  }
 0x40c   : > { %v5861_v15 = vpop.f32.mrb[46].mxu0 }
 0x40d   : > { %v6012_v28 = vmax.f32 %v5950_v57, 0.0  ;;  %v5862_v46 = vadd.f32 %v9640_v55, %v5861_v15  ;;  %v5863_v29 = vpop.f32.mrb[47].mxu0  ;;  %v5989_v38 = vmax.f32 %v5859_v60, 0.0 }
 0x40f   : > { %v6034_v10 = vpack.c.bf16 %v6012_v28, %v6011_v27  ;;  %v5990_v42 = vmax.f32 %v5862_v46, 0.0 }
 0x411   : > { %v6023_v18 = vpack.c.bf16 %v5990_v42, %v5989_v38 }
 0x413   : > { %6587 = vmatpush3.bf16.msra.mxu0 %v6023_v18 }
 0x414   : > { %6588 = vmatprep.subr.bf16.mxu0 %v6032_v45 }
 0x424   : > { %v5954_v24 = vpop.f32.mrb[40].mxu1 }
 0x425   : > { %v5955_v43 = vadd.f32 %v9640_v55, %v5954_v24  ;;  %v5956_v21 = vpop.f32.mrb[41].mxu1 }
 0x426   : > { %v5866_v56 = vpop.f32.mrb[48].mxu0  ;;  %v5957_v20 = vpop.f32.mrb[42].mxu1 }
 0x427   : > { %v5867_v30 = vadd.f32 %v9640_v55, %v5866_v56  ;;  %v5958_v25 = vadd.f32 %v9640_v55, %v5957_v20  ;;  %v5868_v9 = vpop.f32.mrb[49].mxu0  ;;  %v5959_v22 = vpop.f32.mrb[43].mxu1  ;;  %v6013_v50 = vmax.f32 %v5955_v43, 0.0 }
 0x428   : > { %v5869_v58 = vpop.f32.mrb[50].mxu0 }
 0x429   : > { %v6014_v1 = vmax.f32 %v5958_v25, 0.0  ;;  %v5870_v17 = vadd.f32 %v9640_v55, %v5869_v58  ;;  %v5871_v44 = vpop.f32.mrb[51].mxu0  ;;  %v5991_v51 = vmax.f32 %v5867_v30, 0.0 }
 0x42b   : > { %v6035_v36 = vpack.c.bf16 %v6014_v1, %v6013_v50  ;;  %v5992_v6 = vmax.f32 %v5870_v17, 0.0 }
 0x42d   : > { %v6024_v12 = vpack.c.bf16 %v5992_v6, %v5991_v51 }
 0x42f   : > { %6589 = vmatpush3.bf16.msra.mxu0 %v6024_v12 }
 0x430   : > { %6590 = vmatprep.subr.bf16.mxu0 %v6033_v4 }
 0x433   : > { %6591 = vmatpush3.bf16.msra.mxu0 %v9649_v53  ;;  %v7047_v53 = vmov 0.0  }
 0x434   : > { %6592 = vmatprep.subr.bf16.mxu0 %v6034_v10 }
 0x436   : > { %v5962_v63 = vpop.f32.mrb[44].mxu1 }
 0x437   : > { %v5963_v45 = vadd.f32 %v9640_v55, %v5962_v63  ;;  %v5964_v62 = vpop.f32.mrb[45].mxu1  ;;  %6593 = vmatpush3.bf16.msra.mxu0 %v9657_v54 }
 0x438   : > { %v5965_v26 = vpop.f32.mrb[46].mxu1  ;;  %6594 = vmatprep.subr.bf16.mxu0 %v6035_v36 }
 0x439   : > { %v5966_v37 = vadd.f32 %v9640_v55, %v5965_v26  ;;  %v5967_v40 = vpop.f32.mrb[47].mxu1  ;;  %v6015_v0 = vmax.f32 %v5963_v45, 0.0 }
 0x43b   : > { %v6016_v41 = vmax.f32 %v5966_v37, 0.0  ;;  %6595 = vmatpush3.bf16.msra.mxu0 %v9667_v48 }
 0x43d   : > { %v6036_v11 = vpack.c.bf16 %v6016_v41, %v6015_v0 }
 0x43f   : > { %6596 = vmatprep.subr.bf16.mxu0 %v6036_v11 }
 0x440   : > { %6597 = vmatpush3.bf16.msra.mxu0 %v9671_v39 }
 0x441   : > { %6652 = vmatprep.subr.bf16.mxu0 %v7047_v53 }
 0x443   : > { %v5970_v19 = vpop.f32.mrb[48].mxu1  ;;  %6103 = vmatmul.mubr.bf16.vlgmr.msra.gmra.mrb[52].mxu0 %v9683_v3 }
 0x444   : > { %v5971_v54 = vadd.f32 %v9640_v55, %v5970_v19  ;;  %v5972_v16 = vpop.f32.mrb[49].mxu1  ;;  %6656 = vmatprep.mubr.msk.bf16.mxu0 %vm7048_vm2, %v7047_v53 }
 0x445   : > { %v5973_v32 = vpop.f32.mrb[50].mxu1 }
 0x446   : > { %v5974_v5 = vadd.f32 %v9640_v55, %v5973_v32  ;;  %v5975_v47 = vpop.f32.mrb[51].mxu1  ;;  %v6017_v48 = vmax.f32 %v5971_v54, 0.0 }
 0x448   : > { %v6018_v35 = vmax.f32 %v5974_v5, 0.0 }
 0x44a   : > { %v6037_v33 = vpack.c.bf16 %v6018_v35, %v6017_v48 }
 0x44c   : > { %6653 = vmatpush3.bf16.msra.mxu0 %v6037_v33 }
 0x44d   : > { %6654 = vmatprep.subr.bf16.mxu0 %v7047_v53 }
 0x452   : > { %v5978_v39 = vpop.f32.mrb[52].mxu1 }
 0x453   : > { %v5979_v52 = vadd.f32 %v9640_v55, %v5978_v39  ;;  %v5980_v59 = vpop.f32.mrb[53].mxu1 }
 0x454   : > { %v5981_v2 = vpop.f32.mrb[54].mxu1 }
 0x455   : > { %v5982_v4 = vadd.f32 %v9640_v55, %v5981_v2  ;;  %v5983_v14 = vpop.f32.mrb[55].mxu1  ;;  %v6019_v8 = vmax.f32 %v5979_v52, 0.0  ;;  %v6934_v55 = vld [vmem:[%s9812_s7 + $0x8] sm:$0xff]  }
 0x457   : > { %v6020_v7 = vmax.f32 %v5982_v4, 0.0 }
 0x459   : > { %v6038_v49 = vpack.c.bf16 %v6020_v7, %v6019_v8 }
 0x45b   : > { %6655 = vmatpush3.bf16.msra.mxu0 %v6038_v49 }
 0x45c   : > { %6660 = vmatprep.subr.bf16.mxu0 %v7047_v53 }
 0x45e   : > { %6657 = vmatmul.mubr.msk.bf16.vlgmr.msra.gmra.mrb[56].mxu0 %vm6066_vm3, %v6063_v34 }
 0x45f   : > { %6664 = vmatprep.mubr.msk.bf16.mxu0 %vm7048_vm2, %v7047_v53  ;;  %6661 = vmatpush3.bf16.msra.mxu0 %v6933_v31 }
 0x460   : > { %6662 = vmatprep.subr.bf16.mxu0 %v7047_v53 }
 0x463   : > { %6663 = vmatpush3.bf16.msra.mxu0 %v6934_v55 }
 0x516   : > { %v6598_v3 = vpop.f32.mrb[52].mxu0 }
 0x517   : > { %v6599_v23 = vpop.f32.mrb[53].mxu0 }
 0x518   : > { %v6600_v60 = vadd.f32 %v6599_v23, %v6598_v3  ;;  %v6601_v57 = vpop.f32.mrb[54].mxu0 }
 0x519   : > { %v6602_v13 = vpop.f32.mrb[55].mxu0 }
 0x531   : > { %v6144_v61 = vpop.f32.mrb[56].mxu0 }
 0x532   : > { %v6145_v15 = vadd.f32 %v6600_v60, %v6144_v61  ;;  %v6658_v27 = vpop.f32.mrb[57].mxu0 }
 0x533   : > { %v6147_v28 = vpop.f32.mrb[58].mxu0 }
 0x534   : > { %v6152_v46 = vpack.c.bf16 %v6145_v15, %v6145_v15  ;;  %v6659_v29 = vpop.f32.mrb[59].mxu0  ;;  %6151 = vst.msk [vmem:[%s355_s25] sm:$0x1] %vm6150_vm4, %v6145_v15 }
 0x536   : > { %6665 = vmatmul.mubr.msk.bf16.vlgmr.msra.gmra.mrb[60].mxu0 %vm6066_vm3, %v6152_v46 }
 0x537   : > { %6949 = shalt.err (!%p6946_p3)
}
 0x538   : > { %s6950_s25 = scalar_lea.hbm %s9733_s12, 16  ;;  %s6954_s11 = scalar_lea.hbm %s9814_s9, 32 }
 0x539   : > { %p6951_p4 = scmp.ne.s32.totalorder %s9733_s12, %s6950_s25  ;;  %p6955_p9 = scmp.lt.u32.totalorder %s9733_s12, %s9814_s9 }
 0x53a   : > { %p6956_p10 = scmp.lt.u32.totalorder %s6954_s11, %s6950_s25  ;;  %p6958_p12 = scmp.lt.u32.totalorder %s6950_s25, %s9733_s12 }
 0x53b   : > { %p6952_p7 = pnand %p6951_p4, %p7144_p5 }
 0x53c   : > { %p6957_p11 = por %p6956_p10, %p6955_p9 }
 0x53d   : > { %p6953_p8 = pneg %p6952_p7 }
 0x53e   : > { %p6959_p13 = por %p6958_p12, %p6957_p11 }
 0x540   : > { %p6960_p0 = pnand %p6959_p13, %p6953_p8 }
 0x542   : > { %6963 = shalt.err (!%p6960_p0)
}
 0x543   : > { %6688 = dma.vmem_to_hbm [thread:$0]  (%p7144_p5), %s6232_s26, 16, %s9733_s12, %s6215_s27   ;;  %v6157_v38 = vld [vmem:[%s9813_s8] sm:$0x1] }
 0x544   : > { %s361_s29 = scalar_lea.vmem [#allocation6], %s9723_s20  ;;  %s9873_s25 = sshll.u32 %s7127_s17, 4 }
 0x545   : > { %s6244_s30 = sshll.u32 %s361_s29, 4  ;;  %s9762_s18 = scalar_lea.hbm %s9815_s10, %s9873_s25  ;;  %s9764_s30 = int_to_ptr.vmem [resolvable:$true] %s6244_s30 }
 0x546   : > { %s6219_s12 = scalar_lea.sflag [#allocation7], %s9723_s20  ;;  %s6964_s26 = scalar_lea.vmem %s9764_s30, 16 }
 0x547   : > { %p6965_p1 = scmp.ne.s32.totalorder %s9764_s30, %s6964_s26  ;;  %s7050_s17 = smov [#allocation6]  }
 0x548   : > { %s6968_s27 = sshll.u32 %s7050_s17, 4  ;;  %s6969_s27 = int_to_ptr.vmem [resolvable:$false] %s6968_s27 }
 0x549   : > { %p6966_p2 = pnand %p6965_p1, %p7144_p5  ;;  %s6970_s0 = scalar_lea.vmem %s6969_s27, 32 }
 0x54a   : > { %p6971_p4 = scmp.lt.s32.totalorder %s9764_s30, %s6969_s27  ;;  %p6972_p7 = scmp.lt.s32.totalorder %s6970_s0, %s6964_s26 }
 0x54b   : > { %p6967_p3 = pneg %p6966_p2 }
 0x54c   : > { %p6973_p8 = por %p6972_p7, %p6971_p4 }
 0x54e   : > { %p6974_p9 = pnand %p6973_p8, %p6967_p3 }
 0x609   : > { %v6207_v10 = vpop.f32.mrb[60].mxu0 }
 0x60a   : > { %v6208_v42 = vadd.f32 %v6207_v10, %v6157_v38  ;;  %v6666_v18 = vpop.f32.mrb[61].mxu0 }
 0x60b   : > { %v6210_v24 = vpop.f32.mrb[62].mxu0 }
 0x60c   : > { %6213 = vst [vmem:[%s361_s29] sm:$0x1] %v6208_v42  ;;  %v6667_v43 = vpop.f32.mrb[63].mxu0 }
 0x60d   : > { %6977 = shalt.err (!%p6974_p9)
}
 0x60e   : > { %s6978_s20 = scalar_lea.hbm %s9762_s18, 16  ;;  %s6982_s25 = scalar_lea.hbm %s9815_s10, 32 }
 0x60f   : > { %p6979_p10 = scmp.ne.s32.totalorder %s9762_s18, %s6978_s20  ;;  %p6983_p13 = scmp.lt.u32.totalorder %s9762_s18, %s9815_s10 }
 0x610   : > { %p6984_p0 = scmp.lt.u32.totalorder %s6982_s25, %s6978_s20  ;;  %p6986_p2 = scmp.lt.u32.totalorder %s6978_s20, %s9762_s18 }
 0x611   : > { %p6980_p11 = pnand %p6979_p10, %p7144_p5 }
 0x612   : > { %p6985_p1 = por %p6984_p0, %p6983_p13 }
 0x613   : > { %p6981_p12 = pneg %p6980_p11 }
 0x614   : > { %p6987_p3 = por %p6986_p2, %p6985_p1 }
 0x616   : > { %p6988_p4 = pnand %p6987_p3, %p6981_p12 }
 0x618   : > { %6991 = shalt.err (!%p6988_p4)
}
 0x619   : > { %6689 = dma.vmem_to_hbm [thread:$0]  (%p7144_p5), %s9764_s30, 16, %s9762_s18, %s6219_s12  }
 0x61a PF: > { %p6699_p7 = scmp.ge.s32.totalorder %s7030_s16, 2  ;;  %s6256_s26 = sand.u32 1, %s7018_s13  }
 0x61b   : > { %s6257_s17 = scalar_lea.sflag [#allocation5], %s6256_s26 }
 0x61c   : > { %p6693_p8 = pnand %p6699_p7, %p7148_p6 }
 0x61e   : > { %7009 = dma.done.wait (!%p6693_p8), %s6257_s17, 16  }
 0x61f   : > { %7011 = vsyncadd (!%p6693_p8), %s6257_s17, 4294967280  ;;  %s6265_s27 = scalar_lea.sflag [#allocation7], %s6256_s26 }
 0x620   : > { %7013 = dma.done.wait (!%p6693_p8), %s6265_s27, 16  }
 0x621   : > { %7015 = vsyncadd (!%p6693_p8), %s6265_s27, 4294967280  ;;  %p24_p5 = scmp.ge.s32.totalorder %s7131_s19, 4   ;;  %s9874_s13 = smov %s7022_s14 }
 0x622   : > { %s9875_s14 = smov %s7026_s15  ;;  %s9876_s15 = smov %s7142_s22 }
 0x623   : > { %s9877_s16 = smov %s7131_s19  ;;  %26 = sbr.rel (!%p24_p5) target bundleno = 7 (0x7), region = 108 }
 0x62a   :  { %6269 = vsyncpa [#allocation5], 1 }
 0x62b   :  { %6271 = vsyncpa [#allocation5 + $0x1], 1 }
 0x62c   :  { %6272 = vsyncpa [#allocation7], 1 }
 0x62d   :  { %6274 = vsyncpa [#allocation7 + $0x1], 1 }

</bundles_post_ra>
